<compile_context>
chip_gen: v6e
topology: v6e:2x2x1
jax: 0.10.0
libtpu: 0.0.40
codegen_flags: <defaults>
</compile_context>

<pallas_src>
import functools

import jax
import jax.numpy as jnp
import numpy as np
from jax import lax
from jax.experimental import pallas as pl
from jax.experimental.pallas import tpu as pltpu

NEG_SLOPE = 0.01   # nn.LeakyReLU default negative_slope
BN_EPS = 1e-5      # nn.BatchNorm2d default eps
LANE = 128         # TPU lane width


def _round_up(x, m):
    return ((x + m - 1) // m) * m


# --------------------------------------------------------------------------- #
# Fused Pallas kernel: [conv3x3 + BN + LeakyReLU] x 2, one batch element/step  #
# --------------------------------------------------------------------------- #
def _conv_block_kernel(x_ref, w1_ref, s1_ref, b1_ref, w2_ref, s2_ref, b2_ref,
                       out_ref, pad1_ref, pad2_ref, col1_ref, col2_ref,
                       *, H, W, Cin, Cp):
    # x_ref   : (1, H, W, Cin)      input tile (one batch element), NHWC
    # w1_ref  : (9*Cin, Cp)         conv1 taps packed (tap-major, channel-minor)
    # s1,b1   : (1, Cp)             folded BN1 scale / (conv-bias+BN1) bias
    # w2_ref  : (9*Cp, Cp)          conv2 taps packed (padded input channels)
    # s2,b2   : (1, Cp)
    # out_ref : (1, H, W, Cp)       lane-dense output block
    # pad1_ref: (H+2, W+2, Cin)     VMEM scratch, zero-padded input (conv1 halo)
    # pad2_ref: (H+2, W+2, Cp)      VMEM scratch, zero-padded stage-1 activation
    # col1_ref: (H*W, 9*Cin)        VMEM scratch, im2col for conv1
    # col2_ref: (H*W, 9*Cp)         VMEM scratch, im2col for conv2

    # ---------------- stage 1: conv1 + BN1 + LeakyReLU ---------------------- #
    # Build the 1-pixel halo in VMEM (replaces the wrapper-side jnp.pad).
    pad1_ref[...] = jnp.zeros_like(pad1_ref)
    pad1_ref[1:H + 1, 1:W + 1, :] = x_ref[0]

    # im2col: nine shifted (H, W, Cin) windows become columns of (H*W, 9*Cin).
    k = 0
    for dy in range(3):
        for dx in range(3):
            col1_ref[:, k * Cin:(k + 1) * Cin] = (
                pad1_ref[dy:dy + H, dx:dx + W, :].reshape(H * W, Cin))
            k += 1

    # One MXU matmul (K = 9*Cin) + fused conv-bias / BN affine + LeakyReLU.
    y1 = jnp.dot(col1_ref[...], w1_ref[...], preferred_element_type=jnp.float32)
    y1 = y1 * s1_ref[0] + b1_ref[0]
    y1 = jnp.where(y1 >= 0, y1, NEG_SLOPE * y1)            # (H*W, Cp), lane dense

    # ---------------- stage 2: conv2 + BN2 + LeakyReLU ---------------------- #
    # Stage-1 activation stays in VMEM (zero halo) -- no HBM round trip.
    pad2_ref[...] = jnp.zeros_like(pad2_ref)
    pad2_ref[1:H + 1, 1:W + 1, :] = y1.reshape(H, W, Cp)

    k = 0
    for dy in range(3):
        for dx in range(3):
            col2_ref[:, k * Cp:(k + 1) * Cp] = (
                pad2_ref[dy:dy + H, dx:dx + W, :].reshape(H * W, Cp))
            k += 1

    y2 = jnp.dot(col2_ref[...], w2_ref[...], preferred_element_type=jnp.float32)
    y2 = y2 * s2_ref[0] + b2_ref[0]
    y2 = jnp.where(y2 >= 0, y2, NEG_SLOPE * y2)            # (H*W, Cp), lane dense

    out_ref[0] = y2.reshape(H, W, Cp).astype(out_ref.dtype)


# --------------------------------------------------------------------------- #
# Parameter folding / packing (glue, plain JAX)                                #
# --------------------------------------------------------------------------- #
def _fold_bn_pack(w_oihw, b_conv, bn, cin_pad, cout_pad):
    """Fold conv bias + frozen BN into scale/bias; pack+pad weights to
    (9*cin_pad, cout_pad) with tap-major / channel-minor row ordering."""
    gamma, beta, mean, var = bn
    cout, cin = w_oihw.shape[0], w_oihw.shape[1]
    w9 = jnp.transpose(w_oihw, (2, 3, 1, 0)).reshape(9, cin, cout)   # HWIO taps
    scale = gamma / jnp.sqrt(var + BN_EPS)
    bias = scale * (b_conv - mean) + beta
    w9p = jnp.zeros((9, cin_pad, cout_pad), jnp.float32).at[:, :cin, :cout].set(w9)
    sp = jnp.zeros((1, cout_pad), jnp.float32).at[0, :cout].set(scale)
    bp = jnp.zeros((1, cout_pad), jnp.float32).at[0, :cout].set(bias)
    return w9p.reshape(9 * cin_pad, cout_pad), sp, bp


def make_conv_block_params(key, in_c, out_c):
    ks = jax.random.split(key, 12)

    def conv_params(kw, kb, cin, cout):
        fan_in = cin * 9
        bound = 1.0 / np.sqrt(fan_in)
        w = jax.random.uniform(kw, (cout, cin, 3, 3), jnp.float32, -bound, bound)
        b = jax.random.uniform(kb, (cout,), jnp.float32, -bound, bound)
        return w, b

    def bn_params(kg, kb, km, kv, c):
        gamma = 1.0 + 0.1 * jax.random.normal(kg, (c,), jnp.float32)
        beta = 0.1 * jax.random.normal(kb, (c,), jnp.float32)
        mean = 0.1 * jax.random.normal(km, (c,), jnp.float32)
        var = 0.5 + jnp.abs(jax.random.normal(kv, (c,), jnp.float32))
        return gamma, beta, mean, var

    w1, b1 = conv_params(ks[0], ks[1], in_c, out_c)
    w2, b2 = conv_params(ks[2], ks[3], out_c, out_c)
    bn1 = bn_params(ks[4], ks[5], ks[6], ks[7], out_c)
    bn2 = bn_params(ks[8], ks[9], ks[10], ks[11], out_c)
    return dict(w1=w1, b1=b1, bn1=bn1, w2=w2, b2=b2, bn2=bn2)


# --------------------------------------------------------------------------- #
# Forward: PyTorch-style NCHW in / NCHW out, one fused pallas_call             #
# --------------------------------------------------------------------------- #
def conv_block_forward(params, x_nchw):
    N, Cin, H, W = x_nchw.shape
    Cout = params["w1"].shape[0]
    Cp = _round_up(Cout, LANE)          # lane-width-padded channel count

    x = jnp.transpose(x_nchw, (0, 2, 3, 1))                 # NCHW -> NHWC

    w1p, s1, b1 = _fold_bn_pack(params["w1"], params["b1"], params["bn1"], Cin, Cp)
    w2p, s2, b2 = _fold_bn_pack(params["w2"], params["b2"], params["bn2"], Cp, Cp)

    kernel = functools.partial(_conv_block_kernel, H=H, W=W, Cin=Cin, Cp=Cp)
    out = pl.pallas_call(
        kernel,
        out_shape=jax.ShapeDtypeStruct((N, H, W, Cp), jnp.float32),
        grid_spec=pltpu.PrefetchScalarGridSpec(
            num_scalar_prefetch=0,
            grid=(N,),                                       # one step per batch element
            in_specs=[
                pl.BlockSpec((1, H, W, Cin), lambda b: (b, 0, 0, 0)),
                # weights / scales / biases: constant index_map -> stay resident
                pl.BlockSpec((9 * Cin, Cp), lambda b: (0, 0)),
                pl.BlockSpec((1, Cp), lambda b: (0, 0)),
                pl.BlockSpec((1, Cp), lambda b: (0, 0)),
                pl.BlockSpec((9 * Cp, Cp), lambda b: (0, 0)),
                pl.BlockSpec((1, Cp), lambda b: (0, 0)),
                pl.BlockSpec((1, Cp), lambda b: (0, 0)),
            ],
            out_specs=pl.BlockSpec((1, H, W, Cp), lambda b: (b, 0, 0, 0)),
            scratch_shapes=[
                pltpu.VMEM((H + 2, W + 2, Cin), jnp.float32),   # padded input (halo)
                pltpu.VMEM((H + 2, W + 2, Cp), jnp.float32),    # padded stage-1 act
                pltpu.VMEM((H * W, 9 * Cin), jnp.float32),      # im2col, conv1
                pltpu.VMEM((H * W, 9 * Cp), jnp.float32),       # im2col, conv2
            ],
        ),
        compiler_params=pltpu.CompilerParams(
            dimension_semantics=("parallel",)),
    )(x, w1p, s1, b1, w2p, s2, b2)

    out = out[..., :Cout]                                    # drop lane padding
    return jnp.transpose(out, (0, 3, 1, 2))                  # NHWC -> NCHW


# --------------------------------------------------------------------------- #
# Pure-JAX reference (for correctness check)                                   #
# --------------------------------------------------------------------------- #
def conv_block_reference(params, x_nchw):
    def stage(x, w_oihw, b_conv, bn):
        gamma, beta, mean, var = bn
        y = lax.conv_general_dilated(
            x, w_oihw, window_strides=(1, 1), padding=((1, 1), (1, 1)),
            dimension_numbers=("NCHW", "OIHW", "NCHW"))
        y = y + b_conv[None, :, None, None]
        y = (y - mean[None, :, None, None]) / jnp.sqrt(var + BN_EPS)[None, :, None, None]
        y = gamma[None, :, None, None] * y + beta[None, :, None, None]
        return jnp.where(y >= 0, y, NEG_SLOPE * y)

    x = stage(x_nchw, params["w1"], params["b1"], params["bn1"])
    x = stage(x, params["w2"], params["b2"], params["bn2"])
    return x


if __name__ == "__main__":
    key = jax.random.PRNGKey(0)
    kx, kp = jax.random.split(key)

    N, Cin, Cout, H, W = 2, 4, 8, 16, 16
    x = jax.random.normal(kx, (N, Cin, H, W), jnp.float32)   # PyTorch-style NCHW
    params = make_conv_block_params(kp, Cin, Cout)

    out = jax.block_until_ready(conv_block_forward(params, x))
    ref = jax.block_until_ready(conv_block_reference(params, x))
    np.testing.assert_allclose(np.asarray(out), np.asarray(ref), rtol=1e-3, atol=1e-3)

    print("KERNEL_OK")
</pallas_src>

<mosaic_0001>
module attributes {stable_mosaic.version = 11 : i64} {
  func.func @_conv_block_kernel(%arg0: i32, %arg1: memref<1x16x16x4xf32, #tpu.memory_space<vmem>>, %arg2: memref<36x128xf32, #tpu.memory_space<vmem>>, %arg3: memref<1x128xf32, #tpu.memory_space<vmem>>, %arg4: memref<1x128xf32, #tpu.memory_space<vmem>>, %arg5: memref<1152x128xf32, #tpu.memory_space<vmem>>, %arg6: memref<1x128xf32, #tpu.memory_space<vmem>>, %arg7: memref<1x128xf32, #tpu.memory_space<vmem>>, %arg8: memref<1x16x16x128xf32, #tpu.memory_space<vmem>>, %arg9: memref<18x18x4xf32, #tpu.memory_space<vmem>>, %arg10: memref<18x18x128xf32, #tpu.memory_space<vmem>>, %arg11: memref<256x36xf32, #tpu.memory_space<vmem>>, %arg12: memref<256x1152xf32, #tpu.memory_space<vmem>>) attributes {dimension_semantics = [#tpu.dimension_semantics<parallel>], iteration_bounds = array<i64: 2>, scalar_prefetch = 0 : i64, scratch_operands = 4 : i64, tpu.core_type = #tpu.core_type<tc>, window_params = [{transform_indices = @transform_0, window_bounds = array<i64: 1, 16, 16, 4>}, {pipeline_mode = #tpu.pipeline_mode<synchronous>, transform_indices = @transform_1, window_bounds = array<i64: 36, 128>}, {pipeline_mode = #tpu.pipeline_mode<synchronous>, transform_indices = @transform_2, window_bounds = array<i64: 1, 128>}, {pipeline_mode = #tpu.pipeline_mode<synchronous>, transform_indices = @transform_3, window_bounds = array<i64: 1, 128>}, {pipeline_mode = #tpu.pipeline_mode<synchronous>, transform_indices = @transform_4, window_bounds = array<i64: 1152, 128>}, {pipeline_mode = #tpu.pipeline_mode<synchronous>, transform_indices = @transform_5, window_bounds = array<i64: 1, 128>}, {pipeline_mode = #tpu.pipeline_mode<synchronous>, transform_indices = @transform_6, window_bounds = array<i64: 1, 128>}, {transform_indices = @transform_7, window_bounds = array<i64: 1, 16, 16, 128>}]} {
    %cst = arith.constant 0.000000e+00 : f32
    %0 = vector.broadcast %cst : f32 to vector<18x18x4xf32>
    %c0 = arith.constant 0 : index
    %c0_0 = arith.constant 0 : index
    %c0_1 = arith.constant 0 : index
    %1 = vector.load %arg9[%c0, %c0_0, %c0_1] : memref<18x18x4xf32, #tpu.memory_space<vmem>>, vector<18x18x4xf32>
    tpu.vector_store %arg9[%c0, %c0_0, %c0_1], %0 {strides = array<i32>} : memref<18x18x4xf32, #tpu.memory_space<vmem>>, vector<18x18x4xf32>,
    %c0_2 = arith.constant 0 : index
    %c0_3 = arith.constant 0 : index
    %c0_4 = arith.constant 0 : index
    %c0_5 = arith.constant 0 : index
    %2 = vector.load %arg1[%c0_2, %c0_3, %c0_4, %c0_5] : memref<1x16x16x4xf32, #tpu.memory_space<vmem>>, vector<1x16x16x4xf32>
    %3 = vector.shape_cast %2 : vector<1x16x16x4xf32> to vector<16x16x4xf32>
    %c1 = arith.constant 1 : index
    %c1_6 = arith.constant 1 : index
    %c0_7 = arith.constant 0 : index
    %4 = vector.load %arg9[%c1, %c1_6, %c0_7] : memref<18x18x4xf32, #tpu.memory_space<vmem>>, vector<16x16x4xf32>
    tpu.vector_store %arg9[%c1, %c1_6, %c0_7], %3 {strides = array<i32>} : memref<18x18x4xf32, #tpu.memory_space<vmem>>, vector<16x16x4xf32>,
    %c0_8 = arith.constant 0 : index
    %c0_9 = arith.constant 0 : index
    %c0_10 = arith.constant 0 : index
    %5 = vector.load %arg9[%c0_8, %c0_9, %c0_10] : memref<18x18x4xf32, #tpu.memory_space<vmem>>, vector<16x16x4xf32>
    %6 = vector.shape_cast %5 : vector<16x16x4xf32> to vector<256x4xf32>
    %c0_11 = arith.constant 0 : index
    %c0_12 = arith.constant 0 : index
    %7 = vector.load %arg11[%c0_11, %c0_12] : memref<256x36xf32, #tpu.memory_space<vmem>>, vector<256x4xf32>
    tpu.vector_store %arg11[%c0_11, %c0_12], %6 {strides = array<i32>} : memref<256x36xf32, #tpu.memory_space<vmem>>, vector<256x4xf32>,
    %c0_13 = arith.constant 0 : index
    %c1_14 = arith.constant 1 : index
    %c0_15 = arith.constant 0 : index
    %8 = vector.load %arg9[%c0_13, %c1_14, %c0_15] : memref<18x18x4xf32, #tpu.memory_space<vmem>>, vector<16x16x4xf32>
    %9 = vector.shape_cast %8 : vector<16x16x4xf32> to vector<256x4xf32>
    %c0_16 = arith.constant 0 : index
    %c4 = arith.constant 4 : index
    %10 = vector.load %arg11[%c0_16, %c4] : memref<256x36xf32, #tpu.memory_space<vmem>>, vector<256x4xf32>
    tpu.vector_store %arg11[%c0_16, %c4], %9 {strides = array<i32>} : memref<256x36xf32, #tpu.memory_space<vmem>>, vector<256x4xf32>,
    %c0_17 = arith.constant 0 : index
    %c2 = arith.constant 2 : index
    %c0_18 = arith.constant 0 : index
    %11 = vector.load %arg9[%c0_17, %c2, %c0_18] : memref<18x18x4xf32, #tpu.memory_space<vmem>>, vector<16x16x4xf32>
    %12 = vector.shape_cast %11 : vector<16x16x4xf32> to vector<256x4xf32>
    %c0_19 = arith.constant 0 : index
    %c8 = arith.constant 8 : index
    %13 = vector.load %arg11[%c0_19, %c8] : memref<256x36xf32, #tpu.memory_space<vmem>>, vector<256x4xf32>
    tpu.vector_store %arg11[%c0_19, %c8], %12 {strides = array<i32>} : memref<256x36xf32, #tpu.memory_space<vmem>>, vector<256x4xf32>,
    %c1_20 = arith.constant 1 : index
    %c0_21 = arith.constant 0 : index
    %c0_22 = arith.constant 0 : index
    %14 = vector.load %arg9[%c1_20, %c0_21, %c0_22] : memref<18x18x4xf32, #tpu.memory_space<vmem>>, vector<16x16x4xf32>
    %15 = vector.shape_cast %14 : vector<16x16x4xf32> to vector<256x4xf32>
    %c0_23 = arith.constant 0 : index
    %c12 = arith.constant 12 : index
    %16 = vector.load %arg11[%c0_23, %c12] : memref<256x36xf32, #tpu.memory_space<vmem>>, vector<256x4xf32>
    tpu.vector_store %arg11[%c0_23, %c12], %15 {strides = array<i32>} : memref<256x36xf32, #tpu.memory_space<vmem>>, vector<256x4xf32>,
    %c1_24 = arith.constant 1 : index
    %c1_25 = arith.constant 1 : index
    %c0_26 = arith.constant 0 : index
    %17 = vector.load %arg9[%c1_24, %c1_25, %c0_26] : memref<18x18x4xf32, #tpu.memory_space<vmem>>, vector<16x16x4xf32>
    %18 = vector.shape_cast %17 : vector<16x16x4xf32> to vector<256x4xf32>
    %c0_27 = arith.constant 0 : index
    %c16 = arith.constant 16 : index
    %19 = vector.load %arg11[%c0_27, %c16] : memref<256x36xf32, #tpu.memory_space<vmem>>, vector<256x4xf32>
    tpu.vector_store %arg11[%c0_27, %c16], %18 {strides = array<i32>} : memref<256x36xf32, #tpu.memory_space<vmem>>, vector<256x4xf32>,
    %c1_28 = arith.constant 1 : index
    %c2_29 = arith.constant 2 : index
    %c0_30 = arith.constant 0 : index
    %20 = vector.load %arg9[%c1_28, %c2_29, %c0_30] : memref<18x18x4xf32, #tpu.memory_space<vmem>>, vector<16x16x4xf32>
    %21 = vector.shape_cast %20 : vector<16x16x4xf32> to vector<256x4xf32>
    %c0_31 = arith.constant 0 : index
    %c20 = arith.constant 20 : index
    %22 = vector.load %arg11[%c0_31, %c20] : memref<256x36xf32, #tpu.memory_space<vmem>>, vector<256x4xf32>
    tpu.vector_store %arg11[%c0_31, %c20], %21 {strides = array<i32>} : memref<256x36xf32, #tpu.memory_space<vmem>>, vector<256x4xf32>,
    %c2_32 = arith.constant 2 : index
    %c0_33 = arith.constant 0 : index
    %c0_34 = arith.constant 0 : index
    %23 = vector.load %arg9[%c2_32, %c0_33, %c0_34] : memref<18x18x4xf32, #tpu.memory_space<vmem>>, vector<16x16x4xf32>
    %24 = vector.shape_cast %23 : vector<16x16x4xf32> to vector<256x4xf32>
    %c0_35 = arith.constant 0 : index
    %c24 = arith.constant 24 : index
    %25 = vector.load %arg11[%c0_35, %c24] : memref<256x36xf32, #tpu.memory_space<vmem>>, vector<256x4xf32>
    tpu.vector_store %arg11[%c0_35, %c24], %24 {strides = array<i32>} : memref<256x36xf32, #tpu.memory_space<vmem>>, vector<256x4xf32>,
    %c2_36 = arith.constant 2 : index
    %c1_37 = arith.constant 1 : index
    %c0_38 = arith.constant 0 : index
    %26 = vector.load %arg9[%c2_36, %c1_37, %c0_38] : memref<18x18x4xf32, #tpu.memory_space<vmem>>, vector<16x16x4xf32>
    %27 = vector.shape_cast %26 : vector<16x16x4xf32> to vector<256x4xf32>
    %c0_39 = arith.constant 0 : index
    %c28 = arith.constant 28 : index
    %28 = vector.load %arg11[%c0_39, %c28] : memref<256x36xf32, #tpu.memory_space<vmem>>, vector<256x4xf32>
    tpu.vector_store %arg11[%c0_39, %c28], %27 {strides = array<i32>} : memref<256x36xf32, #tpu.memory_space<vmem>>, vector<256x4xf32>,
    %c2_40 = arith.constant 2 : index
    %c2_41 = arith.constant 2 : index
    %c0_42 = arith.constant 0 : index
    %29 = vector.load %arg9[%c2_40, %c2_41, %c0_42] : memref<18x18x4xf32, #tpu.memory_space<vmem>>, vector<16x16x4xf32>
    %30 = vector.shape_cast %29 : vector<16x16x4xf32> to vector<256x4xf32>
    %c0_43 = arith.constant 0 : index
    %c32 = arith.constant 32 : index
    %31 = vector.load %arg11[%c0_43, %c32] : memref<256x36xf32, #tpu.memory_space<vmem>>, vector<256x4xf32>
    tpu.vector_store %arg11[%c0_43, %c32], %30 {strides = array<i32>} : memref<256x36xf32, #tpu.memory_space<vmem>>, vector<256x4xf32>,
    %c0_44 = arith.constant 0 : index
    %c0_45 = arith.constant 0 : index
    %32 = vector.load %arg11[%c0_44, %c0_45] : memref<256x36xf32, #tpu.memory_space<vmem>>, vector<256x36xf32>
    %c0_46 = arith.constant 0 : index
    %c0_47 = arith.constant 0 : index
    %33 = vector.load %arg2[%c0_46, %c0_47] : memref<36x128xf32, #tpu.memory_space<vmem>>, vector<36x128xf32>
    %cst_48 = arith.constant dense<0.000000e+00> : vector<256x128xf32>
    %34 = tpu.matmul %32, %33, %cst_48 {dimension_numbers = #tpu.dot_dimension_numbers<[1], [0], [0], [1], [0, 0, 1, 1], [], []>} : vector<256x36xf32>, vector<36x128xf32>, vector<256x128xf32> -> vector<256x128xf32>
    %c0_49 = arith.constant 0 : index
    %c0_50 = arith.constant 0 : index
    %35 = vector.load %arg3[%c0_49, %c0_50] : memref<1x128xf32, #tpu.memory_space<vmem>>, vector<1x128xf32>
    %36 = vector.shape_cast %35 : vector<1x128xf32> to vector<128xf32>
    %37 = vector.shape_cast %36 : vector<128xf32> to vector<1x128xf32>
    %38 = vector.broadcast %37 : vector<1x128xf32> to vector<256x128xf32>
    %39 = arith.mulf %34, %38 : vector<256x128xf32>
    %c0_51 = arith.constant 0 : index
    %c0_52 = arith.constant 0 : index
    %40 = vector.load %arg4[%c0_51, %c0_52] : memref<1x128xf32, #tpu.memory_space<vmem>>, vector<1x128xf32>
    %41 = vector.shape_cast %40 : vector<1x128xf32> to vector<128xf32>
    %42 = vector.shape_cast %41 : vector<128xf32> to vector<1x128xf32>
    %43 = vector.broadcast %42 : vector<1x128xf32> to vector<256x128xf32>
    %44 = arith.addf %39, %43 : vector<256x128xf32>
    %cst_53 = arith.constant 0.000000e+00 : f32
    %45 = vector.broadcast %cst_53 : f32 to vector<256x128xf32>
    %46 = arith.cmpf oge, %44, %45 : vector<256x128xf32>
    %cst_54 = arith.constant 0.00999999977 : f32
    %47 = vector.broadcast %cst_54 : f32 to vector<256x128xf32>
    %48 = arith.mulf %47, %44 : vector<256x128xf32>
    %49 = arith.select %46, %44, %48 : vector<256x128xi1>, vector<256x128xf32>
    %cst_55 = arith.constant 0.000000e+00 : f32
    %50 = vector.broadcast %cst_55 : f32 to vector<18x18x128xf32>
    %c0_56 = arith.constant 0 : index
    %c0_57 = arith.constant 0 : index
    %c0_58 = arith.constant 0 : index
    %51 = vector.load %arg10[%c0_56, %c0_57, %c0_58] : memref<18x18x128xf32, #tpu.memory_space<vmem>>, vector<18x18x128xf32>
    tpu.vector_store %arg10[%c0_56, %c0_57, %c0_58], %50 {strides = array<i32>} : memref<18x18x128xf32, #tpu.memory_space<vmem>>, vector<18x18x128xf32>,
    %52 = vector.shape_cast %49 : vector<256x128xf32> to vector<16x16x128xf32>
    %c1_59 = arith.constant 1 : index
    %c1_60 = arith.constant 1 : index
    %c0_61 = arith.constant 0 : index
    %53 = vector.load %arg10[%c1_59, %c1_60, %c0_61] : memref<18x18x128xf32, #tpu.memory_space<vmem>>, vector<16x16x128xf32>
    tpu.vector_store %arg10[%c1_59, %c1_60, %c0_61], %52 {strides = array<i32>} : memref<18x18x128xf32, #tpu.memory_space<vmem>>, vector<16x16x128xf32>,
    %c0_62 = arith.constant 0 : index
    %c0_63 = arith.constant 0 : index
    %c0_64 = arith.constant 0 : index
    %54 = vector.load %arg10[%c0_62, %c0_63, %c0_64] : memref<18x18x128xf32, #tpu.memory_space<vmem>>, vector<16x16x128xf32>
    %55 = vector.shape_cast %54 : vector<16x16x128xf32> to vector<256x128xf32>
    %c0_65 = arith.constant 0 : index
    %c0_66 = arith.constant 0 : index
    %56 = vector.load %arg12[%c0_65, %c0_66] : memref<256x1152xf32, #tpu.memory_space<vmem>>, vector<256x128xf32>
    tpu.vector_store %arg12[%c0_65, %c0_66], %55 {strides = array<i32>} : memref<256x1152xf32, #tpu.memory_space<vmem>>, vector<256x128xf32>,
    %c0_67 = arith.constant 0 : index
    %c1_68 = arith.constant 1 : index
    %c0_69 = arith.constant 0 : index
    %57 = vector.load %arg10[%c0_67, %c1_68, %c0_69] : memref<18x18x128xf32, #tpu.memory_space<vmem>>, vector<16x16x128xf32>
    %58 = vector.shape_cast %57 : vector<16x16x128xf32> to vector<256x128xf32>
    %c0_70 = arith.constant 0 : index
    %c128 = arith.constant 128 : index
    %59 = vector.load %arg12[%c0_70, %c128] : memref<256x1152xf32, #tpu.memory_space<vmem>>, vector<256x128xf32>
    tpu.vector_store %arg12[%c0_70, %c128], %58 {strides = array<i32>} : memref<256x1152xf32, #tpu.memory_space<vmem>>, vector<256x128xf32>,
    %c0_71 = arith.constant 0 : index
    %c2_72 = arith.constant 2 : index
    %c0_73 = arith.constant 0 : index
    %60 = vector.load %arg10[%c0_71, %c2_72, %c0_73] : memref<18x18x128xf32, #tpu.memory_space<vmem>>, vector<16x16x128xf32>
    %61 = vector.shape_cast %60 : vector<16x16x128xf32> to vector<256x128xf32>
    %c0_74 = arith.constant 0 : index
    %c256 = arith.constant 256 : index
    %62 = vector.load %arg12[%c0_74, %c256] : memref<256x1152xf32, #tpu.memory_space<vmem>>, vector<256x128xf32>
    tpu.vector_store %arg12[%c0_74, %c256], %61 {strides = array<i32>} : memref<256x1152xf32, #tpu.memory_space<vmem>>, vector<256x128xf32>,
    %c1_75 = arith.constant 1 : index
    %c0_76 = arith.constant 0 : index
    %c0_77 = arith.constant 0 : index
    %63 = vector.load %arg10[%c1_75, %c0_76, %c0_77] : memref<18x18x128xf32, #tpu.memory_space<vmem>>, vector<16x16x128xf32>
    %64 = vector.shape_cast %63 : vector<16x16x128xf32> to vector<256x128xf32>
    %c0_78 = arith.constant 0 : index
    %c384 = arith.constant 384 : index
    %65 = vector.load %arg12[%c0_78, %c384] : memref<256x1152xf32, #tpu.memory_space<vmem>>, vector<256x128xf32>
    tpu.vector_store %arg12[%c0_78, %c384], %64 {strides = array<i32>} : memref<256x1152xf32, #tpu.memory_space<vmem>>, vector<256x128xf32>,
    %c1_79 = arith.constant 1 : index
    %c1_80 = arith.constant 1 : index
    %c0_81 = arith.constant 0 : index
    %66 = vector.load %arg10[%c1_79, %c1_80, %c0_81] : memref<18x18x128xf32, #tpu.memory_space<vmem>>, vector<16x16x128xf32>
    %67 = vector.shape_cast %66 : vector<16x16x128xf32> to vector<256x128xf32>
    %c0_82 = arith.constant 0 : index
    %c512 = arith.constant 512 : index
    %68 = vector.load %arg12[%c0_82, %c512] : memref<256x1152xf32, #tpu.memory_space<vmem>>, vector<256x128xf32>
    tpu.vector_store %arg12[%c0_82, %c512], %67 {strides = array<i32>} : memref<256x1152xf32, #tpu.memory_space<vmem>>, vector<256x128xf32>,
    %c1_83 = arith.constant 1 : index
    %c2_84 = arith.constant 2 : index
    %c0_85 = arith.constant 0 : index
    %69 = vector.load %arg10[%c1_83, %c2_84, %c0_85] : memref<18x18x128xf32, #tpu.memory_space<vmem>>, vector<16x16x128xf32>
    %70 = vector.shape_cast %69 : vector<16x16x128xf32> to vector<256x128xf32>
    %c0_86 = arith.constant 0 : index
    %c640 = arith.constant 640 : index
    %71 = vector.load %arg12[%c0_86, %c640] : memref<256x1152xf32, #tpu.memory_space<vmem>>, vector<256x128xf32>
    tpu.vector_store %arg12[%c0_86, %c640], %70 {strides = array<i32>} : memref<256x1152xf32, #tpu.memory_space<vmem>>, vector<256x128xf32>,
    %c2_87 = arith.constant 2 : index
    %c0_88 = arith.constant 0 : index
    %c0_89 = arith.constant 0 : index
    %72 = vector.load %arg10[%c2_87, %c0_88, %c0_89] : memref<18x18x128xf32, #tpu.memory_space<vmem>>, vector<16x16x128xf32>
    %73 = vector.shape_cast %72 : vector<16x16x128xf32> to vector<256x128xf32>
    %c0_90 = arith.constant 0 : index
    %c768 = arith.constant 768 : index
    %74 = vector.load %arg12[%c0_90, %c768] : memref<256x1152xf32, #tpu.memory_space<vmem>>, vector<256x128xf32>
    tpu.vector_store %arg12[%c0_90, %c768], %73 {strides = array<i32>} : memref<256x1152xf32, #tpu.memory_space<vmem>>, vector<256x128xf32>,
    %c2_91 = arith.constant 2 : index
    %c1_92 = arith.constant 1 : index
    %c0_93 = arith.constant 0 : index
    %75 = vector.load %arg10[%c2_91, %c1_92, %c0_93] : memref<18x18x128xf32, #tpu.memory_space<vmem>>, vector<16x16x128xf32>
    %76 = vector.shape_cast %75 : vector<16x16x128xf32> to vector<256x128xf32>
    %c0_94 = arith.constant 0 : index
    %c896 = arith.constant 896 : index
    %77 = vector.load %arg12[%c0_94, %c896] : memref<256x1152xf32, #tpu.memory_space<vmem>>, vector<256x128xf32>
    tpu.vector_store %arg12[%c0_94, %c896], %76 {strides = array<i32>} : memref<256x1152xf32, #tpu.memory_space<vmem>>, vector<256x128xf32>,
    %c2_95 = arith.constant 2 : index
    %c2_96 = arith.constant 2 : index
    %c0_97 = arith.constant 0 : index
    %78 = vector.load %arg10[%c2_95, %c2_96, %c0_97] : memref<18x18x128xf32, #tpu.memory_space<vmem>>, vector<16x16x128xf32>
    %79 = vector.shape_cast %78 : vector<16x16x128xf32> to vector<256x128xf32>
    %c0_98 = arith.constant 0 : index
    %c1024 = arith.constant 1024 : index
    %80 = vector.load %arg12[%c0_98, %c1024] : memref<256x1152xf32, #tpu.memory_space<vmem>>, vector<256x128xf32>
    tpu.vector_store %arg12[%c0_98, %c1024], %79 {strides = array<i32>} : memref<256x1152xf32, #tpu.memory_space<vmem>>, vector<256x128xf32>,
    %c0_99 = arith.constant 0 : index
    %c0_100 = arith.constant 0 : index
    %81 = vector.load %arg12[%c0_99, %c0_100] : memref<256x1152xf32, #tpu.memory_space<vmem>>, vector<256x1152xf32>
    %c0_101 = arith.constant 0 : index
    %c0_102 = arith.constant 0 : index
    %82 = vector.load %arg5[%c0_101, %c0_102] : memref<1152x128xf32, #tpu.memory_space<vmem>>, vector<1152x128xf32>
    %cst_103 = arith.constant dense<0.000000e+00> : vector<256x128xf32>
    %83 = tpu.matmul %81, %82, %cst_103 {dimension_numbers = #tpu.dot_dimension_numbers<[1], [0], [0], [1], [0, 0, 1, 1], [], []>} : vector<256x1152xf32>, vector<1152x128xf32>, vector<256x128xf32> -> vector<256x128xf32>
    %c0_104 = arith.constant 0 : index
    %c0_105 = arith.constant 0 : index
    %84 = vector.load %arg6[%c0_104, %c0_105] : memref<1x128xf32, #tpu.memory_space<vmem>>, vector<1x128xf32>
    %85 = vector.shape_cast %84 : vector<1x128xf32> to vector<128xf32>
    %86 = vector.shape_cast %85 : vector<128xf32> to vector<1x128xf32>
    %87 = vector.broadcast %86 : vector<1x128xf32> to vector<256x128xf32>
    %88 = arith.mulf %83, %87 : vector<256x128xf32>
    %c0_106 = arith.constant 0 : index
    %c0_107 = arith.constant 0 : index
    %89 = vector.load %arg7[%c0_106, %c0_107] : memref<1x128xf32, #tpu.memory_space<vmem>>, vector<1x128xf32>
    %90 = vector.shape_cast %89 : vector<1x128xf32> to vector<128xf32>
    %91 = vector.shape_cast %90 : vector<128xf32> to vector<1x128xf32>
    %92 = vector.broadcast %91 : vector<1x128xf32> to vector<256x128xf32>
    %93 = arith.addf %88, %92 : vector<256x128xf32>
    %cst_108 = arith.constant 0.000000e+00 : f32
    %94 = vector.broadcast %cst_108 : f32 to vector<256x128xf32>
    %95 = arith.cmpf oge, %93, %94 : vector<256x128xf32>
    %cst_109 = arith.constant 0.00999999977 : f32
    %96 = vector.broadcast %cst_109 : f32 to vector<256x128xf32>
    %97 = arith.mulf %96, %93 : vector<256x128xf32>
    %98 = arith.select %95, %93, %97 : vector<256x128xi1>, vector<256x128xf32>
    %99 = vector.shape_cast %98 : vector<256x128xf32> to vector<16x16x128xf32>
    %c0_110 = arith.constant 0 : index
    %c0_111 = arith.constant 0 : index
    %c0_112 = arith.constant 0 : index
    %c0_113 = arith.constant 0 : index
    %100 = vector.load %arg8[%c0_110, %c0_111, %c0_112, %c0_113] : memref<1x16x16x128xf32, #tpu.memory_space<vmem>>, vector<1x16x16x128xf32>
    %101 = vector.shape_cast %100 : vector<1x16x16x128xf32> to vector<16x16x128xf32>
    %102 = vector.shape_cast %99 : vector<16x16x128xf32> to vector<1x16x16x128xf32>
    tpu.vector_store %arg8[%c0_110, %c0_111, %c0_112, %c0_113], %102 {strides = array<i32>} : memref<1x16x16x128xf32, #tpu.memory_space<vmem>>, vector<1x16x16x128xf32>,
    return
  }
  func.func @transform_0(%arg0: i32) -> (i32, i32, i32, i32) {
    %c0_i32 = arith.constant 0 : i32
    %c0_i32_0 = arith.constant 0 : i32
    %c0_i32_1 = arith.constant 0 : i32
    %c0_i32_2 = arith.constant 0 : i32
    return %arg0, %c0_i32, %c0_i32_0, %c0_i32_1 : i32, i32, i32, i32
  }
  func.func @transform_1(%arg0: i32) -> (i32, i32) {
    %c0_i32 = arith.constant 0 : i32
    %c0_i32_0 = arith.constant 0 : i32
    %c0_i32_1 = arith.constant 0 : i32
    return %c0_i32, %c0_i32_0 : i32, i32
  }
  func.func @transform_2(%arg0: i32) -> (i32, i32) {
    %c0_i32 = arith.constant 0 : i32
    %c0_i32_0 = arith.constant 0 : i32
    %c0_i32_1 = arith.constant 0 : i32
    return %c0_i32, %c0_i32_0 : i32, i32
  }
  func.func @transform_3(%arg0: i32) -> (i32, i32) {
    %c0_i32 = arith.constant 0 : i32
    %c0_i32_0 = arith.constant 0 : i32
    %c0_i32_1 = arith.constant 0 : i32
    return %c0_i32, %c0_i32_0 : i32, i32
  }
  func.func @transform_4(%arg0: i32) -> (i32, i32) {
    %c0_i32 = arith.constant 0 : i32
    %c0_i32_0 = arith.constant 0 : i32
    %c0_i32_1 = arith.constant 0 : i32
    return %c0_i32, %c0_i32_0 : i32, i32
  }
  func.func @transform_5(%arg0: i32) -> (i32, i32) {
    %c0_i32 = arith.constant 0 : i32
    %c0_i32_0 = arith.constant 0 : i32
    %c0_i32_1 = arith.constant 0 : i32
    return %c0_i32, %c0_i32_0 : i32, i32
  }
  func.func @transform_6(%arg0: i32) -> (i32, i32) {
    %c0_i32 = arith.constant 0 : i32
    %c0_i32_0 = arith.constant 0 : i32
    %c0_i32_1 = arith.constant 0 : i32
    return %c0_i32, %c0_i32_0 : i32, i32
  }
  func.func @transform_7(%arg0: i32) -> (i32, i32, i32, i32) {
    %c0_i32 = arith.constant 0 : i32
    %c0_i32_0 = arith.constant 0 : i32
    %c0_i32_1 = arith.constant 0 : i32
    %c0_i32_2 = arith.constant 0 : i32
    return %arg0, %c0_i32, %c0_i32_0, %c0_i32_1 : i32, i32, i32, i32
  }
}

</mosaic_0001>

<bundles_post_ra>
// kernel: tpu_custom_call.1
= control target key start
LH: loop header
LB: loop body
LE: loop exit
PB: predicated region body
PF: predicated region fallthrough
CT: control target
= control target key end

     0   :  { %12 = vsyncpa [#allocation7], 0  ;;  %s7919_s0 = inlined_call_operand.vmem [shape: f32[2,16,16,4], index: 0, kind: input, shape index: {}]   ;;  %s7920_s1 = inlined_call_operand.vmem [shape: f32[36,128], index: 1, kind: input, shape index: {}]   ;;  %s7921_s2 = inlined_call_operand.vmem [shape: f32[1,128], index: 2, kind: input, shape index: {}]   ;;  %s7922_s3 = inlined_call_operand.vmem [shape: f32[1,128], index: 3, kind: input, shape index: {}]   ;;  %s7923_s4 = inlined_call_operand.hbm [shape: f32[1152,128], index: 4, kind: input, shape index: {}]   ;;  %s7924_s5 = inlined_call_operand.vmem [shape: f32[1,128], index: 5, kind: input, shape index: {}]   ;;  %s7925_s6 = inlined_call_operand.vmem [shape: f32[1,128], index: 6, kind: input, shape index: {}]   ;;  %s7926_s7 = inlined_call_operand.hbm [shape: f32[2,16,16,128], index: 7, kind: output, shape index: {}]  }
   0x1   :  { %13 = vsyncpa [#allocation8], 0 }
   0x2   :  { %15 = vsyncpa [#allocation8 + $0x1], 0  ;;  %s5598_s24 = smov 0   ;;  %s5600_s25 = smov 0  }
   0x3   :  { %s5602_s26 = smov 0   ;;  %s5604_s27 = smov 0  }
   0x4 LB: > { %s5619_s28 = sadd.s32 4294967295, %s5542_s27   ;;  %s5074_s29 = sadd.s32 4294967294, %s5542_s27   ;;  %s5542_s27 = sphi %s5604_s27, %s7984_s27   ;;  %s5538_s26 = sphi %s5602_s26, %s7983_s26   ;;  %s5534_s25 = sphi %s5600_s25, %s7982_s25   ;;  %s5530_s24 = sphi %s5598_s24, %s7981_s24  }
   0x5   : > { %s5623_s30 = sadd.s32 1, %s5542_s27   ;;  %s180_s8 = sadd.s32 1, %s5538_s26 }
   0x6   : > { %s177_s9 = ssub.s32 %s5542_s27, %s5623_s30  ;;  %p190_p0 = scmp.ne.s32.totalorder %s5538_s26, %s5534_s25 }
   0x7   : > { %p178_p1 = scmp.eq.s32.totalorder %s177_s9, 0  ;;  %p191_p2 = scmp.eq.s32.totalorder %s5619_s28, 1 }
   0x8   : > { %p196_p3 = scmp.ne.s32.totalorder %s5534_s25, %s5530_s24  ;;  %p197_p4 = scmp.eq.s32.totalorder %s5074_s29, 1 }
   0x9   : > { %s5634_s10 = scalar_select %p178_p1, %s5538_s26, %s180_s8  }
   0xa   : > { %p5636_p5 = por %p191_p2, %p190_p0  ;;  %p5640_p6 = por %p197_p4, %p196_p3 }
   0xb   : > { %p5075_p7 = scmp.ge.s32.totalorder %s5542_s27, 1  ;;  %p204_p8 = scmp.lt.s32.totalorder %s5542_s27, 3 }
   0xc   : > { %s7928_s12 = scalar_select %p5640_p6, 1, 0 }
   0xd   : > { %p5396_p9 = scmp.eq.s32.totalorder %s5619_s28, 0  ;;  %p5647_p10 = pnand %p5075_p7, %p204_p8 }
   0xe   : > { %s5544_s14 = smov [#allocation6]  }
   0xf   : > { %s225_s15 = sshll.u32 %s5544_s14, 4  ;;  %p5388_p11 = pneg %p5647_p10  ;;  %s226_s15 = int_to_ptr.vmem [resolvable:$true] %s225_s15 }
  0x10   : > { %s5463_s16 = scalar_lea.vmem %s226_s15, 18432  ;;  %p5471_p3 = scmp.lt.s32.totalorder %s226_s15, %s226_s15 }
  0x11   : > { %p5389_p12 = pnand %p5396_p9, %p5388_p11  ;;  %p5464_p0 = scmp.ne.s32.totalorder %s226_s15, %s5463_s16 }
  0x12   : > { %p5472_p4 = scmp.lt.s32.totalorder %s5463_s16, %s5463_s16 }
  0x13   : > { %p5454_p13 = pneg %p5389_p12 }
  0x14   : > { %p5473_p6 = por %p5472_p4, %p5471_p3 }
  0x15   : > { %p5466_p1 = pnand %p5464_p0, %p5454_p13 }
  0x17   : > { %p5467_p2 = pneg %p5466_p1 }
  0x19   : > { %p5474_p7 = pnand %p5473_p6, %p5467_p2 }
  0x1b   : > { %5477 = shalt.err (!%p5474_p7)
}
  0x1c   : > { %s5545_s17 = smov 128   ;;  %s5546_s18 = smov 8  }
  0x1d   : > { %5391 = dma.hbm_to_vmem [thread:$0]  (!%p5389_p12), %s7923_s4, 18432, %s226_s15, [#allocation7], %s5545_s17, %s5545_s17, %s5546_s18  }
  0x1e   : > { %255 = sbr.rel (%p5647_p10) target bundleno = 1308 (0x51c), region = 48 }
  0x23   : > { %5521 = dma.done.wait (%p5396_p9), [#allocation7], 18432  }
  0x24   : > { %5523 = vsyncadd (%p5396_p9), [#allocation7], 4294948864  ;;  %vm292_vm0 = vcmask 31744   ;;  %v5547_v0 = vmov 0.0   ;;  %vm295_vm1 = vcmask 25600   ;;  %p287_p6 = scmp.lt.s32.totalorder %s5619_s28, 1 }
  0x25   : > { %293 = vst.msk [vmem:[#allocation2] sm:$0xff] %vm292_vm0, %v5547_v0  ;;  %294 = vst.msk [vmem:[#allocation2 + $0x8] sm:$0xff] %vm292_vm0, %v5547_v0  ;;  %3655 = vmatprep.subr.mxu1 %v5547_v0  ;;  %s5548_s9 = smov 4   ;;  %s5549_s13 = smov 8   ;;  %v2058_v31 = vld [vmem:[%s7920_s1 + $0x20] sm:$0xf] }
  0x26   : > { %297 = vst.msk [vmem:[#allocation2 + $0x18] sm:$0xff] %vm292_vm0, %v5547_v0  ;;  %298 = vst.msk [vmem:[#allocation2 + $0x20] sm:$0xff] %vm292_vm0, %v5547_v0  ;;  %s288_s21 = scalar_select %p287_p6, %s5619_s28, 1  ;;  %vm2156_vm2 = vcmask 1043456   ;;  %v2057_v34 = vld [vmem:[%s7920_s1 + $0x18] sm:$0xff]  ;;  %v2056_v35 = vld [vmem:[%s7920_s1 + $0x10] sm:$0xff] }
  0x27   : > { %300 = vst.msk [vmem:[#allocation2 + $0x30] sm:$0xff] %vm292_vm0, %v5547_v0  ;;  %301 = vst.msk [vmem:[#allocation2 + $0x38] sm:$0xff] %vm292_vm0, %v5547_v0  ;;  %s5550_s14 = smov 12   ;;  %s5551_s15 = smov 16   ;;  %5212 = vmatprep.subr.msk.mxu0 %vm2156_vm2, %v2058_v31  ;;  %v2055_v38 = vld [vmem:[%s7920_s1 + $0x8] sm:$0xff]  ;;  %v2054_v40 = vld [vmem:[%s7920_s1] sm:$0xff] }
  0x28   : > { %303 = vst.msk [vmem:[#allocation2 + $0x48] sm:$0xff] %vm292_vm0, %v5547_v0  ;;  %304 = vst.msk [vmem:[#allocation2 + $0x50] sm:$0xff] %vm292_vm0, %v5547_v0  ;;  %s5125_s22 = sshll.u32 %s288_s21, 8  ;;  %s5552_s16 = smov 20   ;;  %5213 = vmatpush3.msk.msra.mxu0 %vm2156_vm2, %v2058_v31  ;;  %vm637_vm3 = vcmask 64544   ;;  %vm830_vm4 = vcmask 97344  }
  0x29   : > { %306 = vst.msk [vmem:[#allocation2 + $0x60] sm:$0xff] %vm292_vm0, %v5547_v0  ;;  %307 = vst.msk [vmem:[#allocation2 + $0x68] sm:$0xff] %vm292_vm0, %v5547_v0  ;;  %s5834_s8 = scalar_lea.vmem %s7919_s0, %s5125_s22  ;;  %5214 = vmatprep.subr.mxu0 %v2057_v34  ;;  %s5553_s21 = smov 24   ;;  %vm1023_vm5 = vcmask 130144   ;;  %vm1216_vm6 = vcmask 162944   ;;  %vm1409_vm7 = vcmask 195744  }
  0x2a   : > { %309 = vst.msk [vmem:[#allocation2 + $0x78] sm:$0xff] %vm292_vm0, %v5547_v0  ;;  %310 = vst.msk [vmem:[#allocation2 + $0x80] sm:$0xff] %vm292_vm0, %v5547_v0  ;;  %v348_v1 = vld [vmem:[%s5834_s8] sm:$0xff]  ;;  %v349_v2 = vld [vmem:[%s5834_s8 + $0x8] sm:$0xff]  ;;  %5215 = vmatpush3.msra.mxu0 %v2057_v34  ;;  %s5554_s18 = smov 28   ;;  %s5555_s22 = smov 32  }
  0x2b   : > { %312 = vst.msk [vmem:[#allocation2 + $0x90] sm:$0xff] %vm292_vm0, %v5547_v0  ;;  %313 = vst.msk [vmem:[#allocation2 + $0x98] sm:$0xff] %vm292_vm0, %v5547_v0  ;;  %v350_v3 = vld [vmem:[%s5834_s8 + $0x10] sm:$0xff]  ;;  %v351_v6 = vld [vmem:[%s5834_s8 + $0x18] sm:$0xff]  ;;  %5216 = vmatprep.subr.mxu0 %v2056_v35  ;;  %vm1603_vm8 = vcmask 228544   ;;  %vm1796_vm9 = vcmask 261344  }
  0x2c   : > { %315 = vst.msk [vmem:[#allocation2 + $0xa8] sm:$0xff] %vm292_vm0, %v5547_v0  ;;  %316 = vst.msk [vmem:[#allocation2 + $0xb0] sm:$0xff] %vm292_vm0, %v5547_v0  ;;  %v477_v4 = vld [vmem:[#allocation2 + $0x1] sm:$0xff]  ;;  %v354_v11 = vld [vmem:[%s5834_s8 + $0x30] sm:$0xff]  ;;  %5217 = vmatpush3.msra.mxu0 %v2056_v35  ;;  %vm1989_vm10 = vcmask 294144   ;;  %vm2059_vm11 = vcmask 293888  }
  0x2d   : > { %318 = vst.msk [vmem:[#allocation2 + $0xc0] sm:$0xff] %vm292_vm0, %v5547_v0  ;;  %319 = vst.msk [vmem:[#allocation2 + $0xc8] sm:$0xff] %vm292_vm0, %v5547_v0  ;;  %v670_v5 = vld [vmem:[#allocation2 + $0x2] sm:$0xff]  ;;  %541 = vrot.lane.b32.xlu0 %v477_v4, %s5548_s9  ;;  %v355_v12 = vld [vmem:[%s5834_s8 + $0x38] sm:$0xff]  ;;  %5218 = vmatprep.subr.mxu0 %v2055_v38  ;;  %s284_s23 = sand.u32 1, %s5534_s25  }
  0x2e   : > { %321 = vst.msk [vmem:[#allocation2 + $0xd8] sm:$0xff] %vm292_vm0, %v5547_v0  ;;  %322 = vst.msk [vmem:[#allocation2 + $0xe0] sm:$0xff] %vm292_vm0, %v5547_v0  ;;  %734 = vrot.lane.b32.xlu1 %v670_v5, %s5549_s13  ;;  %v352_v9 = vld [vmem:[%s5834_s8 + $0x20] sm:$0xff]  ;;  %v353_v10 = vld [vmem:[%s5834_s8 + $0x28] sm:$0xff]  ;;  %5219 = vmatpush3.msra.mxu0 %v2055_v38 }
  0x2f   : > { %324 = vst.msk [vmem:[#allocation2 + $0xf0] sm:$0xff] %vm292_vm0, %v5547_v0  ;;  %325 = vst.msk [vmem:[#allocation2 + $0xf8] sm:$0xff] %vm292_vm0, %v5547_v0  ;;  %v413_v13 = vld [vmem:[#allocation2] sm:$0xff]  ;;  %v357_v15 = vld [vmem:[%s5834_s8 + $0x48] sm:$0xff]  ;;  %5220 = vmatprep.subr.mxu0 %v2054_v40 }
  0x30   : > { %327 = vst.msk [vmem:[#allocation2 + $0x108] sm:$0xff] %vm292_vm0, %v5547_v0  ;;  %328 = vst.msk [vmem:[#allocation2 + $0x110] sm:$0xff] %vm292_vm0, %v5547_v0  ;;  %v356_v14 = vld [vmem:[%s5834_s8 + $0x40] sm:$0xff]  ;;  %v414_v16 = vld [vmem:[#allocation2 + $0x8] sm:$0xff]  ;;  %5221 = vmatpush3.msra.mxu0 %v2054_v40 }
  0x31   : > { %330 = vst.msk [vmem:[#allocation2 + $0x120] sm:$0xff] %vm292_vm0, %v5547_v0  ;;  %331 = vst.msk [vmem:[#allocation2 + $0x128] sm:$0xff] %vm292_vm0, %v5547_v0  ;;  %v358_v32 = vld [vmem:[%s5834_s8 + $0x50] sm:$0xff]  ;;  %v359_v33 = vld [vmem:[%s5834_s8 + $0x58] sm:$0xff]  ;;  %3880 = vmatprep.subr.mxu0 %v5547_v0 }
  0x32   : > { %333 = vst.msk [vmem:[#allocation2 + $0x138] sm:$0xff] %vm292_vm0, %v5547_v0  ;;  %334 = vst.msk [vmem:[#allocation2 + $0x140] sm:$0xff] %vm292_vm0, %v5547_v0  ;;  %v360_v44 = vld [vmem:[%s5834_s8 + $0x60] sm:$0xff]  ;;  %v361_v45 = vld [vmem:[%s5834_s8 + $0x68] sm:$0xff] }
  0x33   : > { %336 = vst.msk [vmem:[#allocation2 + $0x150] sm:$0xff] %vm292_vm0, %v5547_v0  ;;  %337 = vst.msk [vmem:[#allocation2 + $0x158] sm:$0xff] %vm292_vm0, %v5547_v0  ;;  %v362_v52 = vld [vmem:[%s5834_s8 + $0x70] sm:$0xff]  ;;  %v363_v53 = vld [vmem:[%s5834_s8 + $0x78] sm:$0xff] }
  0x34   : > { %339 = vst.msk [vmem:[#allocation2 + $0x168] sm:$0xff] %vm292_vm0, %v5547_v0  ;;  %340 = vst.msk [vmem:[#allocation2 + $0x170] sm:$0xff] %vm292_vm0, %v5547_v0  ;;  %v364_v60 = vld [vmem:[%s5834_s8 + $0x80] sm:$0xff]  ;;  %v365_v61 = vld [vmem:[%s5834_s8 + $0x88] sm:$0xff] }
  0x35   : > { %342 = vst.msk [vmem:[#allocation2 + $0x180] sm:$0xff] %vm292_vm0, %v5547_v0  ;;  %343 = vst.msk [vmem:[#allocation2 + $0x188] sm:$0xff] %vm292_vm0, %v5547_v0  ;;  %v3525_v40 = vld [vmem:[#allocation6 + $0x70] sm:$0xff] }
  0x36   : > { %345 = vst.msk [vmem:[#allocation2 + $0x198] sm:$0xff] %vm292_vm0, %v5547_v0  ;;  %346 = vst.msk [vmem:[#allocation2 + $0x1a0] sm:$0xff] %vm292_vm0, %v5547_v0 }
  0x37   : > { %2559 = vst [vmem:[#allocation3] sm:$0xff] %v5547_v0  ;;  %2560 = vst [vmem:[#allocation3 + $0x8] sm:$0xff] %v5547_v0 }
  0x38   : > { %2561 = vst [vmem:[#allocation3 + $0x10] sm:$0x3] %v5547_v0  ;;  %2562 = vst [vmem:[#allocation3 + $0x18] sm:$0xff] %v5547_v0 }
  0x39   : > { %2563 = vst [vmem:[#allocation3 + $0x20] sm:$0xff] %v5547_v0  ;;  %2564 = vst [vmem:[#allocation3 + $0x28] sm:$0x3] %v5547_v0 }
  0x3a   : > { %2565 = vst [vmem:[#allocation3 + $0x30] sm:$0xff] %v5547_v0  ;;  %2566 = vst [vmem:[#allocation3 + $0x38] sm:$0xff] %v5547_v0 }
  0x3b   : > { %2567 = vst [vmem:[#allocation3 + $0x40] sm:$0x3] %v5547_v0  ;;  %2568 = vst [vmem:[#allocation3 + $0x48] sm:$0xff] %v5547_v0 }
  0x3c   : > { %2569 = vst [vmem:[#allocation3 + $0x50] sm:$0xff] %v5547_v0  ;;  %2570 = vst [vmem:[#allocation3 + $0x58] sm:$0x3] %v5547_v0 }
  0x3d   : > { %2571 = vst [vmem:[#allocation3 + $0x60] sm:$0xff] %v5547_v0  ;;  %2572 = vst [vmem:[#allocation3 + $0x68] sm:$0xff] %v5547_v0 }
  0x3e   : > { %2573 = vst [vmem:[#allocation3 + $0x70] sm:$0x3] %v5547_v0  ;;  %2574 = vst [vmem:[#allocation3 + $0x78] sm:$0xff] %v5547_v0 }
  0x3f   : > { %2575 = vst [vmem:[#allocation3 + $0x80] sm:$0xff] %v5547_v0  ;;  %2576 = vst [vmem:[#allocation3 + $0x88] sm:$0x3] %v5547_v0 }
  0x40   : > { %2577 = vst [vmem:[#allocation3 + $0x90] sm:$0xff] %v5547_v0  ;;  %2578 = vst [vmem:[#allocation3 + $0x98] sm:$0xff] %v5547_v0 }
  0x41   : > { %2579 = vst [vmem:[#allocation3 + $0xa0] sm:$0x3] %v5547_v0  ;;  %2580 = vst [vmem:[#allocation3 + $0xa8] sm:$0xff] %v5547_v0 }
  0x42   : > { %2581 = vst [vmem:[#allocation3 + $0xb0] sm:$0xff] %v5547_v0  ;;  %2582 = vst [vmem:[#allocation3 + $0xb8] sm:$0x3] %v5547_v0 }
  0x43   : > { %2583 = vst [vmem:[#allocation3 + $0xc0] sm:$0xff] %v5547_v0  ;;  %2584 = vst [vmem:[#allocation3 + $0xc8] sm:$0xff] %v5547_v0 }
  0x44   : > { %2585 = vst [vmem:[#allocation3 + $0xd0] sm:$0x3] %v5547_v0  ;;  %2586 = vst [vmem:[#allocation3 + $0xd8] sm:$0xff] %v5547_v0 }
  0x45   : > { %2587 = vst [vmem:[#allocation3 + $0xe0] sm:$0xff] %v5547_v0  ;;  %2588 = vst [vmem:[#allocation3 + $0xe8] sm:$0x3] %v5547_v0 }
  0x46   : > { %2589 = vst [vmem:[#allocation3 + $0xf0] sm:$0xff] %v5547_v0  ;;  %2590 = vst [vmem:[#allocation3 + $0xf8] sm:$0xff] %v5547_v0 }
  0x47   : > { %2591 = vst [vmem:[#allocation3 + $0x100] sm:$0x3] %v5547_v0  ;;  %2592 = vst [vmem:[#allocation3 + $0x108] sm:$0xff] %v5547_v0 }
  0x48   : > { %2593 = vst [vmem:[#allocation3 + $0x110] sm:$0xff] %v5547_v0  ;;  %2594 = vst [vmem:[#allocation3 + $0x118] sm:$0x3] %v5547_v0 }
  0x49   : > { %2595 = vst [vmem:[#allocation3 + $0x120] sm:$0xff] %v5547_v0  ;;  %2596 = vst [vmem:[#allocation3 + $0x128] sm:$0xff] %v5547_v0 }
  0x4a   : > { %2597 = vst [vmem:[#allocation3 + $0x130] sm:$0x3] %v5547_v0  ;;  %2598 = vst [vmem:[#allocation3 + $0x138] sm:$0xff] %v5547_v0 }
  0x4b   : > { %2599 = vst [vmem:[#allocation3 + $0x140] sm:$0xff] %v5547_v0  ;;  %2600 = vst [vmem:[#allocation3 + $0x148] sm:$0x3] %v5547_v0 }
  0x4c   : > { %2601 = vst [vmem:[#allocation3 + $0x150] sm:$0xff] %v5547_v0  ;;  %2602 = vst [vmem:[#allocation3 + $0x158] sm:$0xff] %v5547_v0 }
  0x4d   : > { %2603 = vst [vmem:[#allocation3 + $0x160] sm:$0x3] %v5547_v0  ;;  %2604 = vst [vmem:[#allocation3 + $0x168] sm:$0xff] %v5547_v0 }
  0x4e   : > { %2605 = vst [vmem:[#allocation3 + $0x170] sm:$0xff] %v5547_v0  ;;  %2606 = vst [vmem:[#allocation3 + $0x178] sm:$0x3] %v5547_v0 }
  0x4f   : > { %2607 = vst [vmem:[#allocation3 + $0x180] sm:$0xff] %v5547_v0  ;;  %2608 = vst [vmem:[#allocation3 + $0x188] sm:$0xff] %v5547_v0 }
  0x50   : > { %2609 = vst [vmem:[#allocation3 + $0x190] sm:$0x3] %v5547_v0  ;;  %2610 = vst [vmem:[#allocation3 + $0x198] sm:$0xff] %v5547_v0 }
  0x51   : > { %2611 = vst [vmem:[#allocation3 + $0x1a0] sm:$0xff] %v5547_v0  ;;  %2612 = vst [vmem:[#allocation3 + $0x1a8] sm:$0x3] %v5547_v0 }
  0x52   : > { %296 = vst.msk [vmem:[#allocation2 + $0x10] sm:$0x3] %vm295_vm1, %v5547_v0  ;;  %299 = vst.msk [vmem:[#allocation2 + $0x28] sm:$0x3] %vm295_vm1, %v5547_v0 }
  0x53   : > { %302 = vst.msk [vmem:[#allocation2 + $0x40] sm:$0x3] %vm295_vm1, %v5547_v0  ;;  %305 = vst.msk [vmem:[#allocation2 + $0x58] sm:$0x3] %vm295_vm1, %v5547_v0 }
  0x54   : > { %308 = vst.msk [vmem:[#allocation2 + $0x70] sm:$0x3] %vm295_vm1, %v5547_v0  ;;  %311 = vst.msk [vmem:[#allocation2 + $0x88] sm:$0x3] %vm295_vm1, %v5547_v0 }
  0x55   : > { %314 = vst.msk [vmem:[#allocation2 + $0xa0] sm:$0x3] %vm295_vm1, %v5547_v0  ;;  %317 = vst.msk [vmem:[#allocation2 + $0xb8] sm:$0x3] %vm295_vm1, %v5547_v0 }
  0x56   : > { %320 = vst.msk [vmem:[#allocation2 + $0xd0] sm:$0x3] %vm295_vm1, %v5547_v0  ;;  %323 = vst.msk [vmem:[#allocation2 + $0xe8] sm:$0x3] %vm295_vm1, %v5547_v0 }
  0x57   : > { %326 = vst.msk [vmem:[#allocation2 + $0x100] sm:$0x3] %vm295_vm1, %v5547_v0  ;;  %329 = vst.msk [vmem:[#allocation2 + $0x118] sm:$0x3] %vm295_vm1, %v5547_v0 }
  0x58   : > { %332 = vst.msk [vmem:[#allocation2 + $0x130] sm:$0x3] %vm295_vm1, %v5547_v0  ;;  %335 = vst.msk [vmem:[#allocation2 + $0x148] sm:$0x3] %vm295_vm1, %v5547_v0 }
  0x59   : > { %338 = vst.msk [vmem:[#allocation2 + $0x160] sm:$0x3] %vm295_vm1, %v5547_v0  ;;  %341 = vst.msk [vmem:[#allocation2 + $0x178] sm:$0x3] %vm295_vm1, %v5547_v0  ;;  %v478_v7 = vld [vmem:[#allocation2 + $0x9] sm:$0xff] }
  0x5a   : > { %344 = vst.msk [vmem:[#allocation2 + $0x190] sm:$0x3] %vm295_vm1, %v5547_v0  ;;  %347 = vst.msk [vmem:[#allocation2 + $0x1a8] sm:$0x3] %vm295_vm1, %v5547_v0  ;;  %v671_v8 = vld [vmem:[#allocation2 + $0xa] sm:$0xff]  ;;  %543 = vrot.lane.b32.xlu0 %v478_v7, %s5548_s9 }
  0x5b   : > { %381 = vst.msk [vmem:[#allocation2 + $0x19] sm:$0xff] %vm292_vm0, %v348_v1  ;;  %382 = vst.msk [vmem:[#allocation2 + $0x21] sm:$0xff] %vm292_vm0, %v349_v2  ;;  %736 = vrot.lane.b32.xlu1 %v671_v8, %s5549_s13 }
  0x5c   : > { %383 = vst.msk [vmem:[#allocation2 + $0x31] sm:$0xff] %vm292_vm0, %v350_v3  ;;  %384 = vst.msk [vmem:[#allocation2 + $0x39] sm:$0xff] %vm292_vm0, %v351_v6 }
  0x5d   : > { %385 = vst.msk [vmem:[#allocation2 + $0x49] sm:$0xff] %vm292_vm0, %v352_v9  ;;  %386 = vst.msk [vmem:[#allocation2 + $0x51] sm:$0xff] %vm292_vm0, %v353_v10 }
  0x5e   : > { %387 = vst.msk [vmem:[#allocation2 + $0x61] sm:$0xff] %vm292_vm0, %v354_v11  ;;  %388 = vst.msk [vmem:[#allocation2 + $0x69] sm:$0xff] %vm292_vm0, %v355_v12 }
  0x5f   : > { %445 = vst.msk [vmem:[#allocation4] sm:$0xff] %vm292_vm0, %v413_v13  ;;  %389 = vst.msk [vmem:[#allocation2 + $0x79] sm:$0xff] %vm292_vm0, %v356_v14 }
  0x60   : > { %390 = vst.msk [vmem:[#allocation2 + $0x81] sm:$0xff] %vm292_vm0, %v357_v15  ;;  %446 = vst.msk [vmem:[#allocation4 + $0x8] sm:$0xff] %vm292_vm0, %v414_v16 }
  0x61   : > { %391 = vst.msk [vmem:[#allocation2 + $0x91] sm:$0xff] %vm292_vm0, %v358_v32  ;;  %392 = vst.msk [vmem:[#allocation2 + $0x99] sm:$0xff] %vm292_vm0, %v359_v33 }
  0x62   : > { %v863_v17 = vld [vmem:[#allocation2 + $0x18] sm:$0xff]  ;;  %v864_v18 = vld [vmem:[#allocation2 + $0x20] sm:$0xff]  ;;  %393 = vst.msk [vmem:[#allocation2 + $0xa9] sm:$0xff] %vm292_vm0, %v360_v44  ;;  %394 = vst.msk [vmem:[#allocation2 + $0xb1] sm:$0xff] %vm292_vm0, %v361_v45 }
  0x63   : > { %447 = vst.msk [vmem:[#allocation4 + $0x10] sm:$0xff] %vm292_vm0, %v863_v17  ;;  %448 = vst.msk [vmem:[#allocation4 + $0x18] sm:$0xff] %vm292_vm0, %v864_v18  ;;  %927 = vrot.lane.b32.xlu0 %v863_v17, %s5550_s14  ;;  %929 = vrot.lane.b32.xlu1 %v864_v18, %s5550_s14  ;;  %v5866_v19 = vld [vmem:[#allocation2 + $0x30] sm:$0xff]  ;;  %v5868_v20 = vld [vmem:[#allocation2 + $0x38] sm:$0xff] }
  0x64   : > { %v1056_v21 = vld [vmem:[#allocation2 + $0x19] sm:$0xff]  ;;  %v1057_v22 = vld [vmem:[#allocation2 + $0x21] sm:$0xff]  ;;  %449 = vst.msk [vmem:[#allocation4 + $0x20] sm:$0xff] %vm292_vm0, %v5866_v19  ;;  %450 = vst.msk [vmem:[#allocation4 + $0x28] sm:$0xff] %vm292_vm0, %v5868_v20 }
  0x65   : > { %v5874_v23 = vld [vmem:[#allocation2 + $0x48] sm:$0xff]  ;;  %v5876_v24 = vld [vmem:[#allocation2 + $0x50] sm:$0xff]  ;;  %v5884_v25 = vld [vmem:[#allocation2 + $0x60] sm:$0xff]  ;;  %395 = vst.msk [vmem:[#allocation2 + $0xc1] sm:$0xff] %vm292_vm0, %v362_v52 }
  0x66   : > { %451 = vst.msk [vmem:[#allocation4 + $0x30] sm:$0xff] %vm292_vm0, %v5874_v23  ;;  %452 = vst.msk [vmem:[#allocation4 + $0x38] sm:$0xff] %vm292_vm0, %v5876_v24  ;;  %v5886_v26 = vld [vmem:[#allocation2 + $0x68] sm:$0xff]  ;;  %v1249_v27 = vld [vmem:[#allocation2 + $0x1a] sm:$0xff] }
  0x67   : > { %1120 = vrot.lane.b32.xlu0 %v1056_v21, %s5551_s15  ;;  %1122 = vrot.lane.b32.xlu1 %v1057_v22, %s5551_s15  ;;  %v1250_v28 = vld [vmem:[#allocation2 + $0x22] sm:$0xff]  ;;  %453 = vst.msk [vmem:[#allocation4 + $0x40] sm:$0xff] %vm292_vm0, %v5884_v25  ;;  %454 = vst.msk [vmem:[#allocation4 + $0x48] sm:$0xff] %vm292_vm0, %v5886_v26  ;;  %v5892_v29 = vld [vmem:[#allocation2 + $0x78] sm:$0xff] }
  0x68   : > { %v5894_v30 = vld [vmem:[#allocation2 + $0x80] sm:$0xff]  ;;  %455 = vst.msk [vmem:[#allocation4 + $0x50] sm:$0xff] %vm292_vm0, %v5892_v29  ;;  %v1636_v36 = vld [vmem:[#allocation2 + $0x31] sm:$0xff]  ;;  %v1638_v48 = vld [vmem:[#allocation2 + $0x49] sm:$0xff] }
  0x69   : > { %456 = vst.msk [vmem:[#allocation4 + $0x58] sm:$0xff] %vm292_vm0, %v5894_v30  ;;  %v1637_v37 = vld [vmem:[#allocation2 + $0x39] sm:$0xff]  ;;  %v5924_v39 = vld [vmem:[#allocation2 + $0x90] sm:$0xff]  ;;  %v5954_v46 = vld [vmem:[#allocation2 + $0xa8] sm:$0xff] }
  0x6a   : > { %v1829_v41 = vld [vmem:[#allocation2 + $0x32] sm:$0xff]  ;;  %457 = vst.msk [vmem:[#allocation4 + $0x60] sm:$0xff] %vm292_vm0, %v5924_v39  ;;  %v1830_v43 = vld [vmem:[#allocation2 + $0x3a] sm:$0xff]  ;;  %459 = vst.msk [vmem:[#allocation4 + $0x70] sm:$0xff] %vm292_vm0, %v5954_v46 }
  0x6b   : > { %1313 = vrot.lane.b32.xlu0 %v1249_v27, %s5552_s16  ;;  %1315 = vrot.lane.b32.xlu1 %v1250_v28, %s5552_s16  ;;  %v5929_v42 = vld [vmem:[#allocation2 + $0x98] sm:$0xff]  ;;  %v5960_v47 = vld [vmem:[#allocation2 + $0xb0] sm:$0xff]  ;;  %396 = vst.msk [vmem:[#allocation2 + $0xc9] sm:$0xff] %vm292_vm0, %v363_v53  ;;  %v1640_v56 = vld [vmem:[#allocation2 + $0x61] sm:$0xff] }
  0x6c   : > { %458 = vst.msk [vmem:[#allocation4 + $0x68] sm:$0xff] %vm292_vm0, %v5929_v42  ;;  %v1639_v49 = vld [vmem:[#allocation2 + $0x51] sm:$0xff]  ;;  %460 = vst.msk [vmem:[#allocation4 + $0x78] sm:$0xff] %vm292_vm0, %v5960_v47  ;;  %v5986_v54 = vld [vmem:[#allocation2 + $0xc0] sm:$0xff] }
  0x6d   : > { %v1831_v50 = vld [vmem:[#allocation2 + $0x4a] sm:$0xff]  ;;  %v1832_v51 = vld [vmem:[#allocation2 + $0x52] sm:$0xff]  ;;  %461 = vst.msk [vmem:[#allocation4 + $0x80] sm:$0xff] %vm292_vm0, %v5986_v54  ;;  %v1833_v58 = vld [vmem:[#allocation2 + $0x62] sm:$0xff] }
  0x6e   : > { %v1641_v57 = vld [vmem:[#allocation2 + $0x69] sm:$0xff]  ;;  %397 = vst.msk [vmem:[#allocation2 + $0xd9] sm:$0xff] %vm292_vm0, %v364_v60  ;;  %398 = vst.msk [vmem:[#allocation2 + $0xe1] sm:$0xff] %vm292_vm0, %v365_v61  ;;  %v6028_v2 = vld [vmem:[#allocation2 + $0x79] sm:$0xff] }
  0x6f   : > { %1507 = vrot.lane.b32.xlu0 %v5866_v19, %s5553_s21  ;;  %1509 = vrot.lane.b32.xlu1 %v5868_v20, %s5553_s21  ;;  %v1834_v59 = vld [vmem:[#allocation2 + $0x6a] sm:$0xff]  ;;  %v6030_v3 = vld [vmem:[#allocation2 + $0x81] sm:$0xff]  ;;  %v3518_v60 = vld [vmem:[#allocation6 + $0x38] sm:$0xff] }
  0x70   : > { %v6038_v6 = vld [vmem:[#allocation2 + $0x7a] sm:$0xff]  ;;  %v6045_v9 = vld [vmem:[#allocation2 + $0x82] sm:$0xff]  ;;  %v366_v18 = vld [vmem:[%s5834_s8 + $0x90] sm:$0xff] }
  0x71   : > { %399 = vst.msk [vmem:[#allocation2 + $0xf1] sm:$0xff] %vm292_vm0, %v366_v18  ;;  %v6104_v33 = vld [vmem:[#allocation2 + $0x9a] sm:$0xff]  ;;  %v6153_v61 = vld [vmem:[#allocation2 + $0xa9] sm:$0xff] }
  0x72   : > { %v5992_v55 = vld [vmem:[#allocation2 + $0xc8] sm:$0xff]  ;;  %v3523_v45 = vld [vmem:[#allocation6 + $0x60] sm:$0xff] }
  0x73   : > { %1700 = vrot.lane.b32.xlu0 %v1636_v36, %s5554_s18  ;;  %1702 = vrot.lane.b32.xlu1 %v1637_v37, %s5554_s18  ;;  %462 = vst.msk [vmem:[#allocation4 + $0x88] sm:$0xff] %vm292_vm0, %v5992_v55  ;;  %v368_v52 = vld [vmem:[%s5834_s8 + $0xa0] sm:$0xff]  ;;  %v3512_v18 = vld [vmem:[#allocation6 + $0x8] sm:$0xff] }
  0x74   : > { %401 = vst.msk [vmem:[#allocation2 + $0x109] sm:$0xff] %vm292_vm0, %v368_v52 }
  0x75   : > { %v6019_v1 = vld [vmem:[#allocation2 + $0xd8] sm:$0xff] }
  0x76   : > { %463 = vst.msk [vmem:[#allocation4 + $0x90] sm:$0xff] %vm292_vm0, %v6019_v1 }
  0x77   : > { %1893 = vrot.lane.b32.xlu0 %v1829_v41, %s5555_s22  ;;  %545 = vrot.lane.b32.xlu1 %v1056_v21, %s5548_s9 }
  0x7b   : > { %1895 = vrot.lane.b32.xlu0 %v1830_v43, %s5555_s22  ;;  %547 = vrot.lane.b32.xlu1 %v1057_v22, %s5548_s9 }
  0x7f   : > { %738 = vrot.lane.b32.xlu0 %v1249_v27, %s5549_s13  ;;  %740 = vrot.lane.b32.xlu1 %v1250_v28, %s5549_s13 }
  0x83   : > { %931 = vrot.lane.b32.xlu0 %v5866_v19, %s5550_s14  ;;  %933 = vrot.lane.b32.xlu1 %v5868_v20, %s5550_s14  ;;  %v367_v19 = vld [vmem:[%s5834_s8 + $0x98] sm:$0xff] }
  0x84   : > { %400 = vst.msk [vmem:[#allocation2 + $0xf9] sm:$0xff] %vm292_vm0, %v367_v19 }
  0x87   : > { %1124 = vrot.lane.b32.xlu0 %v1636_v36, %s5551_s15  ;;  %1126 = vrot.lane.b32.xlu1 %v1637_v37, %s5551_s15 }
  0x8b   : > { %1317 = vrot.lane.b32.xlu0 %v1829_v41, %s5552_s16  ;;  %1319 = vrot.lane.b32.xlu1 %v1830_v43, %s5552_s16 }
  0x8f   : > { %1511 = vrot.lane.b32.xlu0 %v5874_v23, %s5553_s21  ;;  %1513 = vrot.lane.b32.xlu1 %v5876_v24, %s5553_s21 }
  0x93   : > { %1704 = vrot.lane.b32.xlu0 %v1638_v48, %s5554_s18  ;;  %1706 = vrot.lane.b32.xlu1 %v1639_v49, %s5554_s18 }
  0x97   : > { %1897 = vrot.lane.b32.xlu0 %v1831_v50, %s5555_s22  ;;  %549 = vrot.lane.b32.xlu1 %v1636_v36, %s5548_s9  ;;  %v3526_v36 = vld [vmem:[#allocation6 + $0x78] sm:$0xff] }
  0x98   : > { %3656 = vmatpush1.msra.mxu1 %v3526_v36 }
  0x99   : > { %3657 = vmatprep.subr.mxu1 %v5547_v0 }
  0x9a   : > { %3658 = vmatpush1.msra.mxu1 %v3525_v40  ;;  %v3537_v40 = vld [vmem:[#allocation6 + $0xd0] sm:$0xff] }
  0x9b   : > { %1899 = vrot.lane.b32.xlu0 %v1832_v51, %s5555_s22  ;;  %551 = vrot.lane.b32.xlu1 %v1637_v37, %s5548_s9 }
  0x9c   : > { %3659 = vmatprep.subr.mxu1 %v5547_v0 }
  0x9f   : > { %742 = vrot.lane.b32.xlu0 %v1829_v41, %s5549_s13  ;;  %744 = vrot.lane.b32.xlu1 %v1830_v43, %s5549_s13  ;;  %v542_v62 = vpop.permute.xlu0 %541  ;;  %v3524_v41 = vld [vmem:[#allocation6 + $0x68] sm:$0xff] }
  0xa0   : > { %v735_v63 = vpop.permute.xlu1 %734  ;;  %638 = vst.msk [vmem:[#allocation4] sm:$0xff] %vm637_vm3, %v542_v62  ;;  %3660 = vmatpush1.msra.mxu1 %v3524_v41  ;;  %v6155_v62 = vld [vmem:[#allocation2 + $0xb1] sm:$0xff] }
  0xa1   : > { %831 = vst.msk [vmem:[#allocation4] sm:$0xff] %vm830_vm4, %v735_v63  ;;  %3661 = vmatprep.subr.mxu1 %v5547_v0  ;;  %v6239_v41 = vld [vmem:[#allocation3] sm:$0xff] }
  0xa2   : > { %3662 = vmatpush1.msra.mxu1 %v3523_v45 }
  0xa3   : > { %935 = vrot.lane.b32.xlu0 %v5874_v23, %s5550_s14  ;;  %937 = vrot.lane.b32.xlu1 %v5876_v24, %s5550_s14  ;;  %v6084_v24 = vld [vmem:[#allocation2 + $0x91] sm:$0xff] }
  0xa4   : > { %3663 = vmatprep.subr.mxu1 %v5547_v0 }
  0xa7   : > { %1128 = vrot.lane.b32.xlu0 %v1638_v48, %s5551_s15  ;;  %1130 = vrot.lane.b32.xlu1 %v1639_v49, %s5551_s15 }
  0xab   : > { %1321 = vrot.lane.b32.xlu0 %v1831_v50, %s5552_s16  ;;  %1323 = vrot.lane.b32.xlu1 %v1832_v51, %s5552_s16 }
  0xaf   : > { %1515 = vrot.lane.b32.xlu0 %v5884_v25, %s5553_s21  ;;  %1517 = vrot.lane.b32.xlu1 %v5886_v26, %s5553_s21 }
  0xb3   : > { %1708 = vrot.lane.b32.xlu0 %v1640_v56, %s5554_s18  ;;  %1710 = vrot.lane.b32.xlu1 %v1641_v57, %s5554_s18 }
  0xb7   : > { %1901 = vrot.lane.b32.xlu0 %v1833_v58, %s5555_s22  ;;  %553 = vrot.lane.b32.xlu1 %v1638_v48, %s5548_s9  ;;  %v3522_v48 = vld [vmem:[#allocation6 + $0x58] sm:$0xff] }
  0xb8   : > { %3664 = vmatpush1.msra.mxu1 %v3522_v48 }
  0xb9   : > { %3665 = vmatprep.subr.mxu1 %v5547_v0 }
  0xbb   : > { %1903 = vrot.lane.b32.xlu0 %v1834_v59, %s5555_s22  ;;  %555 = vrot.lane.b32.xlu1 %v1639_v49, %s5548_s9 }
  0xbf   : > { %746 = vrot.lane.b32.xlu0 %v1831_v50, %s5549_s13  ;;  %748 = vrot.lane.b32.xlu1 %v1832_v51, %s5549_s13  ;;  %v3521_v51 = vld [vmem:[#allocation6 + $0x50] sm:$0xff] }
  0xc0   : > { %3666 = vmatpush1.msra.mxu1 %v3521_v51 }
  0xc1   : > { %3667 = vmatprep.subr.mxu1 %v5547_v0 }
  0xc3   : > { %939 = vrot.lane.b32.xlu0 %v5884_v25, %s5550_s14  ;;  %941 = vrot.lane.b32.xlu1 %v5886_v26, %s5550_s14  ;;  %v6086_v25 = vld [vmem:[#allocation2 + $0x99] sm:$0xff] }
  0xc7   : > { %1132 = vrot.lane.b32.xlu0 %v1640_v56, %s5551_s15  ;;  %1134 = vrot.lane.b32.xlu1 %v1641_v57, %s5551_s15 }
  0xcb   : > { %1325 = vrot.lane.b32.xlu0 %v1833_v58, %s5552_s16  ;;  %1327 = vrot.lane.b32.xlu1 %v1834_v59, %s5552_s16 }
  0xcc   : > { %v544_v4 = vpop.permute.xlu0 %543 }
  0xcd   : > { %v737_v5 = vpop.permute.xlu1 %736  ;;  %639 = vst.msk [vmem:[#allocation4 + $0x8] sm:$0xff] %vm637_vm3, %v544_v4  ;;  %v3517_v4 = vld [vmem:[#allocation6 + $0x30] sm:$0xff] }
  0xce   : > { %832 = vst.msk [vmem:[#allocation4 + $0x8] sm:$0xff] %vm830_vm4, %v737_v5  ;;  %v3516_v5 = vld [vmem:[#allocation6 + $0x28] sm:$0xff] }
  0xcf   : > { %1519 = vrot.lane.b32.xlu0 %v5892_v29, %s5553_s21  ;;  %1521 = vrot.lane.b32.xlu1 %v5894_v30, %s5553_s21 }
  0xd3   : > { %1712 = vrot.lane.b32.xlu0 %v6028_v2, %s5554_s18  ;;  %1714 = vrot.lane.b32.xlu1 %v6030_v3, %s5554_s18 }
  0xd5   : > { %v928_v7 = vpop.permute.xlu0 %927  ;;  %v930_v8 = vpop.permute.xlu1 %929 }
  0xd6   : > { %1024 = vst.msk [vmem:[#allocation4] sm:$0xff] %vm1023_vm5, %v928_v7  ;;  %1025 = vst.msk [vmem:[#allocation4 + $0x8] sm:$0xff] %vm1023_vm5, %v930_v8 }
  0xd7   : > { %1905 = vrot.lane.b32.xlu0 %v6038_v6, %s5555_s22  ;;  %557 = vrot.lane.b32.xlu1 %v1640_v56, %s5548_s9  ;;  %v3520_v56 = vld [vmem:[#allocation6 + $0x48] sm:$0xff] }
  0xd8   : > { %3668 = vmatpush1.msra.mxu1 %v3520_v56 }
  0xd9   : > { %v1121_v10 = vpop.permute.xlu0 %1120  ;;  %v1123_v11 = vpop.permute.xlu1 %1122  ;;  %3669 = vmatprep.subr.mxu1 %v5547_v0 }
  0xda   : > { %1217 = vst.msk [vmem:[#allocation4] sm:$0xff] %vm1216_vm6, %v1121_v10  ;;  %1218 = vst.msk [vmem:[#allocation4 + $0x8] sm:$0xff] %vm1216_vm6, %v1123_v11  ;;  %v3515_v10 = vld [vmem:[#allocation6 + $0x20] sm:$0xff]  ;;  %v6176_v11 = vld [vmem:[#allocation2 + $0xb2] sm:$0xff] }
  0xdb   : > { %1907 = vrot.lane.b32.xlu0 %v6045_v9, %s5555_s22  ;;  %559 = vrot.lane.b32.xlu1 %v1641_v57, %s5548_s9  ;;  %v3519_v57 = vld [vmem:[#allocation6 + $0x40] sm:$0xff] }
  0xdc   : > { %3670 = vmatpush1.msra.mxu1 %v3519_v57 }
  0xdd   : > { %v1314_v12 = vpop.permute.xlu0 %1313  ;;  %v1316_v13 = vpop.permute.xlu1 %1315  ;;  %3671 = vmatprep.subr.mxu1 %v5547_v0 }
  0xde   : > { %1410 = vst.msk [vmem:[#allocation4] sm:$0xff] %vm1409_vm7, %v1314_v12  ;;  %1411 = vst.msk [vmem:[#allocation4 + $0x8] sm:$0xff] %vm1409_vm7, %v1316_v13  ;;  %3672 = vmatpush1.msra.mxu1 %v3518_v60 }
  0xdf   : > { %750 = vrot.lane.b32.xlu0 %v1833_v58, %s5549_s13  ;;  %752 = vrot.lane.b32.xlu1 %v1834_v59, %s5549_s13 }
  0xe0   : > { %3673 = vmatprep.subr.mxu1 %v5547_v0 }
  0xe1   : > { %v1508_v14 = vpop.permute.xlu0 %1507  ;;  %v1510_v15 = vpop.permute.xlu1 %1509  ;;  %3674 = vmatpush1.msra.mxu1 %v3517_v4  ;;  %v372_v4 = vld [vmem:[%s5834_s8 + $0xc0] sm:$0xff] }
  0xe2   : > { %1604 = vst.msk [vmem:[#allocation4] sm:$0xff] %vm1603_vm8, %v1508_v14  ;;  %1605 = vst.msk [vmem:[#allocation4 + $0x8] sm:$0xff] %vm1603_vm8, %v1510_v15  ;;  %3675 = vmatprep.subr.mxu1 %v5547_v0  ;;  %v3514_v14 = vld [vmem:[#allocation6 + $0x18] sm:$0xff]  ;;  %v3513_v15 = vld [vmem:[#allocation6 + $0x10] sm:$0xff] }
  0xe3   : > { %943 = vrot.lane.b32.xlu0 %v5892_v29, %s5550_s14  ;;  %945 = vrot.lane.b32.xlu1 %v5894_v30, %s5550_s14  ;;  %v6095_v29 = vld [vmem:[#allocation2 + $0x92] sm:$0xff]  ;;  %405 = vst.msk [vmem:[#allocation2 + $0x139] sm:$0xff] %vm292_vm0, %v372_v4 }
  0xe4   : > { %3676 = vmatpush1.msra.mxu1 %v3516_v5  ;;  %v433_v4 = vld [vmem:[#allocation2 + $0xf0] sm:$0xff] }
  0xe5   : > { %v1701_v16 = vpop.permute.xlu0 %1700  ;;  %v1703_v17 = vpop.permute.xlu1 %1702  ;;  %3677 = vmatprep.subr.mxu1 %v5547_v0  ;;  %465 = vst.msk [vmem:[#allocation4 + $0xa0] sm:$0xff] %vm292_vm0, %v433_v4 }
  0xe6   : > { %1797 = vst.msk [vmem:[#allocation4] sm:$0xff] %vm1796_vm9, %v1701_v16  ;;  %1798 = vst.msk [vmem:[#allocation4 + $0x8] sm:$0xff] %vm1796_vm9, %v1703_v17  ;;  %3678 = vmatpush1.msra.mxu1 %v3515_v10 }
  0xe7   : > { %1136 = vrot.lane.b32.xlu0 %v6028_v2, %s5551_s15  ;;  %1138 = vrot.lane.b32.xlu1 %v6030_v3, %s5551_s15 }
  0xe8   : > { %3679 = vmatprep.subr.mxu1 %v5547_v0 }
  0xe9   : > { %v1894_v20 = vpop.permute.xlu0 %1893  ;;  %v546_v21 = vpop.permute.xlu1 %545  ;;  %3680 = vmatpush1.msra.mxu1 %v3514_v14  ;;  %v6312_v14 = vld [vmem:[#allocation2 + $0xd9] sm:$0xff] }
  0xea   : > { %1990 = vst.msk [vmem:[#allocation4] sm:$0xff] %vm1989_vm10, %v1894_v20  ;;  %3681 = vmatprep.subr.mxu1 %v5547_v0 }
  0xeb   : > { %640 = vst.msk [vmem:[#allocation4 + $0x10] sm:$0xff] %vm637_vm3, %v546_v21  ;;  %1329 = vrot.lane.b32.xlu0 %v6038_v6, %s5552_s16  ;;  %1331 = vrot.lane.b32.xlu1 %v6045_v9, %s5552_s16  ;;  %v3511_v21 = vld [vmem:[#allocation6] sm:$0xff] }
  0xec   : > { %3682 = vmatpush1.msra.mxu1 %v3513_v15  ;;  %v6314_v15 = vld [vmem:[#allocation2 + $0xe1] sm:$0xff] }
  0xed   : > { %v1896_v22 = vpop.permute.xlu0 %1895  ;;  %v548_v23 = vpop.permute.xlu1 %547  ;;  %3683 = vmatprep.subr.mxu1 %v5547_v0 }
  0xee   : > { %1991 = vst.msk [vmem:[#allocation4 + $0x8] sm:$0xff] %vm1989_vm10, %v1896_v22  ;;  %3684 = vmatpush1.msra.mxu1 %v3512_v18  ;;  %v3542_v22 = vld [vmem:[#allocation6 + $0xf8] sm:$0xff] }
  0xef   : > { %641 = vst.msk [vmem:[#allocation4 + $0x18] sm:$0xff] %vm637_vm3, %v548_v23  ;;  %1523 = vrot.lane.b32.xlu0 %v5924_v39, %s5553_s21  ;;  %1525 = vrot.lane.b32.xlu1 %v5929_v42, %s5553_s21 }
  0xf0   : > { %3685 = vmatprep.subr.mxu1 %v5547_v0 }
  0xf1   : > { %v739_v26 = vpop.permute.xlu0 %738  ;;  %v741_v27 = vpop.permute.xlu1 %740  ;;  %v2022_v28 = vld [vmem:[#allocation4] sm:$0xff]  ;;  %3686 = vmatpush1.msra.mxu1 %v3511_v21 }
  0xf2   : > { %833 = vst.msk [vmem:[#allocation4 + $0x10] sm:$0xff] %vm830_vm4, %v739_v26  ;;  %834 = vst.msk [vmem:[#allocation4 + $0x18] sm:$0xff] %vm830_vm4, %v741_v27  ;;  %5222 = vmatprep.mubr.msk.f32.mxu0 %vm2059_vm11, %v2022_v28  ;;  %3687 = vmatprep.subr.mxu1 %v5547_v0  ;;  %v370_v26 = vld [vmem:[%s5834_s8 + $0xb0] sm:$0xff]  ;;  %v3540_v28 = vld [vmem:[#allocation6 + $0xe8] sm:$0xff] }
  0xf3   : > { %1716 = vrot.lane.b32.xlu0 %v6084_v24, %s5554_s18  ;;  %1718 = vrot.lane.b32.xlu1 %v6086_v25, %s5554_s18  ;;  %403 = vst.msk [vmem:[#allocation2 + $0x121] sm:$0xff] %vm292_vm0, %v370_v26 }
  0xf4   : > { %3688 = vmatpush2.msra.mxu1 %v3542_v22 }
  0xf5   : > { %v932_v30 = vpop.permute.xlu0 %931  ;;  %v934_v31 = vpop.permute.xlu1 %933  ;;  %v2023_v32 = vld [vmem:[#allocation4 + $0x8] sm:$0xff]  ;;  %3689 = vmatprep.subr.mxu1 %v5547_v0 }
  0xf6   : > { %1026 = vst.msk [vmem:[#allocation4 + $0x10] sm:$0xff] %vm1023_vm5, %v932_v30  ;;  %1027 = vst.msk [vmem:[#allocation4 + $0x18] sm:$0xff] %vm1023_vm5, %v934_v31  ;;  %5223 = vmatmul.mubr.msk.f32.vlgmr.msra.gmra.mxu0 %vm2059_vm11, %v2023_v32  ;;  %v3538_v32 = vld [vmem:[#allocation6 + $0xd8] sm:$0xff] }
  0xf7   : > { %1909 = vrot.lane.b32.xlu0 %v6095_v29, %s5555_s22  ;;  %561 = vrot.lane.b32.xlu1 %v6028_v2, %s5548_s9 }
  0xf9   : > { %v1125_v34 = vpop.permute.xlu0 %1124  ;;  %v1127_v35 = vpop.permute.xlu1 %1126 }
  0xfa   : > { %1219 = vst.msk [vmem:[#allocation4 + $0x10] sm:$0xff] %vm1216_vm6, %v1125_v34  ;;  %1220 = vst.msk [vmem:[#allocation4 + $0x18] sm:$0xff] %vm1216_vm6, %v1127_v35  ;;  %v6231_v34 = vld [vmem:[#allocation2 + $0xc1] sm:$0xff]  ;;  %v6233_v35 = vld [vmem:[#allocation2 + $0xc9] sm:$0xff] }
  0xfb   : > { %1911 = vrot.lane.b32.xlu0 %v6104_v33, %s5555_s22  ;;  %563 = vrot.lane.b32.xlu1 %v6030_v3, %s5548_s9 }
  0xfd   : > { %v1318_v37 = vpop.permute.xlu0 %1317  ;;  %v1320_v38 = vpop.permute.xlu1 %1319 }
  0xfe   : > { %1412 = vst.msk [vmem:[#allocation4 + $0x10] sm:$0xff] %vm1409_vm7, %v1318_v37  ;;  %1413 = vst.msk [vmem:[#allocation4 + $0x18] sm:$0xff] %vm1409_vm7, %v1320_v38 }
  0xff   : > { %754 = vrot.lane.b32.xlu0 %v6038_v6, %s5549_s13  ;;  %756 = vrot.lane.b32.xlu1 %v6045_v9, %s5549_s13  ;;  %v6166_v6 = vld [vmem:[#allocation2 + $0xaa] sm:$0xff] }
 0x101   : > { %v1512_v43 = vpop.permute.xlu0 %1511  ;;  %v1514_v44 = vpop.permute.xlu1 %1513 }
 0x102   : > { %1606 = vst.msk [vmem:[#allocation4 + $0x10] sm:$0xff] %vm1603_vm8, %v1512_v43  ;;  %1607 = vst.msk [vmem:[#allocation4 + $0x18] sm:$0xff] %vm1603_vm8, %v1514_v44  ;;  %v6246_v43 = vld [vmem:[#allocation2 + $0xc2] sm:$0xff] }
 0x103   : > { %947 = vrot.lane.b32.xlu0 %v5924_v39, %s5550_s14  ;;  %949 = vrot.lane.b32.xlu1 %v5929_v42, %s5550_s14  ;;  %v369_v39 = vld [vmem:[%s5834_s8 + $0xa8] sm:$0xff] }
 0x104   : > { %402 = vst.msk [vmem:[#allocation2 + $0x111] sm:$0xff] %vm292_vm0, %v369_v39  ;;  %v3534_v39 = vld [vmem:[#allocation6 + $0xb8] sm:$0xff] }
 0x105   : > { %v1705_v49 = vpop.permute.xlu0 %1704  ;;  %v1707_v50 = vpop.permute.xlu1 %1706 }
 0x106   : > { %1799 = vst.msk [vmem:[#allocation4 + $0x10] sm:$0xff] %vm1796_vm9, %v1705_v49  ;;  %1800 = vst.msk [vmem:[#allocation4 + $0x18] sm:$0xff] %vm1796_vm9, %v1707_v50  ;;  %v3535_v49 = vld [vmem:[#allocation6 + $0xc0] sm:$0xff]  ;;  %v6256_v50 = vld [vmem:[#allocation2 + $0xca] sm:$0xff] }
 0x107   : > { %1140 = vrot.lane.b32.xlu0 %v6084_v24, %s5551_s15  ;;  %1142 = vrot.lane.b32.xlu1 %v6086_v25, %s5551_s15 }
 0x109   : > { %v1898_v42 = vpop.permute.xlu0 %1897  ;;  %v550_v53 = vpop.permute.xlu1 %549 }
 0x10a   : > { %1992 = vst.msk [vmem:[#allocation4 + $0x10] sm:$0xff] %vm1989_vm10, %v1898_v42  ;;  %v2710_v42 = vld [vmem:[#allocation3 + $0x1] sm:$0xff] }
 0x10b   : > { %642 = vst.msk [vmem:[#allocation4 + $0x20] sm:$0xff] %vm637_vm3, %v550_v53  ;;  %1333 = vrot.lane.b32.xlu0 %v6095_v29, %s5552_s16  ;;  %1335 = vrot.lane.b32.xlu1 %v6104_v33, %s5552_s16  ;;  %v3533_v53 = vld [vmem:[#allocation6 + $0xb0] sm:$0xff] }
 0x10c   : > { %3719 = vmatprep.mubr.f32.mxu1 %v2710_v42 }
 0x10d   : > { %v1900_v58 = vpop.permute.xlu0 %1899  ;;  %v552_v59 = vpop.permute.xlu1 %551 }
 0x10e   : > { %1993 = vst.msk [vmem:[#allocation4 + $0x18] sm:$0xff] %vm1989_vm10, %v1900_v58  ;;  %v3532_v58 = vld [vmem:[#allocation6 + $0xa8] sm:$0xff] }
 0x10f   : > { %643 = vst.msk [vmem:[#allocation4 + $0x28] sm:$0xff] %vm637_vm3, %v552_v59  ;;  %1527 = vrot.lane.b32.xlu0 %v5954_v46, %s5553_s21  ;;  %1529 = vrot.lane.b32.xlu1 %v5960_v47, %s5553_s21 }
 0x111   : > { %v743_v63 = vpop.permute.xlu0 %742  ;;  %v745_v2 = vpop.permute.xlu1 %744  ;;  %v2024_v3 = vld [vmem:[#allocation4 + $0x10] sm:$0xff] }
 0x112   : > { %835 = vst.msk [vmem:[#allocation4 + $0x20] sm:$0xff] %vm830_vm4, %v743_v63  ;;  %836 = vst.msk [vmem:[#allocation4 + $0x28] sm:$0xff] %vm830_vm4, %v745_v2  ;;  %5225 = vmatprep.mubr.msk.f32.mxu0 %vm2059_vm11, %v2024_v3  ;;  %v3529_v3 = vld [vmem:[#allocation6 + $0x90] sm:$0xff] }
 0x113   : > { %1720 = vrot.lane.b32.xlu0 %v6153_v61, %s5554_s18  ;;  %1722 = vrot.lane.b32.xlu1 %v6155_v62, %s5554_s18 }
 0x115   : > { %v936_v7 = vpop.permute.xlu0 %935  ;;  %v938_v8 = vpop.permute.xlu1 %937  ;;  %v2025_v9 = vld [vmem:[#allocation4 + $0x18] sm:$0xff] }
 0x116   : > { %1028 = vst.msk [vmem:[#allocation4 + $0x20] sm:$0xff] %vm1023_vm5, %v936_v7  ;;  %1029 = vst.msk [vmem:[#allocation4 + $0x28] sm:$0xff] %vm1023_vm5, %v938_v8  ;;  %5226 = vmatmul.mubr.msk.f32.gmra.mxu0 %vm2059_vm11, %v2025_v9  ;;  %v3527_v7 = vld [vmem:[#allocation6 + $0x80] sm:$0xff] }
 0x117   : > { %1913 = vrot.lane.b32.xlu0 %v6166_v6, %s5555_s22  ;;  %565 = vrot.lane.b32.xlu1 %v6084_v24, %s5548_s9  ;;  %v1458_v8 = vld [vmem:[#allocation2 + $0xe0] sm:$0xff] }
 0x119   : > { %v1129_v12 = vpop.permute.xlu0 %1128  ;;  %v1131_v13 = vpop.permute.xlu1 %1130 }
 0x11a   : > { %1221 = vst.msk [vmem:[#allocation4 + $0x20] sm:$0xff] %vm1216_vm6, %v1129_v12  ;;  %1222 = vst.msk [vmem:[#allocation4 + $0x28] sm:$0xff] %vm1216_vm6, %v1131_v13  ;;  %v6303_v12 = vld [vmem:[#allocation2 + $0x138] sm:$0xff] }
 0x11b   : > { %1915 = vrot.lane.b32.xlu0 %v6176_v11, %s5555_s22  ;;  %567 = vrot.lane.b32.xlu1 %v6086_v25, %s5548_s9  ;;  %v3541_v25 = vld [vmem:[#allocation6 + $0xf0] sm:$0xff]  ;;  %471 = vst.msk [vmem:[#allocation4 + $0xd0] sm:$0xff] %vm292_vm0, %v6303_v12 }
 0x11c   : > { %3690 = vmatpush2.msra.mxu1 %v3541_v25 }
 0x11d   : > { %v1322_v16 = vpop.permute.xlu0 %1321  ;;  %v1324_v17 = vpop.permute.xlu1 %1323  ;;  %3691 = vmatprep.subr.mxu1 %v5547_v0 }
 0x11e   : > { %1414 = vst.msk [vmem:[#allocation4 + $0x20] sm:$0xff] %vm1409_vm7, %v1322_v16  ;;  %1415 = vst.msk [vmem:[#allocation4 + $0x28] sm:$0xff] %vm1409_vm7, %v1324_v17  ;;  %3692 = vmatpush2.msra.mxu1 %v3540_v28 }
 0x11f   : > { %758 = vrot.lane.b32.xlu0 %v6095_v29, %s5549_s13  ;;  %760 = vrot.lane.b32.xlu1 %v6104_v33, %s5549_s13  ;;  %v3539_v29 = vld [vmem:[#allocation6 + $0xe0] sm:$0xff] }
 0x120   : > { %3693 = vmatprep.subr.mxu1 %v5547_v0  ;;  %v6223_v33 = vld [vmem:[#allocation2 + $0x120] sm:$0xff] }
 0x121   : > { %v1516_v19 = vpop.permute.xlu0 %1515  ;;  %v1518_v20 = vpop.permute.xlu1 %1517  ;;  %3694 = vmatpush2.msra.mxu1 %v3539_v29  ;;  %469 = vst.msk [vmem:[#allocation4 + $0xc0] sm:$0xff] %vm292_vm0, %v6223_v33 }
 0x122   : > { %1608 = vst.msk [vmem:[#allocation4 + $0x20] sm:$0xff] %vm1603_vm8, %v1516_v19  ;;  %1609 = vst.msk [vmem:[#allocation4 + $0x28] sm:$0xff] %vm1603_vm8, %v1518_v20  ;;  %3695 = vmatprep.subr.mxu1 %v5547_v0  ;;  %v3536_v0 = vld [vmem:[#allocation6 + $0xc8] sm:$0xff]  ;;  %v6327_v19 = vld [vmem:[#allocation2 + $0xda] sm:$0xff] }
 0x123   : > { %951 = vrot.lane.b32.xlu0 %v5954_v46, %s5550_s14  ;;  %953 = vrot.lane.b32.xlu1 %v5960_v47, %s5550_s14  ;;  %v371_v46 = vld [vmem:[%s5834_s8 + $0xb8] sm:$0xff] }
 0x124   : > { %404 = vst.msk [vmem:[#allocation2 + $0x129] sm:$0xff] %vm292_vm0, %v371_v46  ;;  %3696 = vmatpush2.msra.mxu1 %v3538_v32 }
 0x125   : > { %v1709_v23 = vpop.permute.xlu0 %1708  ;;  %v1711_v24 = vpop.permute.xlu1 %1710  ;;  %3697 = vmatprep.subr.mxu1 %v6239_v41 }
 0x126   : > { %1801 = vst.msk [vmem:[#allocation4 + $0x20] sm:$0xff] %vm1796_vm9, %v1709_v23  ;;  %1802 = vst.msk [vmem:[#allocation4 + $0x28] sm:$0xff] %vm1796_vm9, %v1711_v24  ;;  %3698 = vmatpush2.msra.mxu1 %v3537_v40  ;;  %v6337_v23 = vld [vmem:[#allocation2 + $0xe2] sm:$0xff] }
 0x127   : > { %1144 = vrot.lane.b32.xlu0 %v6153_v61, %s5551_s15  ;;  %1146 = vrot.lane.b32.xlu1 %v6155_v62, %s5551_s15 }
 0x128   : > { %3699 = vmatprep.subr.mxu1 %v6239_v41 }
 0x129   : > { %v1902_v47 = vpop.permute.xlu0 %1901  ;;  %v554_v27 = vpop.permute.xlu1 %553  ;;  %3700 = vmatpush2.msra.mxu1 %v3536_v0  ;;  %v6383_v0 = vld [vmem:[#allocation2 + $0xf1] sm:$0xff] }
 0x12a   : > { %1994 = vst.msk [vmem:[#allocation4 + $0x20] sm:$0xff] %vm1989_vm10, %v1902_v47  ;;  %3701 = vmatprep.subr.mxu1 %v6239_v41 }
 0x12b   : > { %644 = vst.msk [vmem:[#allocation4 + $0x30] sm:$0xff] %vm637_vm3, %v554_v27  ;;  %1337 = vrot.lane.b32.xlu0 %v6166_v6, %s5552_s16  ;;  %1339 = vrot.lane.b32.xlu1 %v6176_v11, %s5552_s16 }
 0x12c   : > { %3702 = vmatpush2.msra.mxu1 %v3535_v49  ;;  %v6396_v49 = vld [vmem:[#allocation2 + $0xf2] sm:$0xff] }
 0x12d   : > { %v1904_v30 = vpop.permute.xlu0 %1903  ;;  %v556_v31 = vpop.permute.xlu1 %555  ;;  %3703 = vmatprep.subr.mxu1 %v6239_v41 }
 0x12e   : > { %1995 = vst.msk [vmem:[#allocation4 + $0x28] sm:$0xff] %vm1989_vm10, %v1904_v30  ;;  %3704 = vmatpush2.msra.mxu1 %v3534_v39  ;;  %v374_v30 = vld [vmem:[%s5834_s8 + $0xd0] sm:$0xff]  ;;  %v6405_v39 = vld [vmem:[#allocation2 + $0xfa] sm:$0xff] }
 0x12f   : > { %645 = vst.msk [vmem:[#allocation4 + $0x38] sm:$0xff] %vm637_vm3, %v556_v31  ;;  %1531 = vrot.lane.b32.xlu0 %v5986_v54, %s5553_s21  ;;  %1533 = vrot.lane.b32.xlu1 %v5992_v55, %s5553_s21  ;;  %v375_v31 = vld [vmem:[%s5834_s8 + $0xd8] sm:$0xff] }
 0x130   : > { %3705 = vmatprep.subr.mxu1 %v6239_v41  ;;  %407 = vst.msk [vmem:[#allocation2 + $0x151] sm:$0xff] %vm292_vm0, %v374_v30  ;;  %408 = vst.msk [vmem:[#allocation2 + $0x159] sm:$0xff] %vm292_vm0, %v375_v31 }
 0x131   : > { %v747_v36 = vpop.permute.xlu0 %746  ;;  %v749_v37 = vpop.permute.xlu1 %748  ;;  %v2026_v38 = vld [vmem:[#allocation4 + $0x20] sm:$0xff]  ;;  %3706 = vmatpush2.msra.mxu1 %v3533_v53 }
 0x132   : > { %837 = vst.msk [vmem:[#allocation4 + $0x30] sm:$0xff] %vm830_vm4, %v747_v36  ;;  %838 = vst.msk [vmem:[#allocation4 + $0x38] sm:$0xff] %vm830_vm4, %v749_v37  ;;  %5228 = vmatprep.mubr.msk.f32.mxu0 %vm2059_vm11, %v2026_v38  ;;  %3707 = vmatprep.subr.mxu1 %v6239_v41  ;;  %v432_v38 = vld [vmem:[#allocation2 + $0xe0] sm:$0xff] }
 0x133   : > { %1724 = vrot.lane.b32.xlu0 %v6231_v34, %s5554_s18  ;;  %1726 = vrot.lane.b32.xlu1 %v6233_v35, %s5554_s18  ;;  %464 = vst.msk [vmem:[#allocation4 + $0x98] sm:$0xff] %vm292_vm0, %v432_v38  ;;  %v6516_v38 = vld [vmem:[#allocation2 + $0x129] sm:$0xff] }
 0x134   : > { %3708 = vmatpush2.msra.mxu1 %v3532_v58 }
 0x135   : > { %v940_v44 = vpop.permute.xlu0 %939  ;;  %v942_v45 = vpop.permute.xlu1 %941  ;;  %v2027_v48 = vld [vmem:[#allocation4 + $0x28] sm:$0xff]  ;;  %3709 = vmatprep.subr.mxu1 %v6239_v41 }
 0x136   : > { %1030 = vst.msk [vmem:[#allocation4 + $0x30] sm:$0xff] %vm1023_vm5, %v940_v44  ;;  %1031 = vst.msk [vmem:[#allocation4 + $0x38] sm:$0xff] %vm1023_vm5, %v942_v45  ;;  %5229 = vmatmul.mubr.msk.f32.gmra.mxu0 %vm2059_vm11, %v2027_v48 }
 0x137   : > { %1917 = vrot.lane.b32.xlu0 %v6246_v43, %s5555_s22  ;;  %569 = vrot.lane.b32.xlu1 %v6153_v61, %s5548_s9  ;;  %v3531_v61 = vld [vmem:[#allocation6 + $0xa0] sm:$0xff]  ;;  %v6375_v40 = vld [vmem:[#allocation2 + $0x150] sm:$0xff] }
 0x138   : > { %3710 = vmatpush2.msra.mxu1 %v3531_v61  ;;  %473 = vst.msk [vmem:[#allocation4 + $0xe0] sm:$0xff] %vm292_vm0, %v6375_v40 }
 0x139   : > { %v1133_v51 = vpop.permute.xlu0 %1132  ;;  %v1135_v52 = vpop.permute.xlu1 %1134  ;;  %3711 = vmatprep.subr.mxu1 %v6239_v41 }
 0x13a   : > { %1223 = vst.msk [vmem:[#allocation4 + $0x30] sm:$0xff] %vm1216_vm6, %v1133_v51  ;;  %1224 = vst.msk [vmem:[#allocation4 + $0x38] sm:$0xff] %vm1216_vm6, %v1135_v52 }
 0x13b   : > { %1919 = vrot.lane.b32.xlu0 %v6256_v50, %s5555_s22  ;;  %571 = vrot.lane.b32.xlu1 %v6155_v62, %s5548_s9  ;;  %v3530_v62 = vld [vmem:[#allocation6 + $0x98] sm:$0xff] }
 0x13c   : > { %3712 = vmatpush2.msra.mxu1 %v3530_v62  ;;  %v376_v62 = vld [vmem:[%s5834_s8 + $0xe0] sm:$0xff] }
 0x13d   : > { %v1326_v56 = vpop.permute.xlu0 %1325  ;;  %v1328_v57 = vpop.permute.xlu1 %1327  ;;  %3713 = vmatprep.subr.mxu1 %v6239_v41  ;;  %409 = vst.msk [vmem:[#allocation2 + $0x169] sm:$0xff] %vm292_vm0, %v376_v62 }
 0x13e   : > { %1416 = vst.msk [vmem:[#allocation4 + $0x30] sm:$0xff] %vm1409_vm7, %v1326_v56  ;;  %1417 = vst.msk [vmem:[#allocation4 + $0x38] sm:$0xff] %vm1409_vm7, %v1328_v57  ;;  %3714 = vmatpush2.msra.mxu1 %v3529_v3 }
 0x13f   : > { %762 = vrot.lane.b32.xlu0 %v6166_v6, %s5549_s13  ;;  %764 = vrot.lane.b32.xlu1 %v6176_v11, %s5549_s13  ;;  %v3528_v6 = vld [vmem:[#allocation6 + $0x88] sm:$0xff]  ;;  %v2711_v11 = vld [vmem:[#allocation3 + $0x9] sm:$0xff] }
 0x140   : > { %3715 = vmatprep.subr.mxu1 %v6239_v41 }
 0x141   : > { %v1520_v59 = vpop.permute.xlu0 %1519  ;;  %v1522_v60 = vpop.permute.xlu1 %1521  ;;  %3716 = vmatpush2.msra.mxu1 %v3528_v6 }
 0x142   : > { %1610 = vst.msk [vmem:[#allocation4 + $0x30] sm:$0xff] %vm1603_vm8, %v1520_v59  ;;  %1611 = vst.msk [vmem:[#allocation4 + $0x38] sm:$0xff] %vm1603_vm8, %v1522_v60  ;;  %3717 = vmatprep.subr.mxu1 %v6239_v41 }
 0x143   : > { %955 = vrot.lane.b32.xlu0 %v5986_v54, %s5550_s14  ;;  %957 = vrot.lane.b32.xlu1 %v5992_v55, %s5550_s14  ;;  %v373_v54 = vld [vmem:[%s5834_s8 + $0xc8] sm:$0xff] }
 0x144   : > { %406 = vst.msk [vmem:[#allocation2 + $0x141] sm:$0xff] %vm292_vm0, %v373_v54  ;;  %3718 = vmatpush2.msra.mxu1 %v3527_v7  ;;  %v1461_v54 = vld [vmem:[#allocation2 + $0x108] sm:$0xff]  ;;  %v434_v7 = vld [vmem:[#allocation2 + $0xf8] sm:$0xff] }
 0x145   : > { %v1713_v63 = vpop.permute.xlu0 %1712  ;;  %v1715_v2 = vpop.permute.xlu1 %1714  ;;  %3720 = vmatmul.mubr.f32.vlgmr.msra.gmra.mxu1 %v6239_v41  ;;  %4105 = vmatprep.subr.mxu1 %v6239_v41  ;;  %466 = vst.msk [vmem:[#allocation4 + $0xa8] sm:$0xff] %vm292_vm0, %v434_v7 }
 0x146   : > { %1803 = vst.msk [vmem:[#allocation4 + $0x30] sm:$0xff] %vm1796_vm9, %v1713_v63  ;;  %1804 = vst.msk [vmem:[#allocation4 + $0x38] sm:$0xff] %vm1796_vm9, %v1715_v2  ;;  %3724 = vmatprep.mubr.f32.mxu1 %v2711_v11  ;;  %v377_v63 = vld [vmem:[%s5834_s8 + $0xe8] sm:$0xff]  ;;  %v6453_v11 = vld [vmem:[#allocation2 + $0x111] sm:$0xff] }
 0x147   : > { %1148 = vrot.lane.b32.xlu0 %v6231_v34, %s5551_s15  ;;  %1150 = vrot.lane.b32.xlu1 %v6233_v35, %s5551_s15  ;;  %410 = vst.msk [vmem:[#allocation2 + $0x171] sm:$0xff] %vm292_vm0, %v377_v63 }
 0x149   : > { %v1906_v55 = vpop.permute.xlu0 %1905  ;;  %v558_v5 = vpop.permute.xlu1 %557  ;;  %3725 = vmatmul.mubr.f32.gmra.mxu1 %v6239_v41  ;;  %v6379_v41 = vld [vmem:[#allocation2 + $0x158] sm:$0xff] }
 0x14a   : > { %1996 = vst.msk [vmem:[#allocation4 + $0x30] sm:$0xff] %vm1989_vm10, %v1906_v55  ;;  %v1462_v55 = vld [vmem:[#allocation2 + $0x110] sm:$0xff] }
 0x14b   : > { %646 = vst.msk [vmem:[#allocation4 + $0x40] sm:$0xff] %vm637_vm3, %v558_v5  ;;  %1341 = vrot.lane.b32.xlu0 %v6246_v43, %s5552_s16  ;;  %1343 = vrot.lane.b32.xlu1 %v6256_v50, %s5552_s16  ;;  %v6308_v13 = vld [vmem:[#allocation2 + $0x140] sm:$0xff] }
 0x14c   : > { %472 = vst.msk [vmem:[#allocation4 + $0xd8] sm:$0xff] %vm292_vm0, %v6308_v13  ;;  %474 = vst.msk [vmem:[#allocation4 + $0xe8] sm:$0xff] %vm292_vm0, %v6379_v41 }
 0x14d   : > { %v1908_v9 = vpop.permute.xlu0 %1907  ;;  %v560_v10 = vpop.permute.xlu1 %559 }
 0x14e   : > { %1997 = vst.msk [vmem:[#allocation4 + $0x38] sm:$0xff] %vm1989_vm10, %v1908_v9  ;;  %v6447_v9 = vld [vmem:[#allocation2 + $0x170] sm:$0xff] }
 0x14f   : > { %647 = vst.msk [vmem:[#allocation4 + $0x48] sm:$0xff] %vm637_vm3, %v560_v10  ;;  %1535 = vrot.lane.b32.xlu0 %v6019_v1, %s5553_s21  ;;  %1537 = vrot.lane.b32.xlu1 %v1458_v8, %s5553_s21  ;;  %v6451_v10 = vld [vmem:[#allocation2 + $0x109] sm:$0xff] }
 0x150   : > { %476 = vst.msk [vmem:[#allocation4 + $0xf8] sm:$0xff] %vm292_vm0, %v6447_v9 }
 0x151   : > { %v751_v16 = vpop.permute.xlu0 %750  ;;  %v753_v17 = vpop.permute.xlu1 %752  ;;  %v2028_v18 = vld [vmem:[#allocation4 + $0x30] sm:$0xff] }
 0x152   : > { %839 = vst.msk [vmem:[#allocation4 + $0x40] sm:$0xff] %vm830_vm4, %v751_v16  ;;  %840 = vst.msk [vmem:[#allocation4 + $0x48] sm:$0xff] %vm830_vm4, %v753_v17  ;;  %5231 = vmatprep.mubr.msk.f32.mxu0 %vm2059_vm11, %v2028_v18  ;;  %v6464_v17 = vld [vmem:[#allocation2 + $0x10a] sm:$0xff] }
 0x153   : > { %1728 = vrot.lane.b32.xlu0 %v6312_v14, %s5554_s18  ;;  %1730 = vrot.lane.b32.xlu1 %v6314_v15, %s5554_s18 }
 0x155   : > { %v944_v20 = vpop.permute.xlu0 %943  ;;  %v946_v21 = vpop.permute.xlu1 %945  ;;  %v2029_v22 = vld [vmem:[#allocation4 + $0x38] sm:$0xff] }
 0x156   : > { %1032 = vst.msk [vmem:[#allocation4 + $0x40] sm:$0xff] %vm1023_vm5, %v944_v20  ;;  %1033 = vst.msk [vmem:[#allocation4 + $0x48] sm:$0xff] %vm1023_vm5, %v946_v21  ;;  %5232 = vmatmul.mubr.msk.f32.gmra.mxu0 %vm2059_vm11, %v2029_v22  ;;  %v6473_v21 = vld [vmem:[#allocation2 + $0x112] sm:$0xff] }
 0x157   : > { %1921 = vrot.lane.b32.xlu0 %v6327_v19, %s5555_s22  ;;  %573 = vrot.lane.b32.xlu1 %v6231_v34, %s5548_s9  ;;  %v1459_v34 = vld [vmem:[#allocation2 + $0xf0] sm:$0xff] }
 0x159   : > { %v1137_v24 = vpop.permute.xlu0 %1136  ;;  %v1139_v25 = vpop.permute.xlu1 %1138 }
 0x15a   : > { %1225 = vst.msk [vmem:[#allocation4 + $0x40] sm:$0xff] %vm1216_vm6, %v1137_v24  ;;  %1226 = vst.msk [vmem:[#allocation4 + $0x48] sm:$0xff] %vm1216_vm6, %v1139_v25 }
 0x15b   : > { %1923 = vrot.lane.b32.xlu0 %v6337_v23, %s5555_s22  ;;  %575 = vrot.lane.b32.xlu1 %v6233_v35, %s5548_s9  ;;  %v1460_v35 = vld [vmem:[#allocation2 + $0xf8] sm:$0xff] }
 0x15d   : > { %v1330_v26 = vpop.permute.xlu0 %1329  ;;  %v1332_v46 = vpop.permute.xlu1 %1331 }
 0x15e   : > { %1418 = vst.msk [vmem:[#allocation4 + $0x40] sm:$0xff] %vm1409_vm7, %v1330_v26  ;;  %1419 = vst.msk [vmem:[#allocation4 + $0x48] sm:$0xff] %vm1409_vm7, %v1332_v46 }
 0x15f   : > { %766 = vrot.lane.b32.xlu0 %v6246_v43, %s5549_s13  ;;  %768 = vrot.lane.b32.xlu1 %v6256_v50, %s5549_s13  ;;  %v6385_v43 = vld [vmem:[#allocation2 + $0xf9] sm:$0xff] }
 0x161   : > { %v1524_v47 = vpop.permute.xlu0 %1523  ;;  %v1526_v27 = vpop.permute.xlu1 %1525 }
 0x162   : > { %1612 = vst.msk [vmem:[#allocation4 + $0x40] sm:$0xff] %vm1603_vm8, %v1524_v47  ;;  %1613 = vst.msk [vmem:[#allocation4 + $0x48] sm:$0xff] %vm1603_vm8, %v1526_v27 }
 0x163   : > { %959 = vrot.lane.b32.xlu0 %v6019_v1, %s5550_s14  ;;  %961 = vrot.lane.b32.xlu1 %v1458_v8, %s5550_s14  ;;  %v6443_v8 = vld [vmem:[#allocation2 + $0x168] sm:$0xff] }
 0x164   : > { %475 = vst.msk [vmem:[#allocation4 + $0xf0] sm:$0xff] %vm292_vm0, %v6443_v8 }
 0x165   : > { %v1717_v28 = vpop.permute.xlu0 %1716  ;;  %v1719_v29 = vpop.permute.xlu1 %1718 }
 0x166   : > { %1805 = vst.msk [vmem:[#allocation4 + $0x40] sm:$0xff] %vm1796_vm9, %v1717_v28  ;;  %1806 = vst.msk [vmem:[#allocation4 + $0x48] sm:$0xff] %vm1796_vm9, %v1719_v29  ;;  %v378_v28 = vld [vmem:[%s5834_s8 + $0xf0] sm:$0xff]  ;;  %v379_v29 = vld [vmem:[%s5834_s8 + $0xf8] sm:$0xff] }
 0x167   : > { %1152 = vrot.lane.b32.xlu0 %v6312_v14, %s5551_s15  ;;  %1154 = vrot.lane.b32.xlu1 %v6314_v15, %s5551_s15  ;;  %411 = vst.msk [vmem:[#allocation2 + $0x181] sm:$0xff] %vm292_vm0, %v378_v28  ;;  %412 = vst.msk [vmem:[#allocation2 + $0x189] sm:$0xff] %vm292_vm0, %v379_v29  ;;  %v6607_v28 = vld [vmem:[#allocation2 + $0x142] sm:$0xff] }
 0x169   : > { %v1910_v1 = vpop.permute.xlu0 %1909  ;;  %v562_v32 = vpop.permute.xlu1 %561 }
 0x16a   : > { %1998 = vst.msk [vmem:[#allocation4 + $0x40] sm:$0xff] %vm1989_vm10, %v1910_v1  ;;  %v435_v1 = vld [vmem:[#allocation2 + $0x108] sm:$0xff] }
 0x16b   : > { %648 = vst.msk [vmem:[#allocation4 + $0x50] sm:$0xff] %vm637_vm3, %v562_v32  ;;  %1345 = vrot.lane.b32.xlu0 %v6327_v19, %s5552_s16  ;;  %1347 = vrot.lane.b32.xlu1 %v6337_v23, %s5552_s16  ;;  %v1464_v32 = vld [vmem:[#allocation2 + $0x128] sm:$0xff] }
 0x16c   : > { %467 = vst.msk [vmem:[#allocation4 + $0xb0] sm:$0xff] %vm292_vm0, %v435_v1 }
 0x16d   : > { %v1912_v36 = vpop.permute.xlu0 %1911  ;;  %v564_v37 = vpop.permute.xlu1 %563 }
 0x16e   : > { %1999 = vst.msk [vmem:[#allocation4 + $0x48] sm:$0xff] %vm1989_vm10, %v1912_v36  ;;  %v436_v36 = vld [vmem:[#allocation2 + $0x110] sm:$0xff] }
 0x16f   : > { %649 = vst.msk [vmem:[#allocation4 + $0x58] sm:$0xff] %vm637_vm3, %v564_v37  ;;  %1539 = vrot.lane.b32.xlu0 %v1459_v34, %s5553_s21  ;;  %1541 = vrot.lane.b32.xlu1 %v1460_v35, %s5553_s21  ;;  %v6514_v37 = vld [vmem:[#allocation2 + $0x121] sm:$0xff] }
 0x170   : > { %468 = vst.msk [vmem:[#allocation4 + $0xb8] sm:$0xff] %vm292_vm0, %v436_v36 }
 0x171   : > { %v755_v44 = vpop.permute.xlu0 %754  ;;  %v757_v45 = vpop.permute.xlu1 %756  ;;  %v2030_v48 = vld [vmem:[#allocation4 + $0x40] sm:$0xff] }
 0x172   : > { %841 = vst.msk [vmem:[#allocation4 + $0x50] sm:$0xff] %vm830_vm4, %v755_v44  ;;  %842 = vst.msk [vmem:[#allocation4 + $0x58] sm:$0xff] %vm830_vm4, %v757_v45  ;;  %5234 = vmatprep.mubr.msk.f32.mxu0 %vm2059_vm11, %v2030_v48  ;;  %v6528_v45 = vld [vmem:[%s7921_s2] ss:$0 sm:$0xff]  ;;  %v6530_v48 = vld [vmem:[#allocation2 + $0x122] sm:$0xff] }
 0x173   : > { %1732 = vrot.lane.b32.xlu0 %v6383_v0, %s5554_s18  ;;  %1734 = vrot.lane.b32.xlu1 %v6385_v43, %s5554_s18 }
 0x175   : > { %v948_v50 = vpop.permute.xlu0 %947  ;;  %v950_v51 = vpop.permute.xlu1 %949  ;;  %v2031_v52 = vld [vmem:[#allocation4 + $0x48] sm:$0xff] }
 0x176   : > { %1034 = vst.msk [vmem:[#allocation4 + $0x50] sm:$0xff] %vm1023_vm5, %v948_v50  ;;  %1035 = vst.msk [vmem:[#allocation4 + $0x58] sm:$0xff] %vm1023_vm5, %v950_v51  ;;  %5235 = vmatmul.mubr.msk.f32.gmra.mxu0 %vm2059_vm11, %v2031_v52 }
 0x177   : > { %1925 = vrot.lane.b32.xlu0 %v6396_v49, %s5555_s22  ;;  %577 = vrot.lane.b32.xlu1 %v6312_v14, %s5548_s9 }
 0x179   : > { %v1141_v42 = vpop.permute.xlu0 %1140  ;;  %v1143_v53 = vpop.permute.xlu1 %1142 }
 0x17a   : > { %1227 = vst.msk [vmem:[#allocation4 + $0x50] sm:$0xff] %vm1216_vm6, %v1141_v42  ;;  %1228 = vst.msk [vmem:[#allocation4 + $0x58] sm:$0xff] %vm1216_vm6, %v1143_v53 }
 0x17b   : > { %1927 = vrot.lane.b32.xlu0 %v6405_v39, %s5555_s22  ;;  %579 = vrot.lane.b32.xlu1 %v6314_v15, %s5548_s9 }
 0x17d   : > { %v1334_v56 = vpop.permute.xlu0 %1333  ;;  %v1336_v57 = vpop.permute.xlu1 %1335 }
 0x17e   : > { %1420 = vst.msk [vmem:[#allocation4 + $0x50] sm:$0xff] %vm1409_vm7, %v1334_v56  ;;  %1421 = vst.msk [vmem:[#allocation4 + $0x58] sm:$0xff] %vm1409_vm7, %v1336_v57  ;;  %v6545_v56 = vld [vmem:[#allocation2 + $0x12a] sm:$0xff] }
 0x17f   : > { %770 = vrot.lane.b32.xlu0 %v6327_v19, %s5549_s13  ;;  %772 = vrot.lane.b32.xlu1 %v6337_v23, %s5549_s13 }
 0x181   : > { %v1528_v58 = vpop.permute.xlu0 %1527  ;;  %v1530_v59 = vpop.permute.xlu1 %1529 }
 0x182   : > { %1614 = vst.msk [vmem:[#allocation4 + $0x50] sm:$0xff] %vm1603_vm8, %v1528_v58  ;;  %1615 = vst.msk [vmem:[#allocation4 + $0x58] sm:$0xff] %vm1603_vm8, %v1530_v59 }
 0x183   : > { %963 = vrot.lane.b32.xlu0 %v1459_v34, %s5550_s14  ;;  %965 = vrot.lane.b32.xlu1 %v1460_v35, %s5550_s14 }
 0x185   : > { %v1721_v60 = vpop.permute.xlu0 %1720  ;;  %v1723_v61 = vpop.permute.xlu1 %1722 }
 0x186   : > { %1807 = vst.msk [vmem:[#allocation4 + $0x50] sm:$0xff] %vm1796_vm9, %v1721_v60  ;;  %1808 = vst.msk [vmem:[#allocation4 + $0x58] sm:$0xff] %vm1796_vm9, %v1723_v61 }
 0x187   : > { %1156 = vrot.lane.b32.xlu0 %v6383_v0, %s5551_s15  ;;  %1158 = vrot.lane.b32.xlu1 %v6385_v43, %s5551_s15 }
 0x189   : > { %v1914_v2 = vpop.permute.xlu0 %1913  ;;  %v566_v3 = vpop.permute.xlu1 %565 }
 0x18a   : > { %2000 = vst.msk [vmem:[#allocation4 + $0x50] sm:$0xff] %vm1989_vm10, %v1914_v2 }
 0x18b   : > { %650 = vst.msk [vmem:[#allocation4 + $0x60] sm:$0xff] %vm637_vm3, %v566_v3  ;;  %1349 = vrot.lane.b32.xlu0 %v6396_v49, %s5552_s16  ;;  %1351 = vrot.lane.b32.xlu1 %v6405_v39, %s5552_s16 }
 0x18d   : > { %v1916_v5 = vpop.permute.xlu0 %1915  ;;  %v568_v6 = vpop.permute.xlu1 %567 }
 0x18e   : > { %2001 = vst.msk [vmem:[#allocation4 + $0x58] sm:$0xff] %vm1989_vm10, %v1916_v5 }
 0x18f   : > { %651 = vst.msk [vmem:[#allocation4 + $0x68] sm:$0xff] %vm637_vm3, %v568_v6  ;;  %1543 = vrot.lane.b32.xlu0 %v1461_v54, %s5553_s21  ;;  %1545 = vrot.lane.b32.xlu1 %v1462_v55, %s5553_s21 }
 0x191   : > { %v759_v14 = vpop.permute.xlu0 %758  ;;  %v761_v15 = vpop.permute.xlu1 %760  ;;  %v2032_v16 = vld [vmem:[#allocation4 + $0x50] sm:$0xff] }
 0x192   : > { %843 = vst.msk [vmem:[#allocation4 + $0x60] sm:$0xff] %vm830_vm4, %v759_v14  ;;  %844 = vst.msk [vmem:[#allocation4 + $0x68] sm:$0xff] %vm830_vm4, %v761_v15  ;;  %5237 = vmatprep.mubr.msk.f32.mxu0 %vm2059_vm11, %v2032_v16 }
 0x193   : > { %1736 = vrot.lane.b32.xlu0 %v6451_v10, %s5554_s18  ;;  %1738 = vrot.lane.b32.xlu1 %v6453_v11, %s5554_s18 }
 0x195   : > { %v952_v18 = vpop.permute.xlu0 %951  ;;  %v954_v19 = vpop.permute.xlu1 %953  ;;  %v2033_v20 = vld [vmem:[#allocation4 + $0x58] sm:$0xff] }
 0x196   : > { %1036 = vst.msk [vmem:[#allocation4 + $0x60] sm:$0xff] %vm1023_vm5, %v952_v18  ;;  %1037 = vst.msk [vmem:[#allocation4 + $0x68] sm:$0xff] %vm1023_vm5, %v954_v19  ;;  %5238 = vmatmul.mubr.msk.f32.gmra.mxu0 %vm2059_vm11, %v2033_v20  ;;  %v6586_v18 = vld [vmem:[#allocation2 + $0x139] sm:$0xff]  ;;  %v6588_v19 = vld [vmem:[#allocation2 + $0x141] sm:$0xff] }
 0x197   : > { %1929 = vrot.lane.b32.xlu0 %v6464_v17, %s5555_s22  ;;  %581 = vrot.lane.b32.xlu1 %v6383_v0, %s5548_s9 }
 0x199   : > { %v1145_v22 = vpop.permute.xlu0 %1144  ;;  %v1147_v23 = vpop.permute.xlu1 %1146 }
 0x19a   : > { %1229 = vst.msk [vmem:[#allocation4 + $0x60] sm:$0xff] %vm1216_vm6, %v1145_v22  ;;  %1230 = vst.msk [vmem:[#allocation4 + $0x68] sm:$0xff] %vm1216_vm6, %v1147_v23  ;;  %v6597_v23 = vld [vmem:[#allocation2 + $0x13a] sm:$0xff] }
 0x19b   : > { %1931 = vrot.lane.b32.xlu0 %v6473_v21, %s5555_s22  ;;  %583 = vrot.lane.b32.xlu1 %v6385_v43, %s5548_s9 }
 0x19d   : > { %v1338_v24 = vpop.permute.xlu0 %1337  ;;  %v1340_v25 = vpop.permute.xlu1 %1339 }
 0x19e   : > { %1422 = vst.msk [vmem:[#allocation4 + $0x60] sm:$0xff] %vm1409_vm7, %v1338_v24  ;;  %1423 = vst.msk [vmem:[#allocation4 + $0x68] sm:$0xff] %vm1409_vm7, %v1340_v25 }
 0x19f   : > { %774 = vrot.lane.b32.xlu0 %v6396_v49, %s5549_s13  ;;  %776 = vrot.lane.b32.xlu1 %v6405_v39, %s5549_s13  ;;  %v6537_v39 = vld [vmem:[%s7922_s3] ss:$0 sm:$0xff] }
 0x1a1   : > { %v1532_v26 = vpop.permute.xlu0 %1531  ;;  %v1534_v46 = vpop.permute.xlu1 %1533 }
 0x1a2   : > { %1616 = vst.msk [vmem:[#allocation4 + $0x60] sm:$0xff] %vm1603_vm8, %v1532_v26  ;;  %1617 = vst.msk [vmem:[#allocation4 + $0x68] sm:$0xff] %vm1603_vm8, %v1534_v46 }
 0x1a3   : > { %967 = vrot.lane.b32.xlu0 %v1461_v54, %s5550_s14  ;;  %969 = vrot.lane.b32.xlu1 %v1462_v55, %s5550_s14 }
 0x1a5   : > { %v1725_v47 = vpop.permute.xlu0 %1724  ;;  %v1727_v27 = vpop.permute.xlu1 %1726 }
 0x1a6   : > { %1809 = vst.msk [vmem:[#allocation4 + $0x60] sm:$0xff] %vm1796_vm9, %v1725_v47  ;;  %1810 = vst.msk [vmem:[#allocation4 + $0x68] sm:$0xff] %vm1796_vm9, %v1727_v27 }
 0x1a7   : > { %1160 = vrot.lane.b32.xlu0 %v6451_v10, %s5551_s15  ;;  %1162 = vrot.lane.b32.xlu1 %v6453_v11, %s5551_s15 }
 0x1a9   : > { %v1918_v30 = vpop.permute.xlu0 %1917  ;;  %v570_v31 = vpop.permute.xlu1 %569 }
 0x1aa   : > { %2002 = vst.msk [vmem:[#allocation4 + $0x60] sm:$0xff] %vm1989_vm10, %v1918_v30 }
 0x1ab   : > { %652 = vst.msk [vmem:[#allocation4 + $0x70] sm:$0xff] %vm637_vm3, %v570_v31  ;;  %1353 = vrot.lane.b32.xlu0 %v6464_v17, %s5552_s16  ;;  %1355 = vrot.lane.b32.xlu1 %v6473_v21, %s5552_s16 }
 0x1ad   : > { %v1920_v34 = vpop.permute.xlu0 %1919  ;;  %v572_v35 = vpop.permute.xlu1 %571 }
 0x1ae   : > { %2003 = vst.msk [vmem:[#allocation4 + $0x68] sm:$0xff] %vm1989_vm10, %v1920_v34 }
 0x1af   : > { %653 = vst.msk [vmem:[#allocation4 + $0x78] sm:$0xff] %vm637_vm3, %v572_v35  ;;  %1547 = vrot.lane.b32.xlu0 %v6223_v33, %s5553_s21  ;;  %1549 = vrot.lane.b32.xlu1 %v1464_v32, %s5553_s21 }
 0x1b1   : > { %v763_v0 = vpop.permute.xlu0 %762  ;;  %v765_v43 = vpop.permute.xlu1 %764  ;;  %v2034_v44 = vld [vmem:[#allocation4 + $0x60] sm:$0xff] }
 0x1b2   : > { %845 = vst.msk [vmem:[#allocation4 + $0x70] sm:$0xff] %vm830_vm4, %v763_v0  ;;  %846 = vst.msk [vmem:[#allocation4 + $0x78] sm:$0xff] %vm830_vm4, %v765_v43  ;;  %5240 = vmatprep.mubr.msk.f32.mxu0 %vm2059_vm11, %v2034_v44 }
 0x1b3   : > { %1740 = vrot.lane.b32.xlu0 %v6514_v37, %s5554_s18  ;;  %1742 = vrot.lane.b32.xlu1 %v6516_v38, %s5554_s18 }
 0x1b5   : > { %v956_v49 = vpop.permute.xlu0 %955  ;;  %v958_v50 = vpop.permute.xlu1 %957  ;;  %v2035_v51 = vld [vmem:[#allocation4 + $0x68] sm:$0xff] }
 0x1b6   : > { %1038 = vst.msk [vmem:[#allocation4 + $0x70] sm:$0xff] %vm1023_vm5, %v956_v49  ;;  %1039 = vst.msk [vmem:[#allocation4 + $0x78] sm:$0xff] %vm1023_vm5, %v958_v50  ;;  %v5224_v52 = vpop.f32.mrf.mxu0  ;;  %5241 = vmatmul.mubr.msk.f32.gmra.mxu0 %vm2059_vm11, %v2035_v51 }
 0x1b7   : > { %v2393_v42 = vmul.f32 %v5224_v52, %v6528_v45  ;;  %1933 = vrot.lane.b32.xlu0 %v6530_v48, %s5555_s22  ;;  %585 = vrot.lane.b32.xlu1 %v6451_v10, %s5548_s9 }
 0x1b8   : > { %v2226_v53 = vpop.f32.mrf.mxu0 }
 0x1b9   : > { %v2432_v57 = vadd.f32 %v6537_v39, %v2393_v42  ;;  %v2392_v58 = vmul.f32 %v6528_v45, %v2226_v53  ;;  %v1149_v59 = vpop.permute.xlu0 %1148  ;;  %v1151_v60 = vpop.permute.xlu1 %1150  ;;  %v6648_v53 = vld [vmem:[#allocation2 + $0x151] sm:$0xff] }
 0x1ba   : > { %1231 = vst.msk [vmem:[#allocation4 + $0x70] sm:$0xff] %vm1216_vm6, %v1149_v59  ;;  %1232 = vst.msk [vmem:[#allocation4 + $0x78] sm:$0xff] %vm1216_vm6, %v1151_v60  ;;  %v6659_v60 = vld [vmem:[#allocation2 + $0x152] sm:$0xff] }
 0x1bb   : > { %vm2464_vm12 = vcmp.ge.f32.partialorder %v2432_v57, 0.0  ;;  %v2496_v61 = vmul.f32 0.01, %v2432_v57  ;;  %v2431_v62 = vadd.f32 %v6537_v39, %v2392_v58  ;;  %1935 = vrot.lane.b32.xlu0 %v6545_v56, %s5555_s22  ;;  %587 = vrot.lane.b32.xlu1 %v6453_v11, %s5548_s9 }
 0x1bd   : > { %v2528_v63 = vsel %vm2464_vm12, %v2432_v57, %v2496_v61  ;;  %vm2463_vm13 = vcmp.ge.f32.partialorder %v2431_v62, 0.0  ;;  %v2495_v2 = vmul.f32 0.01, %v2431_v62  ;;  %v1342_v3 = vpop.permute.xlu0 %1341  ;;  %v1344_v4 = vpop.permute.xlu1 %1343 }
 0x1be   : > { %2615 = vst [vmem:[#allocation3 + $0x21] sm:$0xff] %v2528_v63  ;;  %1424 = vst.msk [vmem:[#allocation4 + $0x70] sm:$0xff] %vm1409_vm7, %v1342_v3 }
 0x1bf   : > { %1425 = vst.msk [vmem:[#allocation4 + $0x78] sm:$0xff] %vm1409_vm7, %v1344_v4  ;;  %v2527_v54 = vsel %vm2463_vm13, %v2431_v62, %v2495_v2  ;;  %778 = vrot.lane.b32.xlu0 %v6464_v17, %s5549_s13  ;;  %780 = vrot.lane.b32.xlu1 %v6473_v21, %s5549_s13  ;;  %v438_v17 = vld [vmem:[#allocation2 + $0x128] sm:$0xff] }
 0x1c0   : > { %2614 = vst [vmem:[#allocation3 + $0x19] sm:$0xff] %v2527_v54  ;;  %3729 = vmatprep.mubr.f32.mxu1 %v2527_v54  ;;  %470 = vst.msk [vmem:[#allocation4 + $0xc8] sm:$0xff] %vm292_vm0, %v438_v17  ;;  %v6669_v54 = vld [vmem:[#allocation2 + $0x15a] sm:$0xff] }
 0x1c1   : > { %v1536_v55 = vpop.permute.xlu0 %1535  ;;  %v1538_v5 = vpop.permute.xlu1 %1537 }
 0x1c2   : > { %1618 = vst.msk [vmem:[#allocation4 + $0x70] sm:$0xff] %vm1603_vm8, %v1536_v55  ;;  %1619 = vst.msk [vmem:[#allocation4 + $0x78] sm:$0xff] %vm1603_vm8, %v1538_v5 }
 0x1c3   : > { %971 = vrot.lane.b32.xlu0 %v6223_v33, %s5550_s14  ;;  %973 = vrot.lane.b32.xlu1 %v1464_v32, %s5550_s14 }
 0x1c5   : > { %v1729_v6 = vpop.permute.xlu0 %1728  ;;  %v1731_v7 = vpop.permute.xlu1 %1730 }
 0x1c6   : > { %1811 = vst.msk [vmem:[#allocation4 + $0x70] sm:$0xff] %vm1796_vm9, %v1729_v6  ;;  %1812 = vst.msk [vmem:[#allocation4 + $0x78] sm:$0xff] %vm1796_vm9, %v1731_v7 }
 0x1c7   : > { %1164 = vrot.lane.b32.xlu0 %v6514_v37, %s5551_s15  ;;  %1166 = vrot.lane.b32.xlu1 %v6516_v38, %s5551_s15  ;;  %v2648_v10 = vld [vmem:[#allocation3 + $0x18] sm:$0xff]  ;;  %v2649_v33 = vld [vmem:[#allocation3 + $0x20] sm:$0xff] }
 0x1c8   : > { %3730 = vmatmul.mubr.f32.gmra.mxu1 %v2648_v10 }
 0x1c9   : > { %v1922_v11 = vpop.permute.xlu0 %1921  ;;  %v574_v14 = vpop.permute.xlu1 %573  ;;  %3734 = vmatprep.mubr.f32.mxu1 %v2528_v63 }
 0x1ca   : > { %2004 = vst.msk [vmem:[#allocation4 + $0x70] sm:$0xff] %vm1989_vm10, %v1922_v11 }
 0x1cb   : > { %654 = vst.msk [vmem:[#allocation4 + $0x80] sm:$0xff] %vm637_vm3, %v574_v14  ;;  %1357 = vrot.lane.b32.xlu0 %v6530_v48, %s5552_s16  ;;  %1359 = vrot.lane.b32.xlu1 %v6545_v56, %s5552_s16 }
 0x1cc   : > { %3735 = vmatmul.mubr.f32.gmra.mxu1 %v2649_v33 }
 0x1cd   : > { %v1924_v15 = vpop.permute.xlu0 %1923  ;;  %v576_v16 = vpop.permute.xlu1 %575 }
 0x1ce   : > { %2005 = vst.msk [vmem:[#allocation4 + $0x78] sm:$0xff] %vm1989_vm10, %v1924_v15 }
 0x1cf   : > { %655 = vst.msk [vmem:[#allocation4 + $0x88] sm:$0xff] %vm637_vm3, %v576_v16  ;;  %1551 = vrot.lane.b32.xlu0 %v6303_v12, %s5553_s21  ;;  %1553 = vrot.lane.b32.xlu1 %v6308_v13, %s5553_s21 }
 0x1d1   : > { %v767_v20 = vpop.permute.xlu0 %766  ;;  %v769_v21 = vpop.permute.xlu1 %768  ;;  %v2036_v22 = vld [vmem:[#allocation4 + $0x70] sm:$0xff] }
 0x1d2   : > { %847 = vst.msk [vmem:[#allocation4 + $0x80] sm:$0xff] %vm830_vm4, %v767_v20  ;;  %848 = vst.msk [vmem:[#allocation4 + $0x88] sm:$0xff] %vm830_vm4, %v769_v21  ;;  %5243 = vmatprep.mubr.msk.f32.mxu0 %vm2059_vm11, %v2036_v22 }
 0x1d3   : > { %1744 = vrot.lane.b32.xlu0 %v6586_v18, %s5554_s18  ;;  %1746 = vrot.lane.b32.xlu1 %v6588_v19, %s5554_s18 }
 0x1d5   : > { %v960_v24 = vpop.permute.xlu0 %959  ;;  %v962_v25 = vpop.permute.xlu1 %961  ;;  %v2037_v26 = vld [vmem:[#allocation4 + $0x78] sm:$0xff] }
 0x1d6   : > { %1040 = vst.msk [vmem:[#allocation4 + $0x80] sm:$0xff] %vm1023_vm5, %v960_v24  ;;  %1041 = vst.msk [vmem:[#allocation4 + $0x88] sm:$0xff] %vm1023_vm5, %v962_v25  ;;  %v5227_v46 = vpop.f32.mrf.mxu0  ;;  %5244 = vmatmul.mubr.msk.f32.gmra.mxu0 %vm2059_vm11, %v2037_v26  ;;  %v6710_v26 = vld [vmem:[#allocation2 + $0x169] sm:$0xff] }
 0x1d7   : > { %v2395_v47 = vmul.f32 %v5227_v46, %v6528_v45  ;;  %1937 = vrot.lane.b32.xlu0 %v6597_v23, %s5555_s22  ;;  %589 = vrot.lane.b32.xlu1 %v6514_v37, %s5548_s9  ;;  %v6712_v46 = vld [vmem:[#allocation2 + $0x171] sm:$0xff] }
 0x1d8   : > { %v2236_v27 = vpop.f32.mrf.mxu0 }
 0x1d9   : > { %v2434_v29 = vadd.f32 %v6537_v39, %v2395_v47  ;;  %v2394_v30 = vmul.f32 %v6528_v45, %v2236_v27  ;;  %v1153_v31 = vpop.permute.xlu0 %1152  ;;  %v1155_v1 = vpop.permute.xlu1 %1154 }
 0x1da   : > { %1233 = vst.msk [vmem:[#allocation4 + $0x80] sm:$0xff] %vm1216_vm6, %v1153_v31  ;;  %1234 = vst.msk [vmem:[#allocation4 + $0x88] sm:$0xff] %vm1216_vm6, %v1155_v1  ;;  %v6723_v31 = vld [vmem:[#allocation2 + $0x16a] sm:$0xff] }
 0x1db   : > { %vm2466_vm14 = vcmp.ge.f32.partialorder %v2434_v29, 0.0  ;;  %v2498_v32 = vmul.f32 0.01, %v2434_v29  ;;  %v2433_v34 = vadd.f32 %v6537_v39, %v2394_v30  ;;  %1939 = vrot.lane.b32.xlu0 %v6607_v28, %s5555_s22  ;;  %591 = vrot.lane.b32.xlu1 %v6516_v38, %s5548_s9 }
 0x1dd   : > { %v2530_v35 = vsel %vm2466_vm14, %v2434_v29, %v2498_v32  ;;  %vm2465_vm15 = vcmp.ge.f32.partialorder %v2433_v34, 0.0  ;;  %v2497_v36 = vmul.f32 0.01, %v2433_v34  ;;  %v1346_v37 = vpop.permute.xlu0 %1345  ;;  %v1348_v0 = vpop.permute.xlu1 %1347 }
 0x1de   : > { %2617 = vst [vmem:[#allocation3 + $0x39] sm:$0xff] %v2530_v35  ;;  %1426 = vst.msk [vmem:[#allocation4 + $0x80] sm:$0xff] %vm1409_vm7, %v1346_v37 }
 0x1df   : > { %1427 = vst.msk [vmem:[#allocation4 + $0x88] sm:$0xff] %vm1409_vm7, %v1348_v0  ;;  %v2529_v43 = vsel %vm2465_vm15, %v2433_v34, %v2497_v36  ;;  %782 = vrot.lane.b32.xlu0 %v6530_v48, %s5549_s13  ;;  %784 = vrot.lane.b32.xlu1 %v6545_v56, %s5549_s13  ;;  %v6650_v56 = vld [vmem:[#allocation2 + $0x159] sm:$0xff] }
 0x1e0   : > { %2616 = vst [vmem:[#allocation3 + $0x31] sm:$0xff] %v2529_v43  ;;  %3739 = vmatprep.mubr.f32.mxu1 %v2529_v43  ;;  %v3558_v43 = vld [vmem:[#allocation6 + $0x178] sm:$0xff] }
 0x1e1   : > { %v1540_v38 = vpop.permute.xlu0 %1539  ;;  %v1542_v44 = vpop.permute.xlu1 %1541  ;;  %3881 = vmatpush1.msra.mxu0 %v3558_v43  ;;  %v3544_v43 = vld [vmem:[#allocation6 + $0x108] sm:$0xff] }
 0x1e2   : > { %1620 = vst.msk [vmem:[#allocation4 + $0x80] sm:$0xff] %vm1603_vm8, %v1540_v38  ;;  %1621 = vst.msk [vmem:[#allocation4 + $0x88] sm:$0xff] %vm1603_vm8, %v1542_v44  ;;  %v6735_v44 = vld [vmem:[#allocation2 + $0x172] sm:$0xff] }
 0x1e3   : > { %975 = vrot.lane.b32.xlu0 %v6303_v12, %s5550_s14  ;;  %977 = vrot.lane.b32.xlu1 %v6308_v13, %s5550_s14 }
 0x1e5   : > { %v1733_v49 = vpop.permute.xlu0 %1732  ;;  %v1735_v50 = vpop.permute.xlu1 %1734 }
 0x1e6   : > { %1813 = vst.msk [vmem:[#allocation4 + $0x80] sm:$0xff] %vm1796_vm9, %v1733_v49  ;;  %1814 = vst.msk [vmem:[#allocation4 + $0x88] sm:$0xff] %vm1796_vm9, %v1735_v50 }
 0x1e7   : > { %1168 = vrot.lane.b32.xlu0 %v6586_v18, %s5551_s15  ;;  %1170 = vrot.lane.b32.xlu1 %v6588_v19, %s5551_s15  ;;  %v2650_v48 = vld [vmem:[#allocation3 + $0x30] sm:$0xff]  ;;  %v2651_v12 = vld [vmem:[#allocation3 + $0x38] sm:$0xff] }
 0x1e8   : > { %3740 = vmatmul.mubr.f32.gmra.mxu1 %v2650_v48 }
 0x1e9   : > { %v1926_v51 = vpop.permute.xlu0 %1925  ;;  %v578_v52 = vpop.permute.xlu1 %577  ;;  %3744 = vmatprep.mubr.f32.mxu1 %v2530_v35 }
 0x1ea   : > { %2006 = vst.msk [vmem:[#allocation4 + $0x80] sm:$0xff] %vm1989_vm10, %v1926_v51 }
 0x1eb   : > { %656 = vst.msk [vmem:[#allocation4 + $0x90] sm:$0xff] %vm637_vm3, %v578_v52  ;;  %1361 = vrot.lane.b32.xlu0 %v6597_v23, %s5552_s16  ;;  %1363 = vrot.lane.b32.xlu1 %v6607_v28, %s5552_s16  ;;  %v6739_v52 = vld [vmem:[#allocation3] sm:$0xff] }
 0x1ec   : > { %3745 = vmatmul.mubr.f32.gmra.mxu1 %v2651_v12  ;;  %3882 = vmatprep.subr.mxu0 %v6739_v52  ;;  %v3557_v12 = vld [vmem:[#allocation6 + $0x170] sm:$0xff] }
 0x1ed   : > { %v1928_v13 = vpop.permute.xlu0 %1927  ;;  %v580_v42 = vpop.permute.xlu1 %579  ;;  %3883 = vmatpush1.msra.mxu0 %v3557_v12 }
 0x1ee   : > { %2007 = vst.msk [vmem:[#allocation4 + $0x88] sm:$0xff] %vm1989_vm10, %v1928_v13  ;;  %3884 = vmatprep.subr.mxu0 %v6739_v52 }
 0x1ef   : > { %657 = vst.msk [vmem:[#allocation4 + $0x98] sm:$0xff] %vm637_vm3, %v580_v42  ;;  %1555 = vrot.lane.b32.xlu0 %v6375_v40, %s5553_s21  ;;  %1557 = vrot.lane.b32.xlu1 %v6379_v41, %s5553_s21 }
 0x1f1   : > { %v771_v57 = vpop.permute.xlu0 %770  ;;  %v773_v58 = vpop.permute.xlu1 %772  ;;  %v2038_v59 = vld [vmem:[#allocation4 + $0x80] sm:$0xff] }
 0x1f2   : > { %849 = vst.msk [vmem:[#allocation4 + $0x90] sm:$0xff] %vm830_vm4, %v771_v57  ;;  %850 = vst.msk [vmem:[#allocation4 + $0x98] sm:$0xff] %vm830_vm4, %v773_v58  ;;  %5246 = vmatprep.mubr.msk.f32.mxu0 %vm2059_vm11, %v2038_v59 }
 0x1f3   : > { %1748 = vrot.lane.b32.xlu0 %v6648_v53, %s5554_s18  ;;  %1750 = vrot.lane.b32.xlu1 %v6650_v56, %s5554_s18 }
 0x1f5   : > { %v964_v61 = vpop.permute.xlu0 %963  ;;  %v966_v62 = vpop.permute.xlu1 %965  ;;  %v2039_v63 = vld [vmem:[#allocation4 + $0x88] sm:$0xff] }
 0x1f6   : > { %1042 = vst.msk [vmem:[#allocation4 + $0x90] sm:$0xff] %vm1023_vm5, %v964_v61  ;;  %1043 = vst.msk [vmem:[#allocation4 + $0x98] sm:$0xff] %vm1023_vm5, %v966_v62  ;;  %v5230_v2 = vpop.f32.mrf.mxu0  ;;  %5247 = vmatmul.mubr.msk.f32.gmra.mxu0 %vm2059_vm11, %v2039_v63  ;;  %v3555_v62 = vld [vmem:[#allocation6 + $0x160] sm:$0xff] }
 0x1f7   : > { %v2397_v3 = vmul.f32 %v5230_v2, %v6528_v45  ;;  %1941 = vrot.lane.b32.xlu0 %v6659_v60, %s5555_s22  ;;  %593 = vrot.lane.b32.xlu1 %v6586_v18, %s5548_s9 }
 0x1f8   : > { %v2246_v4 = vpop.f32.mrf.mxu0 }
 0x1f9   : > { %v2436_v55 = vadd.f32 %v6537_v39, %v2397_v3  ;;  %v2396_v5 = vmul.f32 %v6528_v45, %v2246_v4  ;;  %v1157_v6 = vpop.permute.xlu0 %1156  ;;  %v1159_v7 = vpop.permute.xlu1 %1158  ;;  %v3553_v4 = vld [vmem:[#allocation6 + $0x150] sm:$0xff] }
 0x1fa   : > { %1235 = vst.msk [vmem:[#allocation4 + $0x90] sm:$0xff] %vm1216_vm6, %v1157_v6  ;;  %1236 = vst.msk [vmem:[#allocation4 + $0x98] sm:$0xff] %vm1216_vm6, %v1159_v7  ;;  %v3550_v7 = vld [vmem:[#allocation6 + $0x138] sm:$0xff] }
 0x1fb   : > { %vm2468_vm0 = vcmp.ge.f32.partialorder %v2436_v55, 0.0  ;;  %v2500_v10 = vmul.f32 0.01, %v2436_v55  ;;  %v2435_v11 = vadd.f32 %v6537_v39, %v2396_v5  ;;  %1943 = vrot.lane.b32.xlu0 %v6669_v54, %s5555_s22  ;;  %595 = vrot.lane.b32.xlu1 %v6588_v19, %s5548_s9 }
 0x1fd   : > { %v2532_v14 = vsel %vm2468_vm0, %v2436_v55, %v2500_v10  ;;  %vm2467_vm1 = vcmp.ge.f32.partialorder %v2435_v11, 0.0  ;;  %v2499_v33 = vmul.f32 0.01, %v2435_v11  ;;  %v1350_v15 = vpop.permute.xlu0 %1349  ;;  %v1352_v16 = vpop.permute.xlu1 %1351  ;;  %v3552_v55 = vld [vmem:[#allocation6 + $0x148] sm:$0xff] }
 0x1fe   : > { %2619 = vst [vmem:[#allocation3 + $0x51] sm:$0xff] %v2532_v14  ;;  %1428 = vst.msk [vmem:[#allocation4 + $0x90] sm:$0xff] %vm1409_vm7, %v1350_v15 }
 0x1ff   : > { %1429 = vst.msk [vmem:[#allocation4 + $0x98] sm:$0xff] %vm1409_vm7, %v1352_v16  ;;  %v2531_v17 = vsel %vm2467_vm1, %v2435_v11, %v2499_v33  ;;  %786 = vrot.lane.b32.xlu0 %v6597_v23, %s5549_s13  ;;  %788 = vrot.lane.b32.xlu1 %v6607_v28, %s5549_s13  ;;  %v6779_v11 = vld [vmem:[#allocation2 + $0x180] sm:$0xff]  ;;  %v3549_v16 = vld [vmem:[#allocation6 + $0x130] sm:$0xff] }
 0x200   : > { %2618 = vst [vmem:[#allocation3 + $0x49] sm:$0xff] %v2531_v17  ;;  %3749 = vmatprep.mubr.f32.mxu1 %v2531_v17  ;;  %v3548_v17 = vld [vmem:[#allocation6 + $0x128] sm:$0xff] }
 0x201   : > { %v1544_v18 = vpop.permute.xlu0 %1543  ;;  %v1546_v19 = vpop.permute.xlu1 %1545 }
 0x202   : > { %1622 = vst.msk [vmem:[#allocation4 + $0x90] sm:$0xff] %vm1603_vm8, %v1544_v18  ;;  %1623 = vst.msk [vmem:[#allocation4 + $0x98] sm:$0xff] %vm1603_vm8, %v1546_v19  ;;  %v6791_v18 = vld [vmem:[#allocation2 + $0x181] sm:$0xff]  ;;  %v6793_v19 = vld [vmem:[#allocation2 + $0x189] sm:$0xff] }
 0x203   : > { %979 = vrot.lane.b32.xlu0 %v6375_v40, %s5550_s14  ;;  %981 = vrot.lane.b32.xlu1 %v6379_v41, %s5550_s14 }
 0x205   : > { %v1737_v20 = vpop.permute.xlu0 %1736  ;;  %v1739_v21 = vpop.permute.xlu1 %1738 }
 0x206   : > { %1815 = vst.msk [vmem:[#allocation4 + $0x90] sm:$0xff] %vm1796_vm9, %v1737_v20  ;;  %1816 = vst.msk [vmem:[#allocation4 + $0x98] sm:$0xff] %vm1796_vm9, %v1739_v21  ;;  %v6714_v47 = vpop.f32.mrf.mxu1 }
 0x207   : > { %1172 = vrot.lane.b32.xlu0 %v6648_v53, %s5551_s15  ;;  %1174 = vrot.lane.b32.xlu1 %v6650_v56, %s5551_s15  ;;  %v2652_v22 = vld [vmem:[#allocation3 + $0x48] sm:$0xff]  ;;  %v2653_v40 = vld [vmem:[#allocation3 + $0x50] sm:$0xff] }
 0x208   : > { %3750 = vmatmul.mubr.f32.gmra.mxu1 %v2652_v22  ;;  %v3723_v30 = vpop.f32.mrf.mxu1 }
 0x209   : > { %v1930_v23 = vpop.permute.xlu0 %1929  ;;  %v582_v24 = vpop.permute.xlu1 %581  ;;  %3754 = vmatprep.mubr.f32.mxu1 %v2532_v14  ;;  %v6781_v14 = vld [vmem:[#allocation2 + $0x188] sm:$0xff] }
 0x20a   : > { %2008 = vst.msk [vmem:[#allocation4 + $0x90] sm:$0xff] %vm1989_vm10, %v1930_v23  ;;  %v6725_v1 = vpop.f32.mrf.mxu1  ;;  %v3547_v23 = vld [vmem:[#allocation6 + $0x120] sm:$0xff] }
 0x20b   : > { %658 = vst.msk [vmem:[#allocation4 + $0xa0] sm:$0xff] %vm637_vm3, %v582_v24  ;;  %1365 = vrot.lane.b32.xlu0 %v6659_v60, %s5552_s16  ;;  %1367 = vrot.lane.b32.xlu1 %v6669_v54, %s5552_s16  ;;  %v6803_v24 = vld [vmem:[#allocation2 + $0x182] sm:$0xff] }
 0x20c   : > { %3755 = vmatmul.mubr.f32.gmra.mxu1 %v2653_v40  ;;  %v3728_v37 = vpop.f32.mrf.mxu1  ;;  %v6805_v40 = vld [vmem:[#allocation2 + $0x18a] sm:$0xff] }
 0x20d   : > { %v1932_v41 = vpop.permute.xlu0 %1931  ;;  %v584_v25 = vpop.permute.xlu1 %583 }
 0x20e   : > { %2009 = vst.msk [vmem:[#allocation4 + $0x98] sm:$0xff] %vm1989_vm10, %v1932_v41 }
 0x20f   : > { %659 = vst.msk [vmem:[#allocation4 + $0xa8] sm:$0xff] %vm637_vm3, %v584_v25  ;;  %1559 = vrot.lane.b32.xlu0 %v6443_v8, %s5553_s21  ;;  %1561 = vrot.lane.b32.xlu1 %v6447_v9, %s5553_s21 }
 0x211   : > { %v775_v27 = vpop.permute.xlu0 %774  ;;  %v777_v28 = vpop.permute.xlu1 %776  ;;  %v2040_v29 = vld [vmem:[#allocation4 + $0x90] sm:$0xff] }
 0x212   : > { %851 = vst.msk [vmem:[#allocation4 + $0xa0] sm:$0xff] %vm830_vm4, %v775_v27  ;;  %852 = vst.msk [vmem:[#allocation4 + $0xa8] sm:$0xff] %vm830_vm4, %v777_v28  ;;  %5249 = vmatprep.mubr.msk.f32.mxu0 %vm2059_vm11, %v2040_v29  ;;  %v3546_v28 = vld [vmem:[#allocation6 + $0x118] sm:$0xff] }
 0x213   : > { %1752 = vrot.lane.b32.xlu0 %v6710_v26, %s5554_s18  ;;  %1754 = vrot.lane.b32.xlu1 %v6712_v46, %s5554_s18 }
 0x215   : > { %v968_v32 = vpop.permute.xlu0 %967  ;;  %v970_v34 = vpop.permute.xlu1 %969  ;;  %v2041_v35 = vld [vmem:[#allocation4 + $0x98] sm:$0xff] }
 0x216   : > { %1044 = vst.msk [vmem:[#allocation4 + $0xa0] sm:$0xff] %vm1023_vm5, %v968_v32  ;;  %1045 = vst.msk [vmem:[#allocation4 + $0xa8] sm:$0xff] %vm1023_vm5, %v970_v34  ;;  %v5233_v36 = vpop.f32.mrf.mxu0  ;;  %5250 = vmatmul.mubr.msk.f32.gmra.mxu0 %vm2059_vm11, %v2041_v35  ;;  %v3545_v32 = vld [vmem:[#allocation6 + $0x110] sm:$0xff] }
 0x217   : > { %v2399_v0 = vmul.f32 %v5233_v36, %v6528_v45  ;;  %1945 = vrot.lane.b32.xlu0 %v6723_v31, %s5555_s22  ;;  %597 = vrot.lane.b32.xlu1 %v6648_v53, %s5548_s9  ;;  %v3556_v53 = vld [vmem:[#allocation6 + $0x168] sm:$0xff] }
 0x218   : > { %v2256_v38 = vpop.f32.mrf.mxu0  ;;  %3885 = vmatpush1.msra.mxu0 %v3556_v53 }
 0x219   : > { %v2438_v49 = vadd.f32 %v6537_v39, %v2399_v0  ;;  %v2398_v50 = vmul.f32 %v6528_v45, %v2256_v38  ;;  %v1161_v48 = vpop.permute.xlu0 %1160  ;;  %v1163_v51 = vpop.permute.xlu1 %1162  ;;  %3886 = vmatprep.subr.mxu0 %v6739_v52 }
 0x21a   : > { %1237 = vst.msk [vmem:[#allocation4 + $0xa0] sm:$0xff] %vm1216_vm6, %v1161_v48  ;;  %1238 = vst.msk [vmem:[#allocation4 + $0xa8] sm:$0xff] %vm1216_vm6, %v1163_v51  ;;  %3887 = vmatpush1.msra.mxu0 %v3555_v62 }
 0x21b   : > { %vm2470_vm2 = vcmp.ge.f32.partialorder %v2438_v49, 0.0  ;;  %v2502_v13 = vmul.f32 0.01, %v2438_v49  ;;  %v2437_v42 = vadd.f32 %v6537_v39, %v2398_v50  ;;  %1947 = vrot.lane.b32.xlu0 %v6735_v44, %s5555_s22  ;;  %599 = vrot.lane.b32.xlu1 %v6650_v56, %s5548_s9  ;;  %v3554_v56 = vld [vmem:[#allocation6 + $0x158] sm:$0xff] }
 0x21c   : > { %3888 = vmatprep.subr.mxu0 %v6739_v52 }
 0x21d   : > { %v2534_v57 = vsel %vm2470_vm2, %v2438_v49, %v2502_v13  ;;  %vm2469_vm12 = vcmp.ge.f32.partialorder %v2437_v42, 0.0  ;;  %v2501_v58 = vmul.f32 0.01, %v2437_v42  ;;  %v1354_v59 = vpop.permute.xlu0 %1353  ;;  %v1356_v61 = vpop.permute.xlu1 %1355  ;;  %3889 = vmatpush1.msra.mxu0 %v3554_v56  ;;  %v3543_v13 = vld [vmem:[#allocation6 + $0x100] sm:$0xff]  ;;  %v3570_v56 = vld [vmem:[#allocation6 + $0x1d8] sm:$0xff] }
 0x21e   : > { %2621 = vst [vmem:[#allocation3 + $0x69] sm:$0xff] %v2534_v57  ;;  %1430 = vst.msk [vmem:[#allocation4 + $0xa0] sm:$0xff] %vm1409_vm7, %v1354_v59  ;;  %3890 = vmatprep.subr.mxu0 %v6739_v52 }
 0x21f   : > { %1431 = vst.msk [vmem:[#allocation4 + $0xa8] sm:$0xff] %vm1409_vm7, %v1356_v61  ;;  %v2533_v63 = vsel %vm2469_vm12, %v2437_v42, %v2501_v58  ;;  %790 = vrot.lane.b32.xlu0 %v6659_v60, %s5549_s13  ;;  %792 = vrot.lane.b32.xlu1 %v6669_v54, %s5549_s13  ;;  %v3572_v58 = vld [vmem:[#allocation6 + $0x1e8] sm:$0xff]  ;;  %v3571_v61 = vld [vmem:[#allocation6 + $0x1e0] sm:$0xff] }
 0x220   : > { %2620 = vst [vmem:[#allocation3 + $0x61] sm:$0xff] %v2533_v63  ;;  %3759 = vmatprep.mubr.f32.mxu1 %v2533_v63  ;;  %3891 = vmatpush1.msra.mxu0 %v3553_v4  ;;  %v1474_v4 = vld [vmem:[#allocation2 + $0x1a0] sm:$0xff] }
 0x221   : > { %v1548_v2 = vpop.permute.xlu0 %1547  ;;  %v1550_v3 = vpop.permute.xlu1 %1549  ;;  %3892 = vmatprep.subr.mxu0 %v6739_v52 }
 0x222   : > { %1624 = vst.msk [vmem:[#allocation4 + $0xa0] sm:$0xff] %vm1603_vm8, %v1548_v2  ;;  %1625 = vst.msk [vmem:[#allocation4 + $0xa8] sm:$0xff] %vm1603_vm8, %v1550_v3  ;;  %3893 = vmatpush1.msra.mxu0 %v3552_v55  ;;  %v1473_v3 = vld [vmem:[#allocation2 + $0x198] sm:$0xff]  ;;  %v3569_v55 = vld [vmem:[#allocation6 + $0x1d0] sm:$0xff] }
 0x223   : > { %983 = vrot.lane.b32.xlu0 %v6443_v8, %s5550_s14  ;;  %985 = vrot.lane.b32.xlu1 %v6447_v9, %s5550_s14  ;;  %v3551_v9 = vld [vmem:[#allocation6 + $0x140] sm:$0xff] }
 0x224   : > { %3894 = vmatprep.subr.mxu0 %v6739_v52 }
 0x225   : > { %v1741_v60 = vpop.permute.xlu0 %1740  ;;  %v1743_v54 = vpop.permute.xlu1 %1742  ;;  %3895 = vmatpush1.msra.mxu0 %v3551_v9  ;;  %v1666_v9 = vld [vmem:[#allocation2 + $0x199] sm:$0xff] }
 0x226   : > { %1817 = vst.msk [vmem:[#allocation4 + $0xa0] sm:$0xff] %vm1796_vm9, %v1741_v60  ;;  %1818 = vst.msk [vmem:[#allocation4 + $0xa8] sm:$0xff] %vm1796_vm9, %v1743_v54  ;;  %3896 = vmatprep.subr.mxu0 %v6739_v52 }
 0x227   : > { %1176 = vrot.lane.b32.xlu0 %v6710_v26, %s5551_s15  ;;  %1178 = vrot.lane.b32.xlu1 %v6712_v46, %s5551_s15  ;;  %v2654_v8 = vld [vmem:[#allocation3 + $0x60] sm:$0xff]  ;;  %v2655_v10 = vld [vmem:[#allocation3 + $0x68] sm:$0xff] }
 0x228   : > { %3760 = vmatmul.mubr.f32.gmra.mxu1 %v2654_v8  ;;  %3897 = vmatpush1.msra.mxu0 %v3550_v7  ;;  %v3568_v8 = vld [vmem:[#allocation6 + $0x1c8] sm:$0xff] }
 0x229   : > { %v1934_v5 = vpop.permute.xlu0 %1933  ;;  %v586_v6 = vpop.permute.xlu1 %585  ;;  %3764 = vmatprep.mubr.f32.mxu1 %v2534_v57  ;;  %3898 = vmatprep.subr.mxu0 %v6739_v52  ;;  %v3573_v57 = vld [vmem:[#allocation6 + $0x1f0] sm:$0xff] }
 0x22a   : > { %2010 = vst.msk [vmem:[#allocation4 + $0xa0] sm:$0xff] %vm1989_vm10, %v1934_v5  ;;  %3899 = vmatpush1.msra.mxu0 %v3549_v16  ;;  %v1667_v5 = vld [vmem:[#allocation2 + $0x1a1] sm:$0xff] }
 0x22b   : > { %660 = vst.msk [vmem:[#allocation4 + $0xb0] sm:$0xff] %vm637_vm3, %v586_v6  ;;  %1369 = vrot.lane.b32.xlu0 %v6723_v31, %s5552_s16  ;;  %1371 = vrot.lane.b32.xlu1 %v6735_v44, %s5552_s16 }
 0x22c   : > { %3765 = vmatmul.mubr.f32.gmra.mxu1 %v2655_v10  ;;  %3900 = vmatprep.subr.mxu0 %v6739_v52 }
 0x22d   : > { %v1936_v33 = vpop.permute.xlu0 %1935  ;;  %v588_v15 = vpop.permute.xlu1 %587  ;;  %3901 = vmatpush1.msra.mxu0 %v3548_v17 }
 0x22e   : > { %2011 = vst.msk [vmem:[#allocation4 + $0xa8] sm:$0xff] %vm1989_vm10, %v1936_v33  ;;  %3902 = vmatprep.subr.mxu0 %v6739_v52  ;;  %v1860_v33 = vld [vmem:[#allocation2 + $0x1a2] sm:$0xff] }
 0x22f   : > { %661 = vst.msk [vmem:[#allocation4 + $0xb8] sm:$0xff] %vm637_vm3, %v588_v15  ;;  %1563 = vrot.lane.b32.xlu0 %v6779_v11, %s5553_s21  ;;  %1565 = vrot.lane.b32.xlu1 %v6781_v14, %s5553_s21 }
 0x230   : > { %3903 = vmatpush1.msra.mxu0 %v3547_v23 }
 0x231   : > { %v779_v20 = vpop.permute.xlu0 %778  ;;  %v781_v21 = vpop.permute.xlu1 %780  ;;  %v2042_v22 = vld [vmem:[#allocation4 + $0xa0] sm:$0xff]  ;;  %3904 = vmatprep.subr.mxu0 %v6739_v52 }
 0x232   : > { %853 = vst.msk [vmem:[#allocation4 + $0xb0] sm:$0xff] %vm830_vm4, %v779_v20  ;;  %854 = vst.msk [vmem:[#allocation4 + $0xb8] sm:$0xff] %vm830_vm4, %v781_v21  ;;  %5252 = vmatprep.mubr.msk.f32.mxu0 %vm2059_vm11, %v2042_v22  ;;  %3905 = vmatpush1.msra.mxu0 %v3546_v28  ;;  %v3565_v21 = vld [vmem:[#allocation6 + $0x1b0] sm:$0xff] }
 0x233   : > { %1756 = vrot.lane.b32.xlu0 %v6791_v18, %s5554_s18  ;;  %1758 = vrot.lane.b32.xlu1 %v6793_v19, %s5554_s18 }
 0x234   : > { %3906 = vmatprep.subr.mxu0 %v6739_v52 }
 0x235   : > { %v972_v41 = vpop.permute.xlu0 %971  ;;  %v974_v25 = vpop.permute.xlu1 %973  ;;  %v2043_v27 = vld [vmem:[#allocation4 + $0xa8] sm:$0xff]  ;;  %3907 = vmatpush1.msra.mxu0 %v3545_v32 }
 0x236   : > { %1046 = vst.msk [vmem:[#allocation4 + $0xb0] sm:$0xff] %vm1023_vm5, %v972_v41  ;;  %1047 = vst.msk [vmem:[#allocation4 + $0xb8] sm:$0xff] %vm1023_vm5, %v974_v25  ;;  %v5236_v29 = vpop.f32.mrf.mxu0  ;;  %5253 = vmatmul.mubr.msk.f32.gmra.mxu0 %vm2059_vm11, %v2043_v27  ;;  %3908 = vmatprep.subr.mxu0 %v6739_v52  ;;  %v3564_v25 = vld [vmem:[#allocation6 + $0x1a8] sm:$0xff] }
 0x237   : > { %v2401_v30 = vmul.f32 %v5236_v29, %v6528_v45  ;;  %1949 = vrot.lane.b32.xlu0 %v6803_v24, %s5555_s22  ;;  %1951 = vrot.lane.b32.xlu1 %v6805_v40, %s5555_s22  ;;  %v3563_v29 = vld [vmem:[#allocation6 + $0x1a0] sm:$0xff] }
 0x238   : > { %v2266_v34 = vpop.f32.mrf.mxu0  ;;  %3909 = vmatpush1.msra.mxu0 %v3544_v43  ;;  %v3560_v43 = vld [vmem:[#allocation6 + $0x188] sm:$0xff] }
 0x239   : > { %v2440_v35 = vadd.f32 %v6537_v39, %v2401_v30  ;;  %v2400_v36 = vmul.f32 %v6528_v45, %v2266_v34  ;;  %v1165_v37 = vpop.permute.xlu0 %1164  ;;  %v1167_v0 = vpop.permute.xlu1 %1166  ;;  %3910 = vmatprep.subr.mxu0 %v6739_v52 }
 0x23a   : > { %1239 = vst.msk [vmem:[#allocation4 + $0xb0] sm:$0xff] %vm1216_vm6, %v1165_v37  ;;  %1240 = vst.msk [vmem:[#allocation4 + $0xb8] sm:$0xff] %vm1216_vm6, %v1167_v0  ;;  %3911 = vmatpush1.msra.mxu0 %v3543_v13 }
 0x23b   : > { %vm2472_vm13 = vcmp.ge.f32.partialorder %v2440_v35, 0.0  ;;  %v2504_v38 = vmul.f32 0.01, %v2440_v35  ;;  %v2439_v49 = vadd.f32 %v6537_v39, %v2400_v36  ;;  %601 = vrot.lane.b32.xlu0 %v6710_v26, %s5548_s9  ;;  %603 = vrot.lane.b32.xlu1 %v6712_v46, %s5548_s9  ;;  %v3574_v46 = vld [vmem:[#allocation6 + $0x1f8] sm:$0xff]  ;;  %s5080_s9 = sshll.u32 %s284_s23, 8 }
 0x23c   : > { %3912 = vmatprep.subr.mxu0 %v6739_v52 }
 0x23d   : > { %v2536_v50 = vsel %vm2472_vm13, %v2440_v35, %v2504_v38  ;;  %vm2471_vm14 = vcmp.ge.f32.partialorder %v2439_v49, 0.0  ;;  %v2503_v48 = vmul.f32 0.01, %v2439_v49  ;;  %v1358_v51 = vpop.permute.xlu0 %1357  ;;  %v1360_v12 = vpop.permute.xlu1 %1359  ;;  %3913 = vmatpush2.msra.mxu0 %v3574_v46  ;;  %v3562_v35 = vld [vmem:[#allocation6 + $0x198] sm:$0xff]  ;;  %v3559_v38 = vld [vmem:[#allocation6 + $0x180] sm:$0xff] }
 0x23e   : > { %2623 = vst [vmem:[#allocation3 + $0x81] sm:$0xff] %v2536_v50  ;;  %1432 = vst.msk [vmem:[#allocation4 + $0xb0] sm:$0xff] %vm1409_vm7, %v1358_v51  ;;  %3914 = vmatprep.subr.mxu0 %v6739_v52 }
 0x23f   : > { %1433 = vst.msk [vmem:[#allocation4 + $0xb8] sm:$0xff] %vm1409_vm7, %v1360_v12  ;;  %v2535_v26 = vsel %vm2471_vm14, %v2439_v49, %v2503_v48  ;;  %794 = vrot.lane.b32.xlu0 %v6723_v31, %s5549_s13  ;;  %796 = vrot.lane.b32.xlu1 %v6735_v44, %s5549_s13 }
 0x240   : > { %2622 = vst [vmem:[#allocation3 + $0x79] sm:$0xff] %v2535_v26  ;;  %3769 = vmatprep.mubr.f32.mxu1 %v2535_v26  ;;  %3915 = vmatpush2.msra.mxu0 %v3573_v57 }
 0x241   : > { %v1552_v42 = vpop.permute.xlu0 %1551  ;;  %v1554_v53 = vpop.permute.xlu1 %1553  ;;  %3916 = vmatprep.subr.mxu0 %v6739_v52 }
 0x242   : > { %1626 = vst.msk [vmem:[#allocation4 + $0xb0] sm:$0xff] %vm1603_vm8, %v1552_v42  ;;  %1627 = vst.msk [vmem:[#allocation4 + $0xb8] sm:$0xff] %vm1603_vm8, %v1554_v53  ;;  %3917 = vmatpush2.msra.mxu0 %v3572_v58 }
 0x243   : > { %987 = vrot.lane.b32.xlu0 %v6779_v11, %s5550_s14  ;;  %989 = vrot.lane.b32.xlu1 %v6781_v14, %s5550_s14  ;;  %v3567_v11 = vld [vmem:[#allocation6 + $0x1c0] sm:$0xff]  ;;  %s7726_s14 = scalar_lea.vmem [#allocation9], %s5080_s9 }
 0x244   : > { %3918 = vmatprep.subr.mxu0 %v6739_v52  ;;  %v1859_v14 = vld [vmem:[#allocation2 + $0x19a] sm:$0xff] }
 0x245   : > { %v1745_v31 = vpop.permute.xlu0 %1744  ;;  %v1747_v44 = vpop.permute.xlu1 %1746  ;;  %3919 = vmatpush2.msra.mxu0 %v3571_v61 }
 0x246   : > { %1819 = vst.msk [vmem:[#allocation4 + $0xb0] sm:$0xff] %vm1796_vm9, %v1745_v31  ;;  %1820 = vst.msk [vmem:[#allocation4 + $0xb8] sm:$0xff] %vm1796_vm9, %v1747_v44  ;;  %3920 = vmatprep.subr.mxu0 %v6739_v52 }
 0x247   : > { %1180 = vrot.lane.b32.xlu0 %v6791_v18, %s5551_s15  ;;  %1182 = vrot.lane.b32.xlu1 %v6793_v19, %s5551_s15  ;;  %v6850_v59 = vld [vmem:[#allocation3 + $0x78] sm:$0xff]  ;;  %v6860_v2 = vld [vmem:[#allocation3 + $0x80] sm:$0xff]  ;;  %v3566_v18 = vld [vmem:[#allocation6 + $0x1b8] sm:$0xff]  ;;  %s5126_s15 = sshll.u32 %s5619_s28, 12  ;;  %s7878_s28 = scalar_lea.sflag [#allocation8], %s284_s23 }
 0x248   : > { %3770 = vmatmul.mubr.f32.gmra.mxu1 %v6850_v59  ;;  %3921 = vmatpush2.msra.mxu0 %v3570_v56  ;;  %s7870_s19 = scalar_lea.hbm %s7926_s7, %s5126_s15 }
 0x249   : > { %v1938_v62 = vpop.permute.xlu0 %1937  ;;  %v590_v63 = vpop.permute.xlu1 %589  ;;  %3774 = vmatprep.mubr.f32.mxu1 %v2536_v50  ;;  %3922 = vmatprep.subr.mxu0 %v6739_v52 }
 0x24a   : > { %2012 = vst.msk [vmem:[#allocation4 + $0xb0] sm:$0xff] %vm1989_vm10, %v1938_v62  ;;  %3923 = vmatpush2.msra.mxu0 %v3569_v55  ;;  %v6921_v62 = vld [vmem:[%s7921_s2] ss:$0 sm:$0xff] }
 0x24b   : > { %662 = vst.msk [vmem:[#allocation4 + $0xc0] sm:$0xff] %vm637_vm3, %v590_v63  ;;  %1373 = vrot.lane.b32.xlu0 %v6803_v24, %s5552_s16  ;;  %1375 = vrot.lane.b32.xlu1 %v6805_v40, %s5552_s16  ;;  %s5000_s16 = sshll.u32 %s7726_s14, 4  ;;  %s7873_s16 = int_to_ptr.vmem [resolvable:$true] %s5000_s16 }
 0x24c   : > { %3775 = vmatmul.mubr.f32.gmra.mxu1 %v6860_v2  ;;  %3924 = vmatprep.subr.mxu0 %v6739_v52  ;;  %s5478_s20 = scalar_lea.vmem %s7873_s16, 4096 }
 0x24d   : > { %v1940_v60 = vpop.permute.xlu0 %1939  ;;  %v592_v54 = vpop.permute.xlu1 %591  ;;  %3925 = vmatpush2.msra.mxu0 %v3568_v8  ;;  %p5479_p8 = scmp.ne.s32.totalorder %s7873_s16, %s5478_s20 }
 0x24e   : > { %2013 = vst.msk [vmem:[#allocation4 + $0xb8] sm:$0xff] %vm1989_vm10, %v1940_v60  ;;  %3926 = vmatprep.subr.mxu0 %v6739_v52 }
 0x24f   : > { %663 = vst.msk [vmem:[#allocation4 + $0xc8] sm:$0xff] %vm637_vm3, %v592_v54  ;;  %1567 = vrot.lane.b32.xlu0 %v1473_v3, %s5553_s21  ;;  %1569 = vrot.lane.b32.xlu1 %v1474_v4, %s5553_s21  ;;  %v6927_v3 = vld [vmem:[%s7922_s3] ss:$0 sm:$0xff]  ;;  %p5480_p9 = pnand %p5479_p8, %p5636_p5 }
 0x250   : > { %3927 = vmatpush2.msra.mxu0 %v3567_v11 }
 0x251   : > { %v783_v6 = vpop.permute.xlu0 %782  ;;  %v785_v7 = vpop.permute.xlu1 %784  ;;  %v2044_v10 = vld [vmem:[#allocation4 + $0xb0] sm:$0xff]  ;;  %3928 = vmatprep.subr.mxu0 %v6739_v52  ;;  %p5481_p10 = pneg %p5480_p9 }
 0x252   : > { %855 = vst.msk [vmem:[#allocation4 + $0xc0] sm:$0xff] %vm830_vm4, %v783_v6  ;;  %856 = vst.msk [vmem:[#allocation4 + $0xc8] sm:$0xff] %vm830_vm4, %v785_v7  ;;  %5255 = vmatprep.mubr.msk.f32.mxu0 %vm2059_vm11, %v2044_v10  ;;  %3929 = vmatpush2.msra.mxu0 %v3566_v18 }
 0x253   : > { %1760 = vrot.lane.b32.xlu0 %v1666_v9, %s5554_s18  ;;  %1762 = vrot.lane.b32.xlu1 %v1667_v5, %s5554_s18 }
 0x254   : > { %3930 = vmatprep.subr.mxu0 %v6739_v52 }
 0x255   : > { %v976_v15 = vpop.permute.xlu0 %975  ;;  %v978_v16 = vpop.permute.xlu1 %977  ;;  %v2045_v17 = vld [vmem:[#allocation4 + $0xb8] sm:$0xff]  ;;  %3931 = vmatpush2.msra.mxu0 %v3565_v21 }
 0x256   : > { %1048 = vst.msk [vmem:[#allocation4 + $0xc0] sm:$0xff] %vm1023_vm5, %v976_v15  ;;  %1049 = vst.msk [vmem:[#allocation4 + $0xc8] sm:$0xff] %vm1023_vm5, %v978_v16  ;;  %v5239_v19 = vpop.f32.mrf.mxu0  ;;  %5256 = vmatmul.mubr.msk.f32.gmra.mxu0 %vm2059_vm11, %v2045_v17  ;;  %3932 = vmatprep.subr.mxu0 %v6739_v52 }
 0x257   : > { %v2403_v20 = vmul.f32 %v5239_v19, %v6528_v45  ;;  %1953 = vrot.lane.b32.xlu0 %v1859_v14, %s5555_s22  ;;  %1955 = vrot.lane.b32.xlu1 %v1860_v33, %s5555_s22  ;;  %s5556_s22 = smov [#allocation9]  }
 0x258   : > { %v2276_v22 = vpop.f32.mrf.mxu0  ;;  %3933 = vmatpush2.msra.mxu0 %v3564_v25  ;;  %s5482_s8 = sshll.u32 %s5556_s22, 4  ;;  %s5483_s8 = int_to_ptr.vmem [resolvable:$false] %s5482_s8 }
 0x259   : > { %v2442_v23 = vadd.f32 %v6537_v39, %v2403_v20  ;;  %v2402_v24 = vmul.f32 %v6528_v45, %v2276_v22  ;;  %v1169_v40 = vpop.permute.xlu0 %1168  ;;  %v1171_v41 = vpop.permute.xlu1 %1170  ;;  %3934 = vmatprep.subr.mxu0 %v6739_v52  ;;  %s5484_s29 = scalar_lea.vmem %s5483_s8, 8192  ;;  %p5485_p11 = scmp.lt.s32.totalorder %s7873_s16, %s5483_s8 }
 0x25a   : > { %1241 = vst.msk [vmem:[#allocation4 + $0xc0] sm:$0xff] %vm1216_vm6, %v1169_v40  ;;  %1242 = vst.msk [vmem:[#allocation4 + $0xc8] sm:$0xff] %vm1216_vm6, %v1171_v41  ;;  %3935 = vmatpush2.msra.mxu0 %v3563_v29  ;;  %p5486_p12 = scmp.lt.s32.totalorder %s5484_s29, %s5478_s20 }
 0x25b   : > { %vm2474_vm15 = vcmp.ge.f32.partialorder %v2442_v23, 0.0  ;;  %v2506_v27 = vmul.f32 0.01, %v2442_v23  ;;  %v2441_v28 = vadd.f32 %v6537_v39, %v2402_v24  ;;  %3936 = vmatprep.subr.mxu0 %v6739_v52  ;;  %v3561_v39 = vld [vmem:[#allocation6 + $0x190] sm:$0xff] }
 0x25c   : > { %3937 = vmatpush2.msra.mxu0 %v3562_v35  ;;  %p5487_p13 = por %p5486_p12, %p5485_p11 }
 0x25d   : > { %v2538_v30 = vsel %vm2474_vm15, %v2442_v23, %v2506_v27  ;;  %vm2473_vm0 = vcmp.ge.f32.partialorder %v2441_v28, 0.0  ;;  %v2505_v45 = vmul.f32 0.01, %v2441_v28  ;;  %v1362_v32 = vpop.permute.xlu0 %1361  ;;  %v1364_v34 = vpop.permute.xlu1 %1363  ;;  %3938 = vmatprep.subr.mxu0 %v6739_v52 }
 0x25e   : > { %2625 = vst [vmem:[#allocation3 + $0x99] sm:$0xff] %v2538_v30  ;;  %1434 = vst.msk [vmem:[#allocation4 + $0xc0] sm:$0xff] %vm1409_vm7, %v1362_v32  ;;  %3939 = vmatpush2.msra.mxu0 %v3561_v39  ;;  %p5488_p0 = pnand %p5487_p13, %p5481_p10 }
 0x25f   : > { %1435 = vst.msk [vmem:[#allocation4 + $0xc8] sm:$0xff] %vm1409_vm7, %v1364_v34  ;;  %v2537_v36 = vsel %vm2473_vm0, %v2441_v28, %v2505_v45  ;;  %3940 = vmatprep.subr.mxu0 %v6739_v52 }
 0x260   : > { %2624 = vst [vmem:[#allocation3 + $0x91] sm:$0xff] %v2537_v36  ;;  %3779 = vmatprep.mubr.f32.mxu1 %v2537_v36  ;;  %3941 = vmatpush2.msra.mxu0 %v3560_v43 }
 0x261   : > { %v1556_v37 = vpop.permute.xlu0 %1555  ;;  %v1558_v0 = vpop.permute.xlu1 %1557  ;;  %3942 = vmatprep.subr.mxu0 %v6739_v52 }
 0x262   : > { %1628 = vst.msk [vmem:[#allocation4 + $0xc0] sm:$0xff] %vm1603_vm8, %v1556_v37  ;;  %1629 = vst.msk [vmem:[#allocation4 + $0xc8] sm:$0xff] %vm1603_vm8, %v1558_v0  ;;  %3943 = vmatpush2.msra.mxu0 %v3559_v38 }
 0x263   : > { %4330 = vmatprep.subr.mxu0 %v6739_v52 }
 0x265   : > { %v1749_v49 = vpop.permute.xlu0 %1748  ;;  %v1751_v50 = vpop.permute.xlu1 %1750 }
 0x266   : > { %1821 = vst.msk [vmem:[#allocation4 + $0xc0] sm:$0xff] %vm1796_vm9, %v1749_v49  ;;  %1822 = vst.msk [vmem:[#allocation4 + $0xc8] sm:$0xff] %vm1796_vm9, %v1751_v50 }
 0x267   : > { %v6901_v48 = vld [vmem:[#allocation3 + $0x90] sm:$0xff]  ;;  %v6907_v13 = vld [vmem:[#allocation3 + $0x98] sm:$0xff] }
 0x268   : > { %3780 = vmatmul.mubr.f32.gmra.mxu1 %v6901_v48 }
 0x269   : > { %v1942_v51 = vpop.permute.xlu0 %1941  ;;  %v594_v12 = vpop.permute.xlu1 %593  ;;  %3784 = vmatprep.mubr.f32.mxu1 %v2538_v30 }
 0x26a   : > { %2014 = vst.msk [vmem:[#allocation4 + $0xc0] sm:$0xff] %vm1989_vm10, %v1942_v51 }
 0x26b   : > { %664 = vst.msk [vmem:[#allocation4 + $0xd0] sm:$0xff] %vm637_vm3, %v594_v12 }
 0x26c   : > { %3785 = vmatmul.mubr.f32.gmra.mxu1 %v6907_v13 }
 0x26d   : > { %v1944_v26 = vpop.permute.xlu0 %1943  ;;  %v596_v46 = vpop.permute.xlu1 %595 }
 0x26e   : > { %2015 = vst.msk [vmem:[#allocation4 + $0xc8] sm:$0xff] %vm1989_vm10, %v1944_v26 }
 0x26f   : > { %665 = vst.msk [vmem:[#allocation4 + $0xd8] sm:$0xff] %vm637_vm3, %v596_v46  ;;  %v3590_v46 = vld [vmem:[#allocation6 + $0x278] sm:$0xff] }
 0x270   : > { %4106 = vmatpush1.msra.mxu1 %v3590_v46 }
 0x271   : > { %v787_v42 = vpop.permute.xlu0 %786  ;;  %v789_v53 = vpop.permute.xlu1 %788  ;;  %v2046_v57 = vld [vmem:[#allocation4 + $0xc0] sm:$0xff]  ;;  %4107 = vmatprep.subr.mxu1 %v6739_v52 }
 0x272   : > { %857 = vst.msk [vmem:[#allocation4 + $0xd0] sm:$0xff] %vm830_vm4, %v787_v42  ;;  %858 = vst.msk [vmem:[#allocation4 + $0xd8] sm:$0xff] %vm830_vm4, %v789_v53  ;;  %5258 = vmatprep.mubr.msk.f32.mxu0 %vm2059_vm11, %v2046_v57  ;;  %v3589_v42 = vld [vmem:[#allocation6 + $0x270] sm:$0xff] }
 0x273   : > { %4108 = vmatpush1.msra.mxu1 %v3589_v42 }
 0x274   : > { %4109 = vmatprep.subr.mxu1 %v6739_v52 }
 0x275   : > { %v980_v31 = vpop.permute.xlu0 %979  ;;  %v982_v44 = vpop.permute.xlu1 %981  ;;  %v2047_v58 = vld [vmem:[#allocation4 + $0xc8] sm:$0xff] }
 0x276   : > { %1050 = vst.msk [vmem:[#allocation4 + $0xd0] sm:$0xff] %vm1023_vm5, %v980_v31  ;;  %1051 = vst.msk [vmem:[#allocation4 + $0xd8] sm:$0xff] %vm1023_vm5, %v982_v44  ;;  %v5242_v61 = vpop.f32.mrf.mxu0  ;;  %5259 = vmatmul.mubr.msk.f32.gmra.mxu0 %vm2059_vm11, %v2047_v58  ;;  %v3588_v31 = vld [vmem:[#allocation6 + $0x268] sm:$0xff] }
 0x277   : > { %v2405_v63 = vmul.f32 %v6921_v62, %v5242_v61  ;;  %4110 = vmatpush1.msra.mxu1 %v3588_v31 }
 0x278   : > { %v2286_v56 = vpop.f32.mrf.mxu0  ;;  %4111 = vmatprep.subr.mxu1 %v6739_v52 }
 0x279   : > { %v2444_v4 = vadd.f32 %v6927_v3, %v2405_v63  ;;  %v2404_v60 = vmul.f32 %v6921_v62, %v2286_v56  ;;  %v1173_v54 = vpop.permute.xlu0 %1172  ;;  %v1175_v55 = vpop.permute.xlu1 %1174 }
 0x27a   : > { %1243 = vst.msk [vmem:[#allocation4 + $0xd0] sm:$0xff] %vm1216_vm6, %v1173_v54  ;;  %1244 = vst.msk [vmem:[#allocation4 + $0xd8] sm:$0xff] %vm1216_vm6, %v1175_v55 }
 0x27b   : > { %vm2476_vm1 = vcmp.ge.f32.partialorder %v2444_v4, 0.0  ;;  %v2508_v8 = vmul.f32 0.01, %v2444_v4  ;;  %v2443_v9 = vadd.f32 %v6927_v3, %v2404_v60  ;;  %v3587_v60 = vld [vmem:[#allocation6 + $0x260] sm:$0xff] }
 0x27c   : > { %4112 = vmatpush1.msra.mxu1 %v3587_v60 }
 0x27d   : > { %v2540_v5 = vsel %vm2476_vm1, %v2444_v4, %v2508_v8  ;;  %vm2475_vm2 = vcmp.ge.f32.partialorder %v2443_v9, 0.0  ;;  %v2507_v6 = vmul.f32 0.01, %v2443_v9  ;;  %v1366_v7 = vpop.permute.xlu0 %1365  ;;  %v1368_v10 = vpop.permute.xlu1 %1367  ;;  %4113 = vmatprep.subr.mxu1 %v6739_v52 }
 0x27e   : > { %2627 = vst [vmem:[#allocation3 + $0xb1] sm:$0xff] %v2540_v5  ;;  %1436 = vst.msk [vmem:[#allocation4 + $0xd0] sm:$0xff] %vm1409_vm7, %v1366_v7 }
 0x27f   : > { %1437 = vst.msk [vmem:[#allocation4 + $0xd8] sm:$0xff] %vm1409_vm7, %v1368_v10  ;;  %v2539_v11 = vsel %vm2475_vm2, %v2443_v9, %v2507_v6  ;;  %v3586_v9 = vld [vmem:[#allocation6 + $0x258] sm:$0xff]  ;;  %v3585_v10 = vld [vmem:[#allocation6 + $0x250] sm:$0xff] }
 0x280   : > { %2626 = vst [vmem:[#allocation3 + $0xa9] sm:$0xff] %v2539_v11  ;;  %3789 = vmatprep.mubr.f32.mxu1 %v2539_v11  ;;  %4114 = vmatpush1.msra.mxu1 %v3586_v9  ;;  %v2838_v9 = vld [vmem:[#allocation3 + $0x18] sm:$0xff] }
 0x281   : > { %v1560_v14 = vpop.permute.xlu0 %1559  ;;  %v1562_v33 = vpop.permute.xlu1 %1561  ;;  %4115 = vmatprep.subr.mxu1 %v6739_v52 }
 0x282   : > { %1630 = vst.msk [vmem:[#allocation4 + $0xd0] sm:$0xff] %vm1603_vm8, %v1560_v14  ;;  %1631 = vst.msk [vmem:[#allocation4 + $0xd8] sm:$0xff] %vm1603_vm8, %v1562_v33  ;;  %4116 = vmatpush1.msra.mxu1 %v3585_v10 }
 0x283   : > { %4117 = vmatprep.subr.mxu1 %v6739_v52 }
 0x285   : > { %v1753_v15 = vpop.permute.xlu0 %1752  ;;  %v1755_v16 = vpop.permute.xlu1 %1754 }
 0x286   : > { %1823 = vst.msk [vmem:[#allocation4 + $0xd0] sm:$0xff] %vm1796_vm9, %v1753_v15  ;;  %1824 = vst.msk [vmem:[#allocation4 + $0xd8] sm:$0xff] %vm1796_vm9, %v1755_v16 }
 0x287   : > { %v6940_v17 = vld [vmem:[#allocation3 + $0xa8] sm:$0xff]  ;;  %v6947_v22 = vld [vmem:[#allocation3 + $0xb0] sm:$0xff] }
 0x288   : > { %v6942_v18 = vpop.f32.mrf.mxu1  ;;  %3790 = vmatmul.mubr.f32.gmra.mxu1 %v6940_v17 }
 0x289   : > { %v1946_v19 = vpop.permute.xlu0 %1945  ;;  %v598_v20 = vpop.permute.xlu1 %597  ;;  %3794 = vmatprep.mubr.f32.mxu1 %v2540_v5 }
 0x28a   : > { %2016 = vst.msk [vmem:[#allocation4 + $0xd0] sm:$0xff] %vm1989_vm10, %v1946_v19  ;;  %v3733_v21 = vpop.f32.mrf.mxu1 }
 0x28b   : > { %666 = vst.msk [vmem:[#allocation4 + $0xe0] sm:$0xff] %vm637_vm3, %v598_v20 }
 0x28c   : > { %v6949_v23 = vpop.f32.mrf.mxu1  ;;  %3795 = vmatmul.mubr.f32.gmra.mxu1 %v6947_v22 }
 0x28d   : > { %v1948_v24 = vpop.permute.xlu0 %1947  ;;  %v600_v40 = vpop.permute.xlu1 %599 }
 0x28e   : > { %2017 = vst.msk [vmem:[#allocation4 + $0xd8] sm:$0xff] %vm1989_vm10, %v1948_v24  ;;  %v3738_v41 = vpop.f32.mrf.mxu1 }
 0x28f   : > { %667 = vst.msk [vmem:[#allocation4 + $0xe8] sm:$0xff] %vm637_vm3, %v600_v40 }
 0x291   : > { %v791_v25 = vpop.permute.xlu0 %790  ;;  %v793_v27 = vpop.permute.xlu1 %792  ;;  %v2048_v28 = vld [vmem:[#allocation4 + $0xd0] sm:$0xff] }
 0x292   : > { %859 = vst.msk [vmem:[#allocation4 + $0xe0] sm:$0xff] %vm830_vm4, %v791_v25  ;;  %860 = vst.msk [vmem:[#allocation4 + $0xe8] sm:$0xff] %vm830_vm4, %v793_v27  ;;  %5261 = vmatprep.mubr.msk.f32.mxu0 %vm2059_vm11, %v2048_v28 }
 0x295   : > { %v984_v29 = vpop.permute.xlu0 %983  ;;  %v986_v30 = vpop.permute.xlu1 %985  ;;  %v2049_v45 = vld [vmem:[#allocation4 + $0xd8] sm:$0xff] }
 0x296   : > { %1052 = vst.msk [vmem:[#allocation4 + $0xe0] sm:$0xff] %vm1023_vm5, %v984_v29  ;;  %1053 = vst.msk [vmem:[#allocation4 + $0xe8] sm:$0xff] %vm1023_vm5, %v986_v30  ;;  %v5245_v32 = vpop.f32.mrf.mxu0  ;;  %5262 = vmatmul.mubr.msk.f32.gmra.mxu0 %vm2059_vm11, %v2049_v45 }
 0x297   : > { %v2407_v34 = vmul.f32 %v6921_v62, %v5245_v32 }
 0x298   : > { %v2296_v35 = vpop.f32.mrf.mxu0 }
 0x299   : > { %v2446_v36 = vadd.f32 %v6927_v3, %v2407_v34  ;;  %v2406_v39 = vmul.f32 %v6921_v62, %v2296_v35  ;;  %v1177_v37 = vpop.permute.xlu0 %1176  ;;  %v1179_v0 = vpop.permute.xlu1 %1178  ;;  %v3584_v35 = vld [vmem:[#allocation6 + $0x248] sm:$0xff] }
 0x29a   : > { %1245 = vst.msk [vmem:[#allocation4 + $0xe0] sm:$0xff] %vm1216_vm6, %v1177_v37  ;;  %1246 = vst.msk [vmem:[#allocation4 + $0xe8] sm:$0xff] %vm1216_vm6, %v1179_v0  ;;  %4118 = vmatpush1.msra.mxu1 %v3584_v35  ;;  %v3582_v37 = vld [vmem:[#allocation6 + $0x238] sm:$0xff]  ;;  %v3617_v35 = vld [vmem:[#allocation6 + $0x350] sm:$0xff] }
 0x29b   : > { %vm2478_vm12 = vcmp.ge.f32.partialorder %v2446_v36, 0.0  ;;  %v2510_v43 = vmul.f32 0.01, %v2446_v36  ;;  %v2445_v38 = vadd.f32 %v6927_v3, %v2406_v39  ;;  %4119 = vmatprep.subr.mxu1 %v6739_v52  ;;  %v3583_v39 = vld [vmem:[#allocation6 + $0x240] sm:$0xff] }
 0x29c   : > { %4120 = vmatpush1.msra.mxu1 %v3583_v39  ;;  %v2842_v39 = vld [vmem:[#allocation3 + $0x48] sm:$0xff] }
 0x29d   : > { %v2542_v49 = vsel %vm2478_vm12, %v2446_v36, %v2510_v43  ;;  %vm2477_vm13 = vcmp.ge.f32.partialorder %v2445_v38, 0.0  ;;  %v2509_v50 = vmul.f32 0.01, %v2445_v38  ;;  %v1370_v51 = vpop.permute.xlu0 %1369  ;;  %v1372_v12 = vpop.permute.xlu1 %1371  ;;  %4121 = vmatprep.subr.mxu1 %v6739_v52 }
 0x29e   : > { %2629 = vst [vmem:[#allocation3 + $0xc9] sm:$0xff] %v2542_v49  ;;  %1438 = vst.msk [vmem:[#allocation4 + $0xe0] sm:$0xff] %vm1409_vm7, %v1370_v51  ;;  %4122 = vmatpush1.msra.mxu1 %v3582_v37  ;;  %v3616_v37 = vld [vmem:[#allocation6 + $0x348] sm:$0xff] }
 0x29f   : > { %1439 = vst.msk [vmem:[#allocation4 + $0xe8] sm:$0xff] %vm1409_vm7, %v1372_v12  ;;  %v2541_v26 = vsel %vm2477_vm13, %v2445_v38, %v2509_v50  ;;  %v3581_v38 = vld [vmem:[#allocation6 + $0x230] sm:$0xff]  ;;  %4123 = vmatprep.subr.mxu1 %v6739_v52 }
 0x2a0   : > { %2628 = vst [vmem:[#allocation3 + $0xc1] sm:$0xff] %v2541_v26  ;;  %3799 = vmatprep.mubr.f32.mxu1 %v2541_v26  ;;  %4124 = vmatpush1.msra.mxu1 %v3581_v38  ;;  %v3615_v38 = vld [vmem:[#allocation6 + $0x340] sm:$0xff] }
 0x2a1   : > { %v1564_v53 = vpop.permute.xlu0 %1563  ;;  %v1566_v57 = vpop.permute.xlu1 %1565  ;;  %4125 = vmatprep.subr.mxu1 %v6739_v52 }
 0x2a2   : > { %1632 = vst.msk [vmem:[#allocation4 + $0xe0] sm:$0xff] %vm1603_vm8, %v1564_v53  ;;  %1633 = vst.msk [vmem:[#allocation4 + $0xe8] sm:$0xff] %vm1603_vm8, %v1566_v57  ;;  %v3579_v57 = vld [vmem:[#allocation6 + $0x220] sm:$0xff] }
 0x2a5   : > { %v1757_v44 = vpop.permute.xlu0 %1756  ;;  %v1759_v58 = vpop.permute.xlu1 %1758 }
 0x2a6   : > { %1825 = vst.msk [vmem:[#allocation4 + $0xe0] sm:$0xff] %vm1796_vm9, %v1757_v44  ;;  %1826 = vst.msk [vmem:[#allocation4 + $0xe8] sm:$0xff] %vm1796_vm9, %v1759_v58  ;;  %v3578_v58 = vld [vmem:[#allocation6 + $0x218] sm:$0xff] }
 0x2a7   : > { %v6975_v61 = vld [vmem:[#allocation3 + $0xc0] sm:$0xff]  ;;  %v6982_v55 = vld [vmem:[#allocation3 + $0xc8] sm:$0xff] }
 0x2a8   : > { %v6977_v63 = vpop.f32.mrf.mxu1  ;;  %3800 = vmatmul.mubr.f32.gmra.mxu1 %v6975_v61 }
 0x2a9   : > { %v1950_v56 = vpop.permute.xlu0 %1949  ;;  %v1952_v4 = vpop.permute.xlu1 %1951  ;;  %3804 = vmatprep.mubr.f32.mxu1 %v2542_v49  ;;  %v3580_v49 = vld [vmem:[#allocation6 + $0x228] sm:$0xff] }
 0x2aa   : > { %2018 = vst.msk [vmem:[#allocation4 + $0xe0] sm:$0xff] %vm1989_vm10, %v1950_v56  ;;  %2019 = vst.msk [vmem:[#allocation4 + $0xe8] sm:$0xff] %vm1989_vm10, %v1952_v4  ;;  %v3743_v54 = vpop.f32.mrf.mxu1  ;;  %4126 = vmatpush1.msra.mxu1 %v3580_v49  ;;  %v3577_v4 = vld [vmem:[#allocation6 + $0x210] sm:$0xff]  ;;  %v2843_v49 = vld [vmem:[#allocation3 + $0x50] sm:$0xff] }
 0x2ab   : > { %4127 = vmatprep.subr.mxu1 %v6739_v52 }
 0x2ac   : > { %v6985_v8 = vpop.f32.mrf.mxu1  ;;  %3805 = vmatmul.mubr.f32.gmra.mxu1 %v6982_v55 }
 0x2ad   : > { %v602_v5 = vpop.permute.xlu0 %601  ;;  %v604_v6 = vpop.permute.xlu1 %603  ;;  %4128 = vmatpush1.msra.mxu1 %v3579_v57  ;;  %v3614_v57 = vld [vmem:[#allocation6 + $0x338] sm:$0xff] }
 0x2ae   : > { %668 = vst.msk [vmem:[#allocation4 + $0xf0] sm:$0xff] %vm637_vm3, %v602_v5  ;;  %669 = vst.msk [vmem:[#allocation4 + $0xf8] sm:$0xff] %vm637_vm3, %v604_v6  ;;  %v3748_v7 = vpop.f32.mrf.mxu1  ;;  %4129 = vmatprep.subr.mxu1 %v6739_v52  ;;  %v2774_v5 = vld [vmem:[#allocation3 + $0x2] sm:$0xff] }
 0x2af   : > { %4130 = vmatpush1.msra.mxu1 %v3578_v58  ;;  %v3622_v6 = vld [vmem:[#allocation6 + $0x378] sm:$0xff]  ;;  %v2844_v58 = vld [vmem:[#allocation3 + $0x60] sm:$0xff] }
 0x2b0   : > { %4131 = vmatprep.subr.mxu1 %v6739_v52 }
 0x2b1   : > { %v795_v11 = vpop.permute.xlu0 %794  ;;  %v797_v14 = vpop.permute.xlu1 %796  ;;  %v2050_v33 = vld [vmem:[#allocation4 + $0xe0] sm:$0xff]  ;;  %v2051_v15 = vld [vmem:[#allocation4 + $0xe8] sm:$0xff]  ;;  %4132 = vmatpush1.msra.mxu1 %v3577_v4 }
 0x2b2   : > { %861 = vst.msk [vmem:[#allocation4 + $0xf0] sm:$0xff] %vm830_vm4, %v795_v11  ;;  %862 = vst.msk [vmem:[#allocation4 + $0xf8] sm:$0xff] %vm830_vm4, %v797_v14  ;;  %5264 = vmatprep.mubr.msk.f32.mxu0 %vm2059_vm11, %v2050_v33  ;;  %4133 = vmatprep.subr.mxu1 %v6739_v52  ;;  %v2839_v11 = vld [vmem:[#allocation3 + $0x20] sm:$0xff]  ;;  %v3604_v4 = vld [vmem:[#allocation6 + $0x2e8] sm:$0xff] }
 0x2b3   : > { %5265 = vmatmul.mubr.msk.f32.gmra.mxu0 %vm2059_vm11, %v2051_v15  ;;  %v3621_v14 = vld [vmem:[#allocation6 + $0x370] sm:$0xff]  ;;  %v2775_v15 = vld [vmem:[#allocation3 + $0xa] sm:$0xff] }
 0x2b5   : > { %v988_v16 = vpop.permute.xlu0 %987  ;;  %v990_v19 = vpop.permute.xlu1 %989 }
 0x2b6   : > { %1054 = vst.msk [vmem:[#allocation4 + $0xf0] sm:$0xff] %vm1023_vm5, %v988_v16  ;;  %1055 = vst.msk [vmem:[#allocation4 + $0xf8] sm:$0xff] %vm1023_vm5, %v990_v19  ;;  %v5248_v20 = vpop.f32.mrf.mxu0  ;;  %v7035_v19 = vld [vmem:[#allocation3] sm:$0xff] }
 0x2b7   : > { %v2409_v21 = vmul.f32 %v6921_v62, %v5248_v20  ;;  %v3620_v20 = vld [vmem:[#allocation6 + $0x368] sm:$0xff] }
 0x2b8   : > { %v2306_v24 = vpop.f32.mrf.mxu0 }
 0x2b9   : > { %v2448_v40 = vadd.f32 %v6927_v3, %v2409_v21  ;;  %v2408_v41 = vmul.f32 %v6921_v62, %v2306_v24  ;;  %v1181_v25 = vpop.permute.xlu0 %1180  ;;  %v1183_v27 = vpop.permute.xlu1 %1182 }
 0x2ba   : > { %1247 = vst.msk [vmem:[#allocation4 + $0xf0] sm:$0xff] %vm1216_vm6, %v1181_v25  ;;  %1248 = vst.msk [vmem:[#allocation4 + $0xf8] sm:$0xff] %vm1216_vm6, %v1183_v27 }
 0x2bb   : > { %vm2480_vm3 = vcmp.ge.f32.partialorder %v2448_v40, 0.0  ;;  %v2512_v28 = vmul.f32 0.01, %v2448_v40  ;;  %v2447_v29 = vadd.f32 %v6927_v3, %v2408_v41  ;;  %v3619_v41 = vld [vmem:[#allocation6 + $0x360] sm:$0xff] }
 0x2bd   : > { %v2544_v30 = vsel %vm2480_vm3, %v2448_v40, %v2512_v28  ;;  %vm2479_vm4 = vcmp.ge.f32.partialorder %v2447_v29, 0.0  ;;  %v2511_v45 = vmul.f32 0.01, %v2447_v29  ;;  %v1374_v32 = vpop.permute.xlu0 %1373  ;;  %v1376_v34 = vpop.permute.xlu1 %1375  ;;  %v2840_v40 = vld [vmem:[#allocation3 + $0x30] sm:$0xff]  ;;  %v7041_v28 = vld [vmem:[#allocation3 + $0x1a] sm:$0xff] }
 0x2be   : > { %2631 = vst [vmem:[#allocation3 + $0xe1] sm:$0xff] %v2544_v30  ;;  %1440 = vst.msk [vmem:[#allocation4 + $0xf0] sm:$0xff] %vm1409_vm7, %v1374_v32  ;;  %v2841_v32 = vld [vmem:[#allocation3 + $0x38] sm:$0xff] }
 0x2bf   : > { %1441 = vst.msk [vmem:[#allocation4 + $0xf8] sm:$0xff] %vm1409_vm7, %v1376_v34  ;;  %v2543_v36 = vsel %vm2479_vm4, %v2447_v29, %v2511_v45  ;;  %v3618_v29 = vld [vmem:[#allocation6 + $0x358] sm:$0xff]  ;;  %v3575_v34 = vld [vmem:[#allocation6 + $0x200] sm:$0xff] }
 0x2c0   : > { %2630 = vst [vmem:[#allocation3 + $0xd9] sm:$0xff] %v2543_v36  ;;  %3809 = vmatprep.mubr.f32.mxu1 %v2543_v36  ;;  %v7045_v36 = vld [vmem:[#allocation3 + $0x22] sm:$0xff] }
 0x2c1   : > { %v1568_v0 = vpop.permute.xlu0 %1567  ;;  %v1570_v43 = vpop.permute.xlu1 %1569 }
 0x2c2   : > { %1634 = vst.msk [vmem:[#allocation4 + $0xf0] sm:$0xff] %vm1603_vm8, %v1568_v0  ;;  %1635 = vst.msk [vmem:[#allocation4 + $0xf8] sm:$0xff] %vm1603_vm8, %v1570_v43  ;;  %v3606_v0 = vld [vmem:[#allocation6 + $0x2f8] sm:$0xff]  ;;  %v7052_v43 = vld [vmem:[#allocation3 + $0x32] sm:$0xff] }
 0x2c5   : > { %v1761_v50 = vpop.permute.xlu0 %1760  ;;  %v1763_v51 = vpop.permute.xlu1 %1762 }
 0x2c6   : > { %1827 = vst.msk [vmem:[#allocation4 + $0xf0] sm:$0xff] %vm1796_vm9, %v1761_v50  ;;  %1828 = vst.msk [vmem:[#allocation4 + $0xf8] sm:$0xff] %vm1796_vm9, %v1763_v51 }
 0x2c7   : > { %v7014_v12 = vld [vmem:[#allocation3 + $0xd8] sm:$0xff]  ;;  %v7022_v31 = vld [vmem:[#allocation3 + $0xe0] sm:$0xff] }
 0x2c8   : > { %v7016_v26 = vpop.f32.mrf.mxu1  ;;  %3810 = vmatmul.mubr.f32.gmra.mxu1 %v7014_v12 }
 0x2c9   : > { %7930 = vst [vmem:[#allocation12_spill] sm:$0xff] %v7016_v26  ;;  %v1954_v46 = vpop.permute.xlu0 %1953  ;;  %v1956_v42 = vpop.permute.xlu1 %1955  ;;  %3814 = vmatprep.mubr.f32.mxu1 %v2544_v30  ;;  %v3576_v30 = vld [vmem:[#allocation6 + $0x208] sm:$0xff]  ;;  %v3031_v26 = vld [vmem:[#allocation3 + $0x30] sm:$0xff] }
 0x2ca   : > { %2020 = vst.msk [vmem:[#allocation4 + $0xf0] sm:$0xff] %vm1989_vm10, %v1954_v46  ;;  %2021 = vst.msk [vmem:[#allocation4 + $0xf8] sm:$0xff] %vm1989_vm10, %v1956_v42  ;;  %v3753_v53 = vpop.f32.mrf.mxu1  ;;  %4134 = vmatpush1.msra.mxu1 %v3576_v30  ;;  %v3605_v46 = vld [vmem:[#allocation6 + $0x2f0] sm:$0xff]  ;;  %v3600_v30 = vld [vmem:[#allocation6 + $0x2c8] sm:$0xff] }
 0x2cb   : > { %4135 = vmatprep.subr.mxu1 %v7035_v19  ;;  %v7061_v53 = vld [vmem:[#allocation3 + $0x3a] sm:$0xff] }
 0x2cc   : > { %v7024_v44 = vpop.f32.mrf.mxu1  ;;  %3815 = vmatmul.mubr.f32.gmra.mxu1 %v7022_v31 }
 0x2cd   : > { %7931 = vst [vmem:[#allocation13_spill] sm:$0xff] %v7024_v44  ;;  %4136 = vmatpush1.msra.mxu1 %v3575_v34 }
 0x2ce   : > { %v3758_v56 = vpop.f32.mrf.mxu1  ;;  %4137 = vmatprep.subr.mxu1 %v7035_v19 }
 0x2cf   : > { %4138 = vmatpush2.msra.mxu1 %v3606_v0  ;;  %v3599_v0 = vld [vmem:[#allocation6 + $0x2c0] sm:$0xff] }
 0x2d0   : > { %4139 = vmatprep.subr.mxu1 %v7035_v19 }
 0x2d1   : > { %v2052_v60 = vld [vmem:[#allocation4 + $0xf0] sm:$0xff]  ;;  %v2053_v54 = vld [vmem:[#allocation4 + $0xf8] sm:$0xff]  ;;  %4140 = vmatpush2.msra.mxu1 %v3605_v46 }
 0x2d2   : > { %5267 = vmatprep.mubr.msk.f32.mxu0 %vm2059_vm11, %v2052_v60  ;;  %4141 = vmatprep.subr.mxu1 %v7035_v19  ;;  %v7109_v46 = vld [vmem:[#allocation3 + $0x82] sm:$0xff] }
 0x2d3   : > { %5268 = vmatmul.mubr.msk.f32.gmra.mxu0 %vm2059_vm11, %v2053_v54  ;;  %v3613_v54 = vld [vmem:[#allocation6 + $0x330] sm:$0xff]  ;;  %4142 = vmatpush2.msra.mxu1 %v3604_v4 }
 0x2d4   : > { %3944 = vmatprep.mubr.f32.mxu0 %v2838_v9  ;;  %4143 = vmatprep.subr.mxu1 %v7035_v19 }
 0x2d6   : > { %v5251_v7 = vpop.f32.mrf.mxu0 }
 0x2d7   : > { %v2411_v10 = vmul.f32 %v6921_v62, %v5251_v7  ;;  %3945 = vmatmul.mubr.f32.vlgmr.msra.gmra.mxu0 %v2774_v5  ;;  %v7072_v5 = vld [vmem:[#allocation3 + $0x4a] sm:$0xff] }
 0x2d8   : > { %v2316_v33 = vpop.f32.mrf.mxu0  ;;  %3949 = vmatprep.mubr.f32.mxu0 %v2839_v11  ;;  %4331 = vmatpush1.msra.mxu0 %v3622_v6  ;;  %v3603_v6 = vld [vmem:[#allocation6 + $0x2e0] sm:$0xff]  ;;  %v2845_v7 = vld [vmem:[#allocation3 + $0x68] sm:$0xff] }
 0x2d9   : > { %v2450_v52 = vadd.f32 %v6927_v3, %v2411_v10  ;;  %v2410_v16 = vmul.f32 %v6921_v62, %v2316_v33  ;;  %4332 = vmatprep.subr.mxu0 %v7035_v19  ;;  %v3612_v10 = vld [vmem:[#allocation6 + $0x328] sm:$0xff]  ;;  %v3611_v11 = vld [vmem:[#allocation6 + $0x320] sm:$0xff]  ;;  %4144 = vmatpush2.msra.mxu1 %v3603_v6  ;;  %v3602_v33 = vld [vmem:[#allocation6 + $0x2d8] sm:$0xff] }
 0x2da   : > { %4333 = vmatpush1.msra.mxu0 %v3621_v14  ;;  %v7078_v14 = vld [vmem:[#allocation3 + $0x52] sm:$0xff]  ;;  %4145 = vmatprep.subr.mxu1 %v7035_v19  ;;  %v7127_v6 = vld [vmem:[#allocation3 + $0x9a] sm:$0xff] }
 0x2db   : > { %vm2482_vm5 = vcmp.ge.f32.partialorder %v2450_v52, 0.0  ;;  %v2514_v21 = vmul.f32 0.01, %v2450_v52  ;;  %v2449_v24 = vadd.f32 %v6927_v3, %v2410_v16  ;;  %3950 = vmatmul.mubr.f32.gmra.mxu0 %v2775_v15  ;;  %4334 = vmatprep.subr.mxu0 %v7035_v19  ;;  %v3610_v15 = vld [vmem:[#allocation6 + $0x318] sm:$0xff] }
 0x2dc   : > { %3954 = vmatprep.mubr.f32.mxu0 %v2840_v40  ;;  %4335 = vmatpush1.msra.mxu0 %v3620_v20  ;;  %v7085_v20 = vld [vmem:[#allocation3 + $0x62] sm:$0xff]  ;;  %v3608_v40 = vld [vmem:[#allocation6 + $0x308] sm:$0xff] }
 0x2dd   : > { %v2546_v25 = vsel %vm2482_vm5, %v2450_v52, %v2514_v21  ;;  %vm2481_vm6 = vcmp.ge.f32.partialorder %v2449_v24, 0.0  ;;  %v2513_v27 = vmul.f32 0.01, %v2449_v24  ;;  %4336 = vmatprep.subr.mxu0 %v7035_v19  ;;  %v3609_v52 = vld [vmem:[#allocation6 + $0x310] sm:$0xff]  ;;  %4146 = vmatpush2.msra.mxu1 %v3602_v33  ;;  %v3632_v33 = vld [vmem:[#allocation6 + $0x3c8] sm:$0xff] }
 0x2de   : > { %2633 = vst [vmem:[#allocation3 + $0xf9] sm:$0xff] %v2546_v25  ;;  %4337 = vmatpush1.msra.mxu0 %v3619_v41  ;;  %4147 = vmatprep.subr.mxu1 %v7035_v19  ;;  %v3601_v21 = vld [vmem:[#allocation6 + $0x2d0] sm:$0xff] }
 0x2df   : > { %v2545_v45 = vsel %vm2481_vm6, %v2449_v24, %v2513_v27  ;;  %3955 = vmatmul.mubr.f32.gmra.mxu0 %v7041_v28  ;;  %4338 = vmatprep.subr.mxu0 %v7035_v19  ;;  %v3607_v27 = vld [vmem:[#allocation6 + $0x300] sm:$0xff] }
 0x2e0   : > { %2632 = vst [vmem:[#allocation3 + $0xf1] sm:$0xff] %v2545_v45  ;;  %3959 = vmatprep.mubr.f32.mxu0 %v2841_v32  ;;  %3819 = vmatprep.mubr.f32.mxu1 %v2545_v45 }
 0x2e1   : > { %4339 = vmatpush1.msra.mxu0 %v3618_v29  ;;  %4148 = vmatpush2.msra.mxu1 %v3601_v21  ;;  %v7095_v29 = vld [vmem:[#allocation3 + $0x6a] sm:$0xff]  ;;  %v3593_v21 = vld [vmem:[#allocation6 + $0x290] sm:$0xff] }
 0x2e2   : > { %4340 = vmatprep.subr.mxu0 %v7035_v19  ;;  %4149 = vmatprep.subr.mxu1 %v7035_v19 }
 0x2e3   : > { %3960 = vmatmul.mubr.f32.gmra.mxu0 %v7045_v36  ;;  %4150 = vmatpush2.msra.mxu1 %v3600_v30 }
 0x2e4   : > { %3964 = vmatprep.mubr.f32.mxu0 %v2842_v39  ;;  %4341 = vmatpush1.msra.mxu0 %v3617_v35  ;;  %v7103_v39 = vld [vmem:[#allocation3 + $0x7a] sm:$0xff] }
 0x2e5   : > { %4342 = vmatprep.subr.mxu0 %v7035_v19  ;;  %4151 = vmatprep.subr.mxu1 %v7035_v19 }
 0x2e6   : > { %4343 = vmatpush1.msra.mxu0 %v3616_v37  ;;  %v3637_v37 = vld [vmem:[#allocation6 + $0x3f0] sm:$0xff]  ;;  %4152 = vmatpush2.msra.mxu1 %v3599_v0  ;;  %v3628_v0 = vld [vmem:[#allocation6 + $0x3a8] sm:$0xff] }
 0x2e7   : > { %3965 = vmatmul.mubr.f32.gmra.mxu0 %v7052_v43  ;;  %v7055_v50 = vld [vmem:[#allocation3 + $0xf0] sm:$0xff]  ;;  %4344 = vmatprep.subr.mxu0 %v7035_v19  ;;  %v7066_v56 = vld [vmem:[#allocation3 + $0xf8] sm:$0xff] }
 0x2e8   : > { %3969 = vmatprep.mubr.f32.mxu0 %v2843_v49  ;;  %v7058_v51 = vpop.f32.mrf.mxu1  ;;  %3820 = vmatmul.mubr.f32.gmra.mxu1 %v7055_v50  ;;  %v3636_v49 = vld [vmem:[#allocation6 + $0x3e8] sm:$0xff] }
 0x2e9   : > { %7932 = vst [vmem:[#allocation14_spill] sm:$0xff] %v7058_v51  ;;  %3824 = vmatprep.mubr.f32.mxu1 %v2546_v25  ;;  %4345 = vmatpush1.msra.mxu0 %v3615_v38  ;;  %v7377_v51 = vld [vmem:[#allocation3 + $0x79] sm:$0xff] }
 0x2ea   : > { %v3763_v42 = vpop.f32.mrf.mxu1  ;;  %4346 = vmatprep.subr.mxu0 %v7035_v19  ;;  %4153 = vmatprep.subr.mxu1 %v7035_v19 }
 0x2eb   : > { %3970 = vmatmul.mubr.f32.gmra.mxu0 %v7061_v53  ;;  %v3635_v42 = vld [vmem:[#allocation6 + $0x3e0] sm:$0xff] }
 0x2ec   : > { %3974 = vmatprep.mubr.f32.mxu0 %v2844_v58  ;;  %v7068_v60 = vpop.f32.mrf.mxu1  ;;  %3825 = vmatmul.mubr.f32.gmra.mxu1 %v7066_v56  ;;  %v3634_v58 = vld [vmem:[#allocation6 + $0x3d8] sm:$0xff] }
 0x2ed   : > { %7933 = vst [vmem:[#allocation15_spill] sm:$0xff] %v7068_v60  ;;  %4347 = vmatpush1.msra.mxu0 %v3614_v57  ;;  %v3597_v57 = vld [vmem:[#allocation6 + $0x2b0] sm:$0xff] }
 0x2ee   : > { %v3768_v9 = vpop.f32.mrf.mxu1  ;;  %4348 = vmatprep.subr.mxu0 %v7035_v19 }
 0x2ef   : > { %3975 = vmatmul.mubr.f32.gmra.mxu0 %v7072_v5 }
 0x2f0   : > { %3979 = vmatprep.mubr.f32.mxu0 %v2845_v7  ;;  %4349 = vmatpush1.msra.mxu0 %v3613_v54  ;;  %v3633_v7 = vld [vmem:[#allocation6 + $0x3d0] sm:$0xff] }
 0x2f1   : > { %4350 = vmatprep.subr.mxu0 %v7035_v19 }
 0x2f2   : > { %4351 = vmatpush1.msra.mxu0 %v3612_v10 }
 0x2f3   : > { %3980 = vmatmul.mubr.f32.gmra.mxu0 %v7078_v14  ;;  %4352 = vmatprep.subr.mxu0 %v7035_v19 }
 0x2f4   : > { %3984 = vmatprep.mubr.f32.mxu0 %v6850_v59  ;;  %4353 = vmatpush1.msra.mxu0 %v3611_v11 }
 0x2f5   : > { %4354 = vmatprep.subr.mxu0 %v7035_v19 }
 0x2f6   : > { %v5254_v16 = vpop.f32.mrf.mxu0  ;;  %4355 = vmatpush1.msra.mxu0 %v3610_v15 }
 0x2f7   : > { %v2413_v24 = vmul.f32 %v6921_v62, %v5254_v16  ;;  %3985 = vmatmul.mubr.f32.gmra.mxu0 %v7085_v20  ;;  %4356 = vmatprep.subr.mxu0 %v7035_v19  ;;  %v3594_v16 = vld [vmem:[#allocation6 + $0x298] sm:$0xff] }
 0x2f8   : > { %v2326_v59 = vpop.f32.mrf.mxu0  ;;  %3989 = vmatprep.mubr.f32.mxu0 %v6860_v2  ;;  %4357 = vmatpush1.msra.mxu0 %v3609_v52  ;;  %v3638_v2 = vld [vmem:[#allocation6 + $0x3f8] sm:$0xff] }
 0x2f9   : > { %v2452_v41 = vadd.f32 %v6927_v3, %v2413_v24  ;;  %v2412_v25 = vmul.f32 %v6921_v62, %v2326_v59  ;;  %4358 = vmatprep.subr.mxu0 %v7035_v19  ;;  %v7139_v52 = vld [vmem:[#allocation3 + $0xaa] sm:$0xff]  ;;  %v7146_v24 = vld [vmem:[#allocation3 + $0xb2] sm:$0xff] }
 0x2fa   : > { %4359 = vmatpush1.msra.mxu0 %v3608_v40  ;;  %v3592_v40 = vld [vmem:[#allocation6 + $0x288] sm:$0xff]  ;;  %v3630_v59 = vld [vmem:[#allocation6 + $0x3b8] sm:$0xff] }
 0x2fb   : > { %vm2484_vm7 = vcmp.ge.f32.partialorder %v2452_v41, 0.0  ;;  %v2516_v45 = vmul.f32 0.01, %v2452_v41  ;;  %v2451_v32 = vadd.f32 %v6927_v3, %v2412_v25  ;;  %3990 = vmatmul.mubr.f32.gmra.mxu0 %v7095_v29  ;;  %4360 = vmatprep.subr.mxu0 %v7035_v19  ;;  %v7153_v25 = vld [vmem:[#allocation3 + $0xc2] sm:$0xff] }
 0x2fc   : > { %3994 = vmatprep.mubr.f32.mxu0 %v6901_v48  ;;  %4361 = vmatpush1.msra.mxu0 %v3607_v27  ;;  %v3598_v48 = vld [vmem:[#allocation6 + $0x2b8] sm:$0xff]  ;;  %v3629_v27 = vld [vmem:[#allocation6 + $0x3b0] sm:$0xff] }
 0x2fd   : > { %v2548_v34 = vsel %vm2484_vm7, %v2452_v41, %v2516_v45  ;;  %vm2483_vm8 = vcmp.ge.f32.partialorder %v2451_v32, 0.0  ;;  %v2515_v35 = vmul.f32 0.01, %v2451_v32  ;;  %4362 = vmatprep.subr.mxu0 %v7035_v19  ;;  %4154 = vmatpush2.msra.mxu1 %v3598_v48  ;;  %v3627_v48 = vld [vmem:[#allocation6 + $0x3a0] sm:$0xff] }
 0x2fe   : > { %2635 = vst [vmem:[#allocation3 + $0x111] sm:$0xff] %v2548_v34  ;;  %4363 = vmatpush2.msra.mxu0 %v3638_v2  ;;  %4155 = vmatprep.subr.mxu1 %v7035_v19  ;;  %v7162_v2 = vld [vmem:[#allocation3 + $0xca] sm:$0xff] }
 0x2ff   : > { %v2547_v38 = vsel %vm2483_vm8, %v2451_v32, %v2515_v35  ;;  %3995 = vmatmul.mubr.f32.gmra.mxu0 %v7103_v39  ;;  %4364 = vmatprep.subr.mxu0 %v7035_v19 }
 0x300   : > { %2634 = vst [vmem:[#allocation3 + $0x109] sm:$0xff] %v2547_v38  ;;  %3999 = vmatprep.mubr.f32.mxu0 %v6907_v13  ;;  %3829 = vmatprep.mubr.f32.mxu1 %v2547_v38  ;;  %v7117_v13 = vld [vmem:[#allocation3 + $0x92] sm:$0xff]  ;;  %v7168_v38 = vld [vmem:[#allocation6 + $0x478] sm:$0xff] }
 0x301   : > { %4365 = vmatpush2.msra.mxu0 %v3637_v37  ;;  %4156 = vmatpush2.msra.mxu1 %v3597_v57  ;;  %v2794_v57 = vld [vmem:[#allocation3 + $0xf2] sm:$0xff] }
 0x302   : > { %4366 = vmatprep.subr.mxu0 %v7035_v19  ;;  %4157 = vmatprep.subr.mxu1 %v7035_v19 }
 0x303   : > { %4000 = vmatmul.mubr.f32.gmra.mxu0 %v7109_v46 }
 0x304   : > { %4004 = vmatprep.mubr.f32.mxu0 %v6940_v17  ;;  %4367 = vmatpush2.msra.mxu0 %v3636_v49  ;;  %v3596_v17 = vld [vmem:[#allocation6 + $0x2a8] sm:$0xff] }
 0x305   : > { %4368 = vmatprep.subr.mxu0 %v7035_v19  ;;  %4158 = vmatpush2.msra.mxu1 %v3596_v17 }
 0x306   : > { %4369 = vmatpush2.msra.mxu0 %v3635_v42  ;;  %4159 = vmatprep.subr.mxu1 %v7035_v19  ;;  %v3625_v42 = vld [vmem:[#allocation6 + $0x390] sm:$0xff] }
 0x307   : > { %4005 = vmatmul.mubr.f32.gmra.mxu0 %v7117_v13  ;;  %v7120_v4 = vld [vmem:[#allocation3 + $0x108] sm:$0xff]  ;;  %4370 = vmatprep.subr.mxu0 %v7035_v19  ;;  %v7132_v10 = vld [vmem:[#allocation3 + $0x110] sm:$0xff] }
 0x308   : > { %4009 = vmatprep.mubr.f32.mxu0 %v6947_v22  ;;  %v7124_v54 = vpop.f32.mrf.mxu1  ;;  %3830 = vmatmul.mubr.f32.gmra.mxu1 %v7120_v4  ;;  %v3595_v22 = vld [vmem:[#allocation6 + $0x2a0] sm:$0xff] }
 0x309   : > { %7934 = vst [vmem:[#allocation16_spill] sm:$0xff] %v7124_v54  ;;  %3834 = vmatprep.mubr.f32.mxu1 %v2548_v34  ;;  %4371 = vmatpush2.msra.mxu0 %v3634_v58  ;;  %v3624_v58 = vld [vmem:[#allocation6 + $0x388] sm:$0xff] }
 0x30a   : > { %v3773_v9 = vpop.f32.mrf.mxu1  ;;  %4372 = vmatprep.subr.mxu0 %v7035_v19  ;;  %4160 = vmatpush2.msra.mxu1 %v3595_v22 }
 0x30b   : > { %4010 = vmatmul.mubr.f32.gmra.mxu0 %v7127_v6  ;;  %4161 = vmatprep.subr.mxu1 %v7035_v19 }
 0x30c   : > { %4014 = vmatprep.mubr.f32.mxu0 %v6975_v61  ;;  %v7135_v11 = vpop.f32.mrf.mxu1  ;;  %3835 = vmatmul.mubr.f32.gmra.mxu1 %v7132_v10  ;;  %v3631_v61 = vld [vmem:[#allocation6 + $0x3c0] sm:$0xff] }
 0x30d   : > { %7935 = vst [vmem:[#allocation17_spill] sm:$0xff] %v7135_v11  ;;  %4373 = vmatpush2.msra.mxu0 %v3633_v7  ;;  %4162 = vmatpush2.msra.mxu1 %v3594_v16  ;;  %v2795_v7 = vld [vmem:[#allocation3 + $0xfa] sm:$0xff]  ;;  %v2796_v16 = vld [vmem:[#allocation3 + $0x10a] sm:$0xff] }
 0x30e   : > { %v3778_v15 = vpop.f32.mrf.mxu1  ;;  %4374 = vmatprep.subr.mxu0 %v7035_v19  ;;  %4163 = vmatprep.subr.mxu1 %v7035_v19 }
 0x30f   : > { %4015 = vmatmul.mubr.f32.gmra.mxu0 %v7139_v52  ;;  %4164 = vmatpush2.msra.mxu1 %v3593_v21 }
 0x310   : > { %4019 = vmatprep.mubr.f32.mxu0 %v6982_v55  ;;  %4375 = vmatpush2.msra.mxu0 %v3632_v33  ;;  %v3591_v55 = vld [vmem:[#allocation6 + $0x280] sm:$0xff] }
 0x311   : > { %4376 = vmatprep.subr.mxu0 %v7035_v19  ;;  %4165 = vmatprep.subr.mxu1 %v7035_v19 }
 0x312   : > { %4377 = vmatpush2.msra.mxu0 %v3631_v61  ;;  %4166 = vmatpush2.msra.mxu1 %v3592_v40 }
 0x313   : > { %4020 = vmatmul.mubr.f32.gmra.mxu0 %v7146_v24  ;;  %4378 = vmatprep.subr.mxu0 %v7035_v19 }
 0x314   : > { %4024 = vmatprep.mubr.f32.mxu0 %v7014_v12  ;;  %4167 = vmatprep.subr.mxu1 %v7035_v19 }
 0x315   : > { %4379 = vmatpush2.msra.mxu0 %v3630_v59  ;;  %4168 = vmatpush2.msra.mxu1 %v3591_v55  ;;  %v7193_v59 = vld [vmem:[%s7922_s3] ss:$0 sm:$0xff] }
 0x316   : > { %v5257_v41 = vpop.f32.mrf.mxu0  ;;  %4380 = vmatprep.subr.mxu0 %v7035_v19  ;;  %5350 = vmatprep.subr.mxu1 %v7168_v38 }
 0x317   : > { %v2415_v30 = vmul.f32 %v6921_v62, %v5257_v41  ;;  %4025 = vmatmul.mubr.f32.gmra.mxu0 %v7153_v25 }
 0x318   : > { %v2336_v45 = vpop.f32.mrf.mxu0  ;;  %4029 = vmatprep.mubr.f32.mxu0 %v7022_v31  ;;  %4381 = vmatpush2.msra.mxu0 %v3629_v27 }
 0x319   : > { %v2454_v12 = vadd.f32 %v6927_v3, %v2415_v30  ;;  %v2414_v32 = vmul.f32 %v6921_v62, %v2336_v45  ;;  %4382 = vmatprep.subr.mxu0 %v7035_v19  ;;  %v2792_v62 = vld [vmem:[#allocation3 + $0xda] sm:$0xff] }
 0x31a   : > { %4383 = vmatpush2.msra.mxu0 %v3628_v0 }
 0x31b   : > { %vm2486_vm9 = vcmp.ge.f32.partialorder %v2454_v12, 0.0  ;;  %v2518_v34 = vmul.f32 0.01, %v2454_v12  ;;  %v2453_v35 = vadd.f32 %v6927_v3, %v2414_v32  ;;  %4030 = vmatmul.mubr.f32.gmra.mxu0 %v7162_v2  ;;  %4384 = vmatprep.subr.mxu0 %v7035_v19  ;;  %v3626_v3 = vld [vmem:[#allocation6 + $0x398] sm:$0xff] }
 0x31c   : > { %4034 = vmatprep.mubr.f32.mxu0 %v7055_v50  ;;  %4385 = vmatpush2.msra.mxu0 %v3627_v48  ;;  %v2793_v50 = vld [vmem:[#allocation3 + $0xe2] sm:$0xff] }
 0x31d   : > { %v2550_v31 = vsel %vm2486_vm9, %v2454_v12, %v2518_v34  ;;  %vm2485_vm10 = vcmp.ge.f32.partialorder %v2453_v35, 0.0  ;;  %v2517_v37 = vmul.f32 0.01, %v2453_v35  ;;  %4386 = vmatprep.subr.mxu0 %v7035_v19 }
 0x31e   : > { %2637 = vst [vmem:[#allocation3 + $0x129] sm:$0xff] %v2550_v31  ;;  %4387 = vmatpush2.msra.mxu0 %v3626_v3 }
 0x31f   : > { %v2549_v49 = vsel %vm2485_vm10, %v2453_v35, %v2517_v37  ;;  %4035 = vmatmul.mubr.f32.gmra.mxu0 %v2792_v62  ;;  %4388 = vmatprep.subr.mxu0 %v7035_v19 }
 0x320   : > { %2636 = vst [vmem:[#allocation3 + $0x121] sm:$0xff] %v2549_v49  ;;  %4039 = vmatprep.mubr.f32.mxu0 %v7066_v56  ;;  %3839 = vmatprep.mubr.f32.mxu1 %v2549_v49 }
 0x321   : > { %4389 = vmatpush2.msra.mxu0 %v3625_v42 }
 0x322   : > { %4390 = vmatprep.subr.mxu0 %v7035_v19 }
 0x323   : > { %4040 = vmatmul.mubr.f32.gmra.mxu0 %v2793_v50 }
 0x324   : > { %4044 = vmatprep.mubr.f32.mxu0 %v7120_v4  ;;  %4391 = vmatpush2.msra.mxu0 %v3624_v58  ;;  %v3623_v4 = vld [vmem:[#allocation6 + $0x380] sm:$0xff] }
 0x325   : > { %4392 = vmatprep.subr.mxu0 %v7035_v19  ;;  %v7187_v19 = vld [vmem:[%s7921_s2] ss:$0 sm:$0xff] }
 0x326   : > { %4393 = vmatpush2.msra.mxu0 %v3623_v4  ;;  %v7205_v48 = vld [vmem:[#allocation3 + $0x12a] sm:$0xff] }
 0x327   : > { %4045 = vmatmul.mubr.f32.gmra.mxu0 %v2794_v57  ;;  %v2670_v17 = vld [vmem:[#allocation3 + $0x120] sm:$0xff]  ;;  %v2671_v22 = vld [vmem:[#allocation3 + $0x128] sm:$0xff]  ;;  %5270 = vmatprep.subr.mxu0 %v7168_v38 }
 0x328   : > { %4049 = vmatprep.mubr.f32.mxu0 %v7132_v10  ;;  %v7178_v56 = vpop.f32.mrf.mxu1  ;;  %3840 = vmatmul.mubr.f32.gmra.mxu1 %v2670_v17  ;;  %v2797_v10 = vld [vmem:[#allocation3 + $0x112] sm:$0xff] }
 0x329   : > { %7936 = vst [vmem:[#allocation18_spill] sm:$0xff] %v7178_v56  ;;  %3844 = vmatprep.mubr.f32.mxu1 %v2550_v31  ;;  %v7200_v31 = vld [vmem:[#allocation3 + $0x122] sm:$0xff] }
 0x32a   : > { %v3783_v9 = vpop.f32.mrf.mxu1 }
 0x32b   : > { %4050 = vmatmul.mubr.f32.gmra.mxu0 %v2795_v7 }
 0x32c   : > { %4054 = vmatprep.mubr.f32.mxu0 %v2670_v17  ;;  %v7181_v33 = vpop.f32.mrf.mxu1  ;;  %3845 = vmatmul.mubr.f32.gmra.mxu1 %v2671_v22 }
 0x32d   : > { %7937 = vst [vmem:[#allocation19_spill] sm:$0xff] %v7181_v33  ;;  %v7360_v33 = vld [vmem:[#allocation3 + $0x69] sm:$0xff] }
 0x32e   : > { %v3788_v15 = vpop.f32.mrf.mxu1 }
 0x32f   : > { %4055 = vmatmul.mubr.f32.gmra.mxu0 %v2796_v16 }
 0x330   : > { %4059 = vmatprep.mubr.f32.mxu0 %v2671_v22 }
 0x333   : > { %4060 = vmatmul.mubr.f32.gmra.mxu0 %v2797_v10 }
 0x336   : > { %v5260_v61 = vpop.f32.mrf.mxu0 }
 0x337   : > { %v2417_v21 = vmul.f32 %v7187_v19, %v5260_v61 }
 0x338   : > { %v2346_v40 = vpop.f32.mrf.mxu0 }
 0x339   : > { %v2456_v55 = vadd.f32 %v7193_v59, %v2417_v21  ;;  %v2416_v41 = vmul.f32 %v7187_v19, %v2346_v40 }
 0x33b   : > { %vm2488_vm11 = vcmp.ge.f32.partialorder %v2456_v55, 0.0  ;;  %v2520_v27 = vmul.f32 0.01, %v2456_v55  ;;  %v2455_v30 = vadd.f32 %v7193_v59, %v2416_v41 }
 0x33d   : > { %v2552_v45 = vsel %vm2488_vm11, %v2456_v55, %v2520_v27  ;;  %vm2487_vm14 = vcmp.ge.f32.partialorder %v2455_v30, 0.0  ;;  %v2519_v12 = vmul.f32 0.01, %v2455_v30 }
 0x33e   : > { %2639 = vst [vmem:[#allocation3 + $0x141] sm:$0xff] %v2552_v45 }
 0x33f   : > { %v2551_v32 = vsel %vm2487_vm14, %v2455_v30, %v2519_v12 }
 0x340   : > { %2638 = vst [vmem:[#allocation3 + $0x139] sm:$0xff] %v2551_v32  ;;  %3849 = vmatprep.mubr.f32.mxu1 %v2551_v32 }
 0x345   : > { %v7223_v55 = vld [vmem:[#allocation3 + $0x142] sm:$0xff] }
 0x347   : > { %v2862_v34 = vld [vmem:[#allocation3 + $0x138] sm:$0xff]  ;;  %v2863_v37 = vld [vmem:[#allocation3 + $0x140] sm:$0xff] }
 0x348   : > { %4064 = vmatprep.mubr.f32.mxu0 %v2862_v34  ;;  %v7198_v35 = vpop.f32.mrf.mxu1  ;;  %3850 = vmatmul.mubr.f32.gmra.mxu1 %v2862_v34  ;;  %v7218_v10 = vld [vmem:[#allocation3 + $0x13a] sm:$0xff] }
 0x349   : > { %7938 = vst [vmem:[#allocation20_spill] sm:$0xff] %v7198_v35  ;;  %4065 = vmatmul.mubr.f32.gmra.mxu0 %v7200_v31  ;;  %3854 = vmatprep.mubr.f32.mxu1 %v2552_v45 }
 0x34a   : > { %4069 = vmatprep.mubr.f32.mxu0 %v2863_v37  ;;  %v3793_v0 = vpop.f32.mrf.mxu1 }
 0x34c   : > { %v7203_v62 = vpop.f32.mrf.mxu1  ;;  %3855 = vmatmul.mubr.f32.gmra.mxu1 %v2863_v37 }
 0x34d   : > { %7939 = vst [vmem:[#allocation21_spill] sm:$0xff] %v7203_v62  ;;  %4070 = vmatmul.mubr.f32.gmra.mxu0 %v7205_v48  ;;  %v7352_v62 = vld [vmem:[#allocation6 + $0x410] sm:$0xff] }
 0x34e   : > { %v3798_v49 = vpop.f32.mrf.mxu1 }
 0x356   : > { %v5263_v3 = vpop.f32.mrf.mxu0 }
 0x357   : > { %v2419_v50 = vmul.f32 %v7187_v19, %v5263_v3 }
 0x358   : > { %v2356_v42 = vpop.f32.mrf.mxu0 }
 0x359   : > { %v2458_v57 = vadd.f32 %v7193_v59, %v2419_v50  ;;  %v2418_v58 = vmul.f32 %v7187_v19, %v2356_v42 }
 0x35b   : > { %vm2490_vm15 = vcmp.ge.f32.partialorder %v2458_v57, 0.0  ;;  %v2522_v17 = vmul.f32 0.01, %v2458_v57  ;;  %v2457_v9 = vadd.f32 %v7193_v59, %v2418_v58 }
 0x35d   : > { %v2554_v7 = vsel %vm2490_vm15, %v2458_v57, %v2522_v17  ;;  %vm2489_vm0 = vcmp.ge.f32.partialorder %v2457_v9, 0.0  ;;  %v2521_v4 = vmul.f32 0.01, %v2457_v9 }
 0x35e   : > { %2641 = vst [vmem:[#allocation3 + $0x159] sm:$0xff] %v2554_v7 }
 0x35f   : > { %v7212_v22 = vsel %vm2489_vm0, %v2457_v9, %v2521_v4  ;;  %v2902_v4 = vld [vmem:[#allocation3 + $0x19] sm:$0xff] }
 0x360   : > { %2640 = vst [vmem:[#allocation3 + $0x151] sm:$0xff] %v7212_v22  ;;  %3859 = vmatprep.mubr.f32.mxu1 %v7212_v22 }
 0x365   : > { %v7251_v17 = vld [vmem:[#allocation3 + $0x15a] sm:$0xff] }
 0x367   : > { %v2864_v15 = vld [vmem:[#allocation3 + $0x150] sm:$0xff]  ;;  %v2865_v61 = vld [vmem:[#allocation3 + $0x158] sm:$0xff] }
 0x368   : > { %4074 = vmatprep.mubr.f32.mxu0 %v2864_v15  ;;  %v7216_v16 = vpop.f32.mrf.mxu1  ;;  %3860 = vmatmul.mubr.f32.gmra.mxu1 %v2864_v15  ;;  %v7241_v42 = vld [vmem:[#allocation3 + $0x152] sm:$0xff]  ;;  %v7257_v15 = vld [vmem:[#allocation6 + $0x470] sm:$0xff] }
 0x369   : > { %7940 = vst [vmem:[#allocation22_spill] sm:$0xff] %v7216_v16  ;;  %4075 = vmatmul.mubr.f32.gmra.mxu0 %v7218_v10  ;;  %3864 = vmatprep.mubr.f32.mxu1 %v2554_v7 }
 0x36a   : > { %4079 = vmatprep.mubr.f32.mxu0 %v2865_v61  ;;  %v3803_v21 = vpop.f32.mrf.mxu1 }
 0x36b   : > { %v7261_v21 = vld [vmem:[#allocation6 + $0x468] sm:$0xff] }
 0x36c   : > { %v7221_v40 = vpop.f32.mrf.mxu1  ;;  %3865 = vmatmul.mubr.f32.gmra.mxu1 %v2865_v61 }
 0x36d   : > { %7941 = vst [vmem:[#allocation23_spill] sm:$0xff] %v7221_v40  ;;  %4080 = vmatmul.mubr.f32.gmra.mxu0 %v7223_v55  ;;  %v7342_v40 = vld [vmem:[#allocation6 + $0x418] sm:$0xff] }
 0x36e   : > { %v3808_v41 = vpop.f32.mrf.mxu1 }
 0x36f   : > { %v2903_v41 = vld [vmem:[#allocation3 + $0x21] sm:$0xff] }
 0x373   : > { %v5266_v27 = vpop.f32.mrf.mxu0 }
 0x374   : > { %v2421_v30 = vmul.f32 %v7187_v19, %v5266_v27  ;;  %v7265_v27 = vld [vmem:[#allocation6 + $0x460] sm:$0xff] }
 0x375   : > { %v2366_v45 = vpop.f32.mrf.mxu0 }
 0x376   : > { %v2460_v12 = vadd.f32 %v7193_v59, %v2421_v30  ;;  %v2420_v32 = vmul.f32 %v7187_v19, %v2366_v45  ;;  %v7274_v45 = vld [vmem:[#allocation3 + $0x31] sm:$0xff] }
 0x378   : > { %vm2492_vm1 = vcmp.ge.f32.partialorder %v2460_v12, 0.0  ;;  %v2524_v34 = vmul.f32 0.01, %v2460_v12  ;;  %v2459_v37 = vadd.f32 %v7193_v59, %v2420_v32 }
 0x37a   : > { %v7230_v0 = vsel %vm2492_vm1, %v2460_v12, %v2524_v34  ;;  %vm2491_vm2 = vcmp.ge.f32.partialorder %v2459_v37, 0.0  ;;  %v2523_v49 = vmul.f32 0.01, %v2459_v37  ;;  %v7277_v12 = vld [vmem:[#allocation6 + $0x450] sm:$0xff] }
 0x37b   : > { %2643 = vst [vmem:[#allocation3 + $0x171] sm:$0xff] %v7230_v0 }
 0x37c   : > { %v7233_v3 = vsel %vm2491_vm2, %v2459_v37, %v2523_v49  ;;  %v7285_v37 = vld [vmem:[#allocation6 + $0x448] sm:$0xff] }
 0x37d   : > { %2642 = vst [vmem:[#allocation3 + $0x169] sm:$0xff] %v7233_v3  ;;  %3869 = vmatprep.mubr.f32.mxu1 %v7233_v3 }
 0x382   : > { %v7363_v11 = vld [vmem:[#allocation3 + $0x172] sm:$0xff] }
 0x384   : > { %v7237_v50 = vld [vmem:[#allocation3 + $0x168] sm:$0xff]  ;;  %v7245_v57 = vld [vmem:[#allocation3 + $0x170] sm:$0xff] }
 0x385   : > { %4084 = vmatprep.mubr.f32.mxu0 %v7237_v50  ;;  %3870 = vmatmul.mubr.f32.gmra.mxu1 %v7237_v50  ;;  %v7345_v16 = vld [vmem:[#allocation3 + $0x16a] sm:$0xff] }
 0x386   : > { %4085 = vmatmul.mubr.f32.gmra.mxu0 %v7241_v42  ;;  %3874 = vmatprep.mubr.f32.mxu1 %v7230_v0 }
 0x387   : > { %4089 = vmatprep.mubr.f32.mxu0 %v7245_v57 }
 0x388   : > { %v7248_v58 = vpop.f32.mrf.mxu1 }
 0x389   : > { %7942 = vst [vmem:[#allocation24_spill] sm:$0xff] %v7248_v58  ;;  %3875 = vmatmul.mubr.f32.gmra.mxu1 %v7245_v57  ;;  %v7339_v58 = vld [vmem:[#allocation3 + $0x61] sm:$0xff] }
 0x38a   : > { %4090 = vmatmul.mubr.f32.gmra.mxu0 %v7251_v17  ;;  %v3813_v9 = vpop.f32.mrf.mxu1  ;;  %4169 = vmatprep.mubr.f32.mxu1 %v7041_v28  ;;  %v7270_v28 = vld [vmem:[#allocation6 + $0x458] sm:$0xff] }
 0x38c   : > { %v7255_v7 = vpop.f32.mrf.mxu1 }
 0x38d   : > { %7943 = vst [vmem:[#allocation25_spill] sm:$0xff] %v7255_v7  ;;  %4170 = vmatmul.mubr.f32.vlgmr.msra.gmra.mxu1 %v2902_v4 }
 0x38e   : > { %v3818_v61 = vpop.f32.mrf.mxu1  ;;  %4174 = vmatprep.mubr.f32.mxu1 %v7045_v36  ;;  %5366 = vmatpush3.msra.mxu1 %v7168_v38 }
 0x38f   : > { %5351 = vmatprep.subr.mxu1 %v7257_v15  ;;  %v7291_v61 = vld [vmem:[#allocation3 + $0x39] sm:$0xff] }
 0x390   : > { %5367 = vmatpush3.msra.mxu1 %v7257_v15 }
 0x391   : > { %4175 = vmatmul.mubr.f32.gmra.mxu1 %v2903_v41  ;;  %5352 = vmatprep.subr.mxu1 %v7261_v21  ;;  %v7294_v41 = vld [vmem:[#allocation6 + $0x440] sm:$0xff] }
 0x392   : > { %4179 = vmatprep.mubr.f32.mxu1 %v7052_v43  ;;  %5368 = vmatpush3.msra.mxu1 %v7261_v21 }
 0x393   : > { %v5269_v36 = vpop.f32.mrf.mxu0  ;;  %5353 = vmatprep.subr.mxu1 %v7265_v27 }
 0x394   : > { %v2423_v30 = vmul.f32 %v7187_v19, %v5269_v36  ;;  %5369 = vmatpush3.msra.mxu1 %v7265_v27 }
 0x395   : > { %v2376_v32 = vpop.f32.mrf.mxu0  ;;  %4180 = vmatmul.mubr.f32.gmra.mxu1 %v7274_v45  ;;  %5354 = vmatprep.subr.mxu1 %v7270_v28 }
 0x396   : > { %v2462_v43 = vadd.f32 %v7193_v59, %v2423_v30  ;;  %v2422_v34 = vmul.f32 %v7187_v19, %v2376_v32  ;;  %4184 = vmatprep.mubr.f32.mxu1 %v7061_v53  ;;  %5370 = vmatpush3.msra.mxu1 %v7270_v28 }
 0x397   : > { %v7287_v49 = vpop.f32.mrf.mxu0  ;;  %5355 = vmatprep.subr.mxu1 %v7277_v12 }
 0x398   : > { %vm2494_vm12 = vcmp.ge.f32.partialorder %v2462_v43, 0.0  ;;  %v2526_v9 = vmul.f32 0.01, %v2462_v43  ;;  %v2461_v4 = vadd.f32 %v7193_v59, %v2422_v34  ;;  %5371 = vmatpush3.msra.mxu1 %v7277_v12  ;;  %v7302_v59 = vld [vmem:[#allocation6 + $0x438] sm:$0xff] }
 0x399   : > { %v3948_v19 = vpop.f32.mrf.mxu0  ;;  %4185 = vmatmul.mubr.f32.gmra.mxu1 %v7291_v61  ;;  %5356 = vmatprep.subr.mxu1 %v7285_v37  ;;  %v7310_v34 = vld [vmem:[#allocation3 + $0x49] sm:$0xff] }
 0x39a   : > { %v7298_v53 = vsel %vm2494_vm12, %v2462_v43, %v2526_v9  ;;  %vm2493_vm13 = vcmp.ge.f32.partialorder %v2461_v4, 0.0  ;;  %v2525_v36 = vmul.f32 0.01, %v2461_v4  ;;  %4189 = vmatprep.mubr.f32.mxu1 %v7072_v5  ;;  %5372 = vmatpush3.msra.mxu1 %v7285_v37  ;;  %v7313_v43 = vld [vmem:[#allocation6 + $0x430] sm:$0xff]  ;;  %v7320_v9 = vld [vmem:[#allocation6 + $0x428] sm:$0xff] }
 0x39b   : > { %2645 = vst [vmem:[#allocation3 + $0x189] sm:$0xff] %v7298_v53  ;;  %v7305_v30 = vpop.f32.mrf.mxu0  ;;  %5357 = vmatprep.subr.mxu1 %v7294_v41  ;;  %v7325_v19 = vld [vmem:[#allocation3 + $0x51] sm:$0xff] }
 0x39c   : > { %v7308_v32 = vsel %vm2493_vm13, %v2461_v4, %v2525_v36  ;;  %5373 = vmatpush3.msra.mxu1 %v7294_v41  ;;  %v7328_v36 = vld [vmem:[#allocation6 + $0x420] sm:$0xff] }
 0x39d   : > { %2644 = vst [vmem:[#allocation3 + $0x181] sm:$0xff] %v7308_v32  ;;  %v3953_v5 = vpop.f32.mrf.mxu0  ;;  %4190 = vmatmul.mubr.f32.gmra.mxu1 %v7310_v34  ;;  %5358 = vmatprep.subr.mxu1 %v7302_v59 }
 0x39e   : > { %4194 = vmatprep.mubr.f32.mxu1 %v7078_v14  ;;  %5374 = vmatpush3.msra.mxu1 %v7302_v59 }
 0x39f   : > { %v7322_v4 = vpop.f32.mrf.mxu0  ;;  %5359 = vmatprep.subr.mxu1 %v7313_v43 }
 0x3a0   : > { %5375 = vmatpush3.msra.mxu1 %v7313_v43 }
 0x3a1   : > { %v3958_v5 = vpop.f32.mrf.mxu0  ;;  %4195 = vmatmul.mubr.f32.gmra.mxu1 %v7325_v19  ;;  %5360 = vmatprep.subr.mxu1 %v7320_v9 }
 0x3a2   : > { %4199 = vmatprep.mubr.f32.mxu1 %v7085_v20  ;;  %5376 = vmatpush3.msra.mxu1 %v7320_v9 }
 0x3a3   : > { %v7334_v14 = vpop.f32.mrf.mxu0  ;;  %5361 = vmatprep.subr.mxu1 %v7328_v36 }
 0x3a4   : > { %v7337_v7 = vld [vmem:[#allocation3 + $0x180] sm:$0xff]  ;;  %5377 = vmatpush3.msra.mxu1 %v7328_v36  ;;  %v7349_v20 = vld [vmem:[#allocation3 + $0x188] sm:$0xff] }
 0x3a5   : > { %v3963_v5 = vpop.f32.mrf.mxu0  ;;  %4094 = vmatprep.mubr.f32.mxu0 %v7337_v7  ;;  %4200 = vmatmul.mubr.f32.gmra.mxu1 %v7339_v58 }
 0x3a6   : > { %4095 = vmatmul.mubr.f32.gmra.mxu0 %v7345_v16  ;;  %4204 = vmatprep.mubr.f32.mxu1 %v7095_v29  ;;  %v7367_v29 = vld [vmem:[#allocation6 + $0x408] sm:$0xff] }
 0x3a7   : > { %v7354_v35 = vpop.f32.mrf.mxu0  ;;  %4099 = vmatprep.mubr.f32.mxu0 %v7349_v20  ;;  %5362 = vmatprep.subr.mxu1 %v7342_v40 }
 0x3a8   : > { %v7358_v5 = vpop.f32.mrf.mxu1  ;;  %5378 = vmatpush3.msra.mxu1 %v7342_v40 }
 0x3a9   : > { %v3968_v56 = vpop.f32.mrf.mxu0  ;;  %4205 = vmatmul.mubr.f32.gmra.mxu1 %v7360_v33  ;;  %5363 = vmatprep.subr.mxu1 %v7352_v62 }
 0x3aa   : > { %4100 = vmatmul.mubr.f32.gmra.mxu0 %v7363_v11  ;;  %v3823_v54 = vpop.f32.mrf.mxu1  ;;  %4209 = vmatprep.mubr.f32.mxu1 %v7103_v39 }
 0x3ab   : > { %v7371_v60 = vpop.f32.mrf.mxu0  ;;  %4394 = vmatprep.mubr.f32.mxu0 %v7274_v45  ;;  %5379 = vmatpush3.msra.mxu1 %v7352_v62  ;;  %v7386_v45 = vld [vmem:[#allocation3 + $0x81] sm:$0xff] }
 0x3ac   : > { %7944 = vst [vmem:[#allocation26_spill] sm:$0xff] %v7371_v60  ;;  %v7375_v56 = vpop.f32.mrf.mxu1  ;;  %5364 = vmatprep.subr.mxu1 %v7367_v29  ;;  %v3032_v60 = vld [vmem:[#allocation3 + $0x38] sm:$0xff] }
 0x3ad   : > { %v3973_v44 = vpop.f32.mrf.mxu0  ;;  %4210 = vmatmul.mubr.f32.gmra.mxu1 %v7377_v51 }
 0x3ae   : > { %4395 = vmatmul.mubr.f32.vlgmr.msra.gmra.mxu0 %v3031_v26  ;;  %v3828_v54 = vpop.f32.mrf.mxu1  ;;  %4214 = vmatprep.mubr.f32.mxu1 %v7109_v46  ;;  %v7392_v26 = vld [vmem:[#allocation6 + $0x400] sm:$0xff] }
 0x3af   : > { %5271 = vmatpush3.msra.mxu0 %v7168_v38  ;;  %v7383_v39 = vpop.f32.mrf.mxu0  ;;  %4399 = vmatprep.mubr.f32.mxu0 %v7291_v61  ;;  %v7399_v38 = vld [vmem:[#allocation3 + $0x91] sm:$0xff]  ;;  %v3035_v54 = vld [vmem:[#allocation3 + $0x60] sm:$0xff] }
 0x3b0   : > { %5272 = vmatprep.subr.mxu0 %v7257_v15  ;;  %5380 = vmatpush3.msra.mxu1 %v7367_v29 }
 0x3b1   : > { %v3978_v44 = vpop.f32.mrf.mxu0  ;;  %4215 = vmatmul.mubr.f32.gmra.mxu1 %v7386_v45  ;;  %5273 = vmatpush3.msra.mxu0 %v7257_v15  ;;  %v3033_v15 = vld [vmem:[#allocation3 + $0x48] sm:$0xff] }
 0x3b2   : > { %4400 = vmatmul.mubr.f32.gmra.mxu0 %v3032_v60  ;;  %4219 = vmatprep.mubr.f32.mxu1 %v7117_v13  ;;  %v7410_v13 = vld [vmem:[#allocation3 + $0x99] sm:$0xff] }
 0x3b3   : > { %v7395_v46 = vpop.f32.mrf.mxu0  ;;  %4404 = vmatprep.mubr.f32.mxu0 %v7310_v34  ;;  %5274 = vmatprep.subr.mxu0 %v7261_v21  ;;  %v3034_v34 = vld [vmem:[#allocation3 + $0x50] sm:$0xff]  ;;  %v3037_v44 = vld [vmem:[#allocation3 + $0x78] sm:$0xff] }
 0x3b4   : > { %5275 = vmatpush3.msra.mxu0 %v7261_v21  ;;  %5365 = vmatprep.subr.mxu1 %v7392_v26 }
 0x3b5   : > { %v3983_v61 = vpop.f32.mrf.mxu0  ;;  %4220 = vmatmul.mubr.f32.gmra.mxu1 %v7399_v38  ;;  %5276 = vmatprep.subr.mxu0 %v7265_v27 }
 0x3b6   : > { %4405 = vmatmul.mubr.f32.gmra.mxu0 %v3033_v15  ;;  %4224 = vmatprep.mubr.f32.mxu1 %v7127_v6  ;;  %v3038_v61 = vld [vmem:[#allocation3 + $0x80] sm:$0xff] }
 0x3b7   : > { %v7406_v60 = vpop.f32.mrf.mxu0  ;;  %4409 = vmatprep.mubr.f32.mxu0 %v7325_v19  ;;  %5277 = vmatpush3.msra.mxu0 %v7265_v27  ;;  %v7421_v27 = vld [vmem:[#allocation3 + $0xa9] sm:$0xff]  ;;  %v7457_v15 = vld [vmem:[#allocation3 + $0xda] sm:$0xff] }
 0x3b8   : > { %5278 = vmatprep.subr.mxu0 %v7270_v28  ;;  %5381 = vmatpush3.msra.mxu1 %v7392_v26 }
 0x3b9   : > { %v3988_v21 = vpop.f32.mrf.mxu0  ;;  %4225 = vmatmul.mubr.f32.gmra.mxu1 %v7410_v13  ;;  %5279 = vmatpush3.msra.mxu0 %v7270_v28 }
 0x3ba   : > { %4410 = vmatmul.mubr.f32.gmra.mxu0 %v3034_v34  ;;  %4229 = vmatprep.mubr.f32.mxu1 %v7139_v52  ;;  %v2918_v21 = vld [vmem:[#allocation3 + $0xd9] sm:$0xff] }
 0x3bb   : > { %v7417_v6 = vpop.f32.mrf.mxu0  ;;  %4414 = vmatprep.mubr.f32.mxu0 %v7339_v58  ;;  %5280 = vmatprep.subr.mxu0 %v7277_v12  ;;  %v7431_v58 = vld [vmem:[#allocation3 + $0xb1] sm:$0xff] }
 0x3bc   : > { %5281 = vmatpush3.msra.mxu0 %v7277_v12  ;;  %v3036_v12 = vld [vmem:[#allocation3 + $0x68] sm:$0xff] }
 0x3bd   : > { %v3993_v19 = vpop.f32.mrf.mxu0  ;;  %4230 = vmatmul.mubr.f32.gmra.mxu1 %v7421_v27  ;;  %5282 = vmatprep.subr.mxu0 %v7285_v37 }
 0x3be   : > { %4415 = vmatmul.mubr.f32.gmra.mxu0 %v3035_v54  ;;  %4234 = vmatprep.mubr.f32.mxu1 %v7146_v24  ;;  %v3039_v19 = vld [vmem:[#allocation3 + $0x90] sm:$0xff]  ;;  %v7468_v54 = vld [vmem:[#allocation3 + $0xe2] sm:$0xff] }
 0x3bf   : > { %v7427_v52 = vpop.f32.mrf.mxu0  ;;  %4419 = vmatprep.mubr.f32.mxu0 %v7360_v33  ;;  %5283 = vmatpush3.msra.mxu0 %v7285_v37  ;;  %v7441_v33 = vld [vmem:[#allocation3 + $0xc1] sm:$0xff] }
 0x3c0   : > { %5284 = vmatprep.subr.mxu0 %v7294_v41 }
 0x3c1   : > { %v3998_v28 = vpop.f32.mrf.mxu0  ;;  %4235 = vmatmul.mubr.f32.gmra.mxu1 %v7431_v58  ;;  %5285 = vmatpush3.msra.mxu0 %v7294_v41  ;;  %v7453_v41 = vld [vmem:[#allocation3 + $0xc9] sm:$0xff] }
 0x3c2   : > { %4420 = vmatmul.mubr.f32.gmra.mxu0 %v3036_v12  ;;  %4239 = vmatprep.mubr.f32.mxu1 %v7153_v25  ;;  %v3040_v12 = vld [vmem:[#allocation3 + $0x98] sm:$0xff] }
 0x3c3   : > { %v7437_v24 = vpop.f32.mrf.mxu0  ;;  %4424 = vmatprep.mubr.f32.mxu0 %v7377_v51  ;;  %5286 = vmatprep.subr.mxu0 %v7302_v59 }
 0x3c4   : > { %5287 = vmatpush3.msra.mxu0 %v7302_v59 }
 0x3c5   : > { %v4003_v37 = vpop.f32.mrf.mxu0  ;;  %4240 = vmatmul.mubr.f32.gmra.mxu1 %v7441_v33  ;;  %5288 = vmatprep.subr.mxu0 %v7313_v43 }
 0x3c6   : > { %4425 = vmatmul.mubr.f32.gmra.mxu0 %v3037_v44  ;;  %4244 = vmatprep.mubr.f32.mxu1 %v7162_v2  ;;  %v7477_v37 = vld [vmem:[#allocation3 + $0xf2] sm:$0xff] }
 0x3c7   : > { %v7447_v25 = vpop.f32.mrf.mxu0  ;;  %4429 = vmatprep.mubr.f32.mxu0 %v7386_v45  ;;  %5289 = vmatpush3.msra.mxu0 %v7313_v43 }
 0x3c8   : > { %v7451_v51 = vpop.f32.mrf.mxu1  ;;  %5290 = vmatprep.subr.mxu0 %v7320_v9 }
 0x3c9   : > { %v4008_v59 = vpop.f32.mrf.mxu0  ;;  %4245 = vmatmul.mubr.f32.gmra.mxu1 %v7453_v41  ;;  %5291 = vmatpush3.msra.mxu0 %v7320_v9 }
 0x3ca   : > { %4430 = vmatmul.mubr.f32.gmra.mxu0 %v3038_v61  ;;  %v3833_v2 = vpop.f32.mrf.mxu1  ;;  %4249 = vmatprep.mubr.f32.mxu1 %v7457_v15  ;;  %v3041_v59 = vld [vmem:[#allocation3 + $0xa8] sm:$0xff]  ;;  %v7486_v61 = vld [vmem:[#allocation3 + $0xfa] sm:$0xff] }
 0x3cb   : > { %v7461_v45 = vpop.f32.mrf.mxu0  ;;  %4434 = vmatprep.mubr.f32.mxu0 %v7399_v38  ;;  %5292 = vmatprep.subr.mxu0 %v7328_v36  ;;  %v2919_v38 = vld [vmem:[#allocation3 + $0xe1] sm:$0xff] }
 0x3cc   : > { %v7465_v43 = vpop.f32.mrf.mxu1  ;;  %5293 = vmatpush3.msra.mxu0 %v7328_v36 }
 0x3cd   : > { %v4013_v34 = vpop.f32.mrf.mxu0  ;;  %4250 = vmatmul.mubr.f32.gmra.mxu1 %v2918_v21  ;;  %5294 = vmatprep.subr.mxu0 %v7342_v40 }
 0x3ce   : > { %4435 = vmatmul.mubr.f32.gmra.mxu0 %v3039_v19  ;;  %v3838_v9 = vpop.f32.mrf.mxu1  ;;  %4254 = vmatprep.mubr.f32.mxu1 %v7468_v54  ;;  %v7494_v34 = vld [vmem:[#allocation3 + $0x10a] sm:$0xff] }
 0x3cf   : > { %v7472_v28 = vpop.f32.mrf.mxu0  ;;  %4439 = vmatprep.mubr.f32.mxu0 %v7410_v13  ;;  %5295 = vmatpush3.msra.mxu0 %v7342_v40  ;;  %v2920_v40 = vld [vmem:[#allocation3 + $0xf1] sm:$0xff]  ;;  %v2922_v9 = vld [vmem:[#allocation3 + $0x109] sm:$0xff] }
 0x3d0   : > { %5296 = vmatprep.subr.mxu0 %v7352_v62 }
 0x3d1   : > { %v4018_v36 = vpop.f32.mrf.mxu0  ;;  %4255 = vmatmul.mubr.f32.gmra.mxu1 %v2919_v38  ;;  %5297 = vmatpush3.msra.mxu0 %v7352_v62 }
 0x3d2   : > { %4440 = vmatmul.mubr.f32.gmra.mxu0 %v3040_v12  ;;  %4259 = vmatprep.mubr.f32.mxu1 %v7477_v37  ;;  %v3043_v12 = vld [vmem:[#allocation3 + $0xc0] sm:$0xff] }
 0x3d3   : > { %v7481_v44 = vpop.f32.mrf.mxu0  ;;  %4444 = vmatprep.mubr.f32.mxu0 %v7421_v27  ;;  %5298 = vmatprep.subr.mxu0 %v7367_v29  ;;  %v2921_v27 = vld [vmem:[#allocation3 + $0xf9] sm:$0xff] }
 0x3d4   : > { %5299 = vmatpush3.msra.mxu0 %v7367_v29  ;;  %v3042_v29 = vld [vmem:[#allocation3 + $0xb0] sm:$0xff] }
 0x3d5   : > { %v4023_v13 = vpop.f32.mrf.mxu0  ;;  %4260 = vmatmul.mubr.f32.gmra.mxu1 %v2920_v40  ;;  %5300 = vmatprep.subr.mxu0 %v7392_v26 }
 0x3d6   : > { %4445 = vmatmul.mubr.f32.gmra.mxu0 %v3041_v59  ;;  %4264 = vmatprep.mubr.f32.mxu1 %v7486_v61  ;;  %v2923_v13 = vld [vmem:[#allocation3 + $0x111] sm:$0xff] }
 0x3d7   : > { %v7490_v62 = vpop.f32.mrf.mxu0  ;;  %4449 = vmatprep.mubr.f32.mxu0 %v7431_v58  ;;  %5301 = vmatpush3.msra.mxu0 %v7392_v26  ;;  %v7500_v58 = vld [vmem:[#allocation3 + $0x112] sm:$0xff] }
 0x3d9   : > { %v4028_v2 = vpop.f32.mrf.mxu0  ;;  %4265 = vmatmul.mubr.f32.gmra.mxu1 %v2921_v27 }
 0x3da   : > { %4450 = vmatmul.mubr.f32.gmra.mxu0 %v3042_v29  ;;  %4269 = vmatprep.mubr.f32.mxu1 %v7494_v34  ;;  %v3044_v2 = vld [vmem:[#allocation3 + $0xc8] sm:$0xff] }
 0x3db   : > { %v7497_v19 = vpop.f32.mrf.mxu0  ;;  %4454 = vmatprep.mubr.f32.mxu0 %v7441_v33  ;;  %v2924_v29 = vld [vmem:[#allocation3 + $0x121] sm:$0xff] }
 0x3dc   : > { %7945 = vst [vmem:[#allocation27_spill] sm:$0xff] %v7497_v19 }
 0x3dd   : > { %v4033_v36 = vpop.f32.mrf.mxu0  ;;  %4270 = vmatmul.mubr.f32.gmra.mxu1 %v2922_v9 }
 0x3de   : > { %4455 = vmatmul.mubr.f32.gmra.mxu0 %v3043_v12  ;;  %4274 = vmatprep.mubr.f32.mxu1 %v7500_v58  ;;  %v3045_v12 = vld [vmem:[#allocation3 + $0xd8] sm:$0xff] }
 0x3df   : > { %v7503_v26 = vpop.f32.mrf.mxu0  ;;  %4459 = vmatprep.mubr.f32.mxu0 %v7453_v41 }
 0x3e0   : > { %7946 = vst [vmem:[#allocation28_spill] sm:$0xff] %v7503_v26 }
 0x3e1   : > { %v4038_v59 = vpop.f32.mrf.mxu0  ;;  %4275 = vmatmul.mubr.f32.gmra.mxu1 %v2923_v13 }
 0x3e2   : > { %4460 = vmatmul.mubr.f32.gmra.mxu0 %v3044_v2  ;;  %4279 = vmatprep.mubr.f32.mxu1 %v7200_v31  ;;  %v2925_v2 = vld [vmem:[#allocation3 + $0x129] sm:$0xff]  ;;  %v3046_v31 = vld [vmem:[#allocation3 + $0xe0] sm:$0xff] }
 0x3e3   : > { %v7507_v33 = vpop.f32.mrf.mxu0  ;;  %4464 = vmatprep.mubr.f32.mxu0 %v2918_v21 }
 0x3e5   : > { %v4043_v36 = vpop.f32.mrf.mxu0  ;;  %4280 = vmatmul.mubr.f32.gmra.mxu1 %v2924_v29 }
 0x3e6   : > { %4465 = vmatmul.mubr.f32.gmra.mxu0 %v3045_v12  ;;  %4284 = vmatprep.mubr.f32.mxu1 %v7205_v48 }
 0x3e7   : > { %v4046_v26 = vpop.f32.mrf.mxu0  ;;  %4469 = vmatprep.mubr.f32.mxu0 %v2919_v38  ;;  %v2926_v38 = vld [vmem:[#allocation3 + $0x139] sm:$0xff] }
 0x3e8   : > { %v7511_v41 = vadd.f32 %v4046_v26, %v7358_v5  ;;  %v7513_v59 = vpop.f32.mrf.mxu1  ;;  %v3047_v26 = vld [vmem:[#allocation3 + $0xf0] sm:$0xff] }
 0x3e9   : > { %v4048_v19 = vpop.f32.mrf.mxu0  ;;  %4285 = vmatmul.mubr.f32.gmra.mxu1 %v2925_v2 }
 0x3ea   : > { %7947 = vst [vmem:[#allocation29_spill] sm:$0xff] %v7511_v41  ;;  %4470 = vmatmul.mubr.f32.gmra.mxu0 %v3046_v31  ;;  %v3843_v21 = vpop.f32.mrf.mxu1  ;;  %4289 = vmatprep.mubr.f32.mxu1 %v7218_v10  ;;  %v2927_v10 = vld [vmem:[#allocation3 + $0x141] sm:$0xff] }
 0x3eb   : > { %v4051_v36 = vpop.f32.mrf.mxu0  ;;  %4474 = vmatprep.mubr.f32.mxu0 %v2920_v40 }
 0x3ec   : > { %v7517_v12 = vadd.f32 %v4051_v36, %v7375_v56  ;;  %v7519_v48 = vpop.f32.mrf.mxu1  ;;  %v3048_v56 = vld [vmem:[#allocation3 + $0xf8] sm:$0xff] }
 0x3ed   : > { %v4053_v5 = vpop.f32.mrf.mxu0  ;;  %4290 = vmatmul.mubr.f32.gmra.mxu1 %v2926_v38 }
 0x3ee   : > { %4475 = vmatmul.mubr.f32.gmra.mxu0 %v3047_v26  ;;  %v3848_v41 = vpop.f32.mrf.mxu1  ;;  %4294 = vmatprep.mubr.f32.mxu1 %v7223_v55  ;;  %v3049_v55 = vld [vmem:[#allocation3 + $0x108] sm:$0xff]  ;;  %v3119_v26 = vld [vmem:[#allocation3 + $0x151] sm:$0xff] }
 0x3ef   : > { %v4056_v19 = vpop.f32.mrf.mxu0  ;;  %4479 = vmatprep.mubr.f32.mxu0 %v2921_v27  ;;  %v3050_v27 = vld [vmem:[#allocation3 + $0x110] sm:$0xff] }
 0x3f0   : > { %v7523_v31 = vadd.f32 %v4056_v19, %v7451_v51  ;;  %v2929_v51 = vld [vmem:[#allocation3 + $0x159] sm:$0xff] }
 0x3f1   : > { %v4058_v40 = vpop.f32.mrf.mxu0  ;;  %4295 = vmatmul.mubr.f32.gmra.mxu1 %v2927_v10 }
 0x3f2   : > { %4480 = vmatmul.mubr.f32.gmra.mxu0 %v3048_v56  ;;  %4299 = vmatprep.mubr.f32.mxu1 %v7241_v42  ;;  %v3051_v42 = vld [vmem:[#allocation3 + $0x120] sm:$0xff]  ;;  %v3172_v56 = vld [vmem:[#allocation3 + $0xca] sm:$0xff] }
 0x3f3   : > { %v4061_v21 = vpop.f32.mrf.mxu0  ;;  %4484 = vmatprep.mubr.f32.mxu0 %v2922_v9  ;;  %v3053_v9 = vld [vmem:[#allocation3 + $0x138] sm:$0xff] }
 0x3f4   : > { %v7527_v36 = vadd.f32 %v4061_v21, %v7465_v43  ;;  %v7535_v43 = vld [vmem:[#allocation3 + $0x182] sm:$0xff] }
 0x3f5   : > { %v4063_v41 = vpop.f32.mrf.mxu0  ;;  %4300 = vmatmul.mubr.f32.gmra.mxu1 %v7212_v22  ;;  %v3052_v22 = vld [vmem:[#allocation3 + $0x128] sm:$0xff] }
 0x3f6   : > { %4485 = vmatmul.mubr.f32.gmra.mxu0 %v3049_v55  ;;  %4304 = vmatprep.mubr.f32.mxu1 %v7251_v17  ;;  %v3055_v41 = vld [vmem:[#allocation3 + $0x150] sm:$0xff] }
 0x3f7   : > { %4489 = vmatprep.mubr.f32.mxu0 %v2923_v13  ;;  %v7539_v13 = vld [vmem:[#allocation3 + $0x18a] sm:$0xff] }
 0x3f9   : > { %4305 = vmatmul.mubr.f32.gmra.mxu1 %v2929_v51 }
 0x3fa   : > { %4490 = vmatmul.mubr.f32.gmra.mxu0 %v3050_v27  ;;  %4309 = vmatprep.mubr.f32.mxu1 %v7345_v16  ;;  %v3056_v27 = vld [vmem:[#allocation3 + $0x158] sm:$0xff] }
 0x3fb   : > { %4494 = vmatprep.mubr.f32.mxu0 %v2924_v29 }
 0x3fd   : > { %4310 = vmatmul.mubr.f32.gmra.mxu1 %v7233_v3 }
 0x3fe   : > { %4495 = vmatmul.mubr.f32.gmra.mxu0 %v3051_v42  ;;  %4314 = vmatprep.mubr.f32.mxu1 %v7363_v11  ;;  %v3121_v42 = vld [vmem:[#allocation3 + $0x169] sm:$0xff] }
 0x3ff   : > { %4499 = vmatprep.mubr.f32.mxu0 %v2925_v2  ;;  %v3171_v2 = vld [vmem:[#allocation3 + $0xc2] sm:$0xff] }
 0x401   : > { %4315 = vmatmul.mubr.f32.gmra.mxu1 %v7230_v0  ;;  %v3054_v0 = vld [vmem:[#allocation3 + $0x140] sm:$0xff] }
 0x402   : > { %4500 = vmatmul.mubr.f32.gmra.mxu0 %v3052_v22  ;;  %4319 = vmatprep.mubr.f32.mxu1 %v7535_v43  ;;  %v3159_v22 = vld [vmem:[#allocation3 + $0x32] sm:$0xff] }
 0x403   : > { %4504 = vmatprep.mubr.f32.mxu0 %v2926_v38 }
 0x405   : > { %4320 = vmatmul.mubr.f32.gmra.mxu1 %v7308_v32 }
 0x406   : > { %4505 = vmatmul.mubr.f32.gmra.mxu0 %v3053_v9  ;;  %4324 = vmatprep.mubr.f32.mxu1 %v7539_v13  ;;  %v3189_v9 = vld [vmem:[#allocation3 + $0x19a] sm:$0xff] }
 0x407   : > { %4509 = vmatprep.mubr.f32.mxu0 %v2927_v10 }
 0x408   : > { %v3851_v3 = vpop.f32.mrf.mxu1 }
 0x409   : > { %v4066_v29 = vpop.f32.mrf.mxu0  ;;  %4325 = vmatmul.mubr.f32.gmra.mxu1 %v7298_v53 }
 0x40a   : > { %v7544_v5 = vadd.f32 %v4066_v29, %v7513_v59  ;;  %4510 = vmatmul.mubr.f32.gmra.mxu0 %v3054_v0  ;;  %v3853_v38 = vpop.f32.mrf.mxu1  ;;  %5320 = vmatprep.mubr.f32.mxu1 %v3171_v2  ;;  %v3160_v0 = vld [vmem:[#allocation3 + $0x3a] sm:$0xff] }
 0x40b   : > { %v4068_v19 = vpop.f32.mrf.mxu0  ;;  %4514 = vmatprep.mubr.f32.mxu0 %v3119_v26  ;;  %v3162_v26 = vld [vmem:[#allocation3 + $0x52] sm:$0xff] }
 0x40c   : > { %v3856_v40 = vpop.f32.mrf.mxu1  ;;  %v3164_v19 = vld [vmem:[#allocation3 + $0x6a] sm:$0xff] }
 0x40d   : > { %v4071_v21 = vpop.f32.mrf.mxu0  ;;  %5321 = vmatmul.mubr.f32.vlgmr.msra.gmra.mxu1 %v3172_v56  ;;  %v3165_v56 = vld [vmem:[#allocation3 + $0x7a] sm:$0xff] }
 0x40e   : > { %v7547_v10 = vadd.f32 %v4071_v21, %v7519_v48  ;;  %4515 = vmatmul.mubr.f32.gmra.mxu0 %v3055_v41  ;;  %v3858_v55 = vpop.f32.mrf.mxu1  ;;  %5323 = vmatprep.mubr.f32.mxu1 %v7457_v15  ;;  %v3122_v48 = vld [vmem:[#allocation3 + $0x171] sm:$0xff]  ;;  %v3179_v15 = vld [vmem:[#allocation3 + $0x122] sm:$0xff] }
 0x40f   : > { %v4073_v59 = vpop.f32.mrf.mxu0  ;;  %4519 = vmatprep.mubr.f32.mxu0 %v2929_v51  ;;  %v3166_v21 = vld [vmem:[#allocation3 + $0x82] sm:$0xff]  ;;  %v3169_v41 = vld [vmem:[#allocation3 + $0xaa] sm:$0xff]  ;;  %v3170_v55 = vld [vmem:[#allocation3 + $0xb2] sm:$0xff] }
 0x411   : > { %5324 = vmatmul.mubr.f32.gmra.mxu1 %v7468_v54  ;;  %v3180_v54 = vld [vmem:[#allocation3 + $0x12a] sm:$0xff] }
 0x412   : > { %4520 = vmatmul.mubr.f32.gmra.mxu0 %v3056_v27  ;;  %5326 = vmatprep.mubr.f32.mxu1 %v7477_v37  ;;  %v3181_v37 = vld [vmem:[#allocation3 + $0x13a] sm:$0xff] }
 0x413   : > { %4524 = vmatprep.mubr.f32.mxu0 %v3121_v42 }
 0x415   : > { %5327 = vmatmul.mubr.f32.gmra.mxu1 %v7486_v61  ;;  %v3125_v61 = vld [vmem:[#allocation3 + $0x199] sm:$0xff] }
 0x416   : > { %4525 = vmatmul.mubr.f32.gmra.mxu0 %v7237_v50  ;;  %5329 = vmatprep.mubr.f32.mxu1 %v7494_v34  ;;  %v3182_v50 = vld [vmem:[#allocation3 + $0x142] sm:$0xff]  ;;  %v3183_v34 = vld [vmem:[#allocation3 + $0x152] sm:$0xff] }
 0x417   : > { %4529 = vmatprep.mubr.f32.mxu0 %v3122_v48 }
 0x419   : > { %5330 = vmatmul.mubr.f32.gmra.mxu1 %v7500_v58 }
 0x41a   : > { %4530 = vmatmul.mubr.f32.gmra.mxu0 %v7245_v57  ;;  %5332 = vmatprep.mubr.f32.mxu1 %v3179_v15  ;;  %v3126_v57 = vld [vmem:[#allocation3 + $0x1a1] sm:$0xff] }
 0x41b   : > { %4534 = vmatprep.mubr.f32.mxu0 %v7308_v32  ;;  %v5451_v32 = vld [vmem:[#allocation3] sm:$0xff] }
 0x41d   : > { %5333 = vmatmul.mubr.f32.gmra.mxu1 %v3180_v54 }
 0x41e   : > { %4535 = vmatmul.mubr.f32.gmra.mxu0 %v7337_v7  ;;  %5335 = vmatprep.mubr.f32.mxu1 %v3181_v37 }
 0x41f   : > { %4539 = vmatprep.mubr.f32.mxu0 %v7298_v53 }
 0x421   : > { %5336 = vmatmul.mubr.f32.gmra.mxu1 %v3182_v50 }
 0x422   : > { %4540 = vmatmul.mubr.f32.gmra.mxu0 %v7349_v20  ;;  %5338 = vmatprep.mubr.f32.mxu1 %v3183_v34  ;;  %v3947_v34 = vadd.f32 %v7287_v49, %v6714_v47 }
 0x423   : > { %4544 = vmatprep.mubr.f32.mxu0 %v3125_v61 }
 0x425   : > { %5339 = vmatmul.mubr.f32.gmra.mxu1 %v7251_v17 }
 0x426   : > { %4545 = vmatmul.mubr.f32.gmra.mxu0 %v5451_v32  ;;  %5341 = vmatprep.mubr.f32.mxu1 %v7345_v16 }
 0x427   : > { %4549 = vmatprep.mubr.f32.mxu0 %v3126_v57 }
 0x428   : > { %v3861_v7 = vpop.f32.mrf.mxu1 }
 0x429   : > { %v4076_v58 = vpop.f32.mrf.mxu0  ;;  %5342 = vmatmul.mubr.f32.gmra.mxu1 %v7363_v11  ;;  %v3161_v11 = vld [vmem:[#allocation3 + $0x4a] sm:$0xff] }
 0x42a   : > { %v7564_v53 = vadd.f32 %v4076_v58, %v3851_v3  ;;  %4550 = vmatmul.mubr.f32.gmra.mxu0 %v5451_v32  ;;  %v3863_v51 = vpop.f32.mrf.mxu1  ;;  %5344 = vmatprep.mubr.f32.mxu1 %v7535_v43  ;;  %v3190_v3 = vld [vmem:[#allocation3 + $0x1a2] sm:$0xff] }
 0x42b   : > { %v4078_v20 = vpop.f32.mrf.mxu0  ;;  %5302 = vmatprep.mubr.f32.mxu0 %v3159_v22  ;;  %v3163_v43 = vld [vmem:[#allocation3 + $0x62] sm:$0xff]  ;;  %v3952_v22 = vadd.f32 %v7305_v30, %v6725_v1 }
 0x42c   : > { %v3866_v17 = vpop.f32.mrf.mxu1 }
 0x42d   : > { %v4081_v29 = vpop.f32.mrf.mxu0  ;;  %5345 = vmatmul.mubr.f32.gmra.mxu1 %v7539_v13  ;;  %v3167_v13 = vld [vmem:[#allocation3 + $0x92] sm:$0xff] }
 0x42e   : > { %v7568_v16 = vadd.f32 %v4081_v29, %v3856_v40  ;;  %5303 = vmatmul.mubr.f32.vlgmr.msra.gmra.mxu0 %v3160_v0  ;;  %v3868_v2 = vpop.f32.mrf.mxu1  ;;  %5347 = vmatprep.mubr.f32.mxu1 %v3189_v9  ;;  %v3168_v40 = vld [vmem:[#allocation3 + $0x9a] sm:$0xff]  ;;  %v3957_v29 = vadd.f32 %v7322_v4, %v6942_v18 }
 0x42f   : > { %v4083_v38 = vpop.f32.mrf.mxu0  ;;  %5305 = vmatprep.mubr.f32.mxu0 %v3161_v11  ;;  %v3962_v11 = vadd.f32 %v7334_v14, %v6949_v23 }
 0x430   : > { %v3967_v38 = vadd.f32 %v7354_v35, %v6977_v63 }
 0x431   : > { %5348 = vmatmul.mubr.f32.gmra.mxu1 %v3190_v3 }
 0x432   : > { %5306 = vmatmul.mubr.f32.gmra.mxu0 %v3162_v26 }
 0x433   : > { %5308 = vmatprep.mubr.f32.mxu0 %v3163_v43  ;;  %v7948_v43 = vld [vmem:[#allocation26_spill] sm:$0xff] }
 0x436   : > { %5309 = vmatmul.mubr.f32.gmra.mxu0 %v3164_v19  ;;  %v3972_v19 = vadd.f32 %v7948_v43, %v6985_v8 }
 0x437   : > { %5311 = vmatprep.mubr.f32.mxu0 %v3165_v56 }
 0x43a   : > { %5312 = vmatmul.mubr.f32.gmra.mxu0 %v3166_v21  ;;  %v7949_v21 = vld [vmem:[#allocation12_spill] sm:$0xff] }
 0x43b   : > { %5314 = vmatprep.mubr.f32.mxu0 %v3167_v13  ;;  %v3977_v13 = vadd.f32 %v7383_v39, %v7949_v21 }
 0x43e   : > { %5315 = vmatmul.mubr.f32.gmra.mxu0 %v3168_v40 }
 0x43f   : > { %5317 = vmatprep.mubr.f32.mxu0 %v3169_v41 }
 0x442   : > { %5318 = vmatmul.mubr.f32.gmra.mxu0 %v3170_v55 }
 0x445   : > { %v3871_v59 = vpop.f32.mrf.mxu1 }
 0x446   : > { %v4086_v27 = vpop.f32.mrf.mxu0 }
 0x447   : > { %v7570_v42 = vadd.f32 %v4086_v27, %v3861_v7  ;;  %v3873_v48 = vpop.f32.mrf.mxu1  ;;  %v7950_v27 = vld [vmem:[#allocation13_spill] sm:$0xff] }
 0x448   : > { %v4088_v15 = vpop.f32.mrf.mxu0  ;;  %v3982_v63 = vadd.f32 %v7395_v46, %v7950_v27 }
 0x449   : > { %v3876_v54 = vpop.f32.mrf.mxu1 }
 0x44a   : > { %v4091_v37 = vpop.f32.mrf.mxu0 }
 0x44b   : > { %v7572_v50 = vadd.f32 %v4091_v37, %v3866_v17  ;;  %v3878_v61 = vpop.f32.mrf.mxu1 }
 0x44c   : > { %v4093_v57 = vpop.f32.mrf.mxu0 }
 0x44d   : > { %v4171_v32 = vpop.f32.mrf.mxu1 }
 0x44e   : > { %v4172_v58 = vadd.f32 %v4171_v32, %v3947_v34  ;;  %v7951_v34 = vld [vmem:[#allocation14_spill] sm:$0xff] }
 0x44f   : > { %v4173_v51 = vpop.f32.mrf.mxu1  ;;  %v3987_v57 = vadd.f32 %v7406_v60, %v7951_v34 }
 0x451   : > { %v4176_v20 = vpop.f32.mrf.mxu1 }
 0x452   : > { %v4177_v7 = vadd.f32 %v4176_v20, %v3952_v22 }
 0x453   : > { %v4178_v9 = vpop.f32.mrf.mxu1 }
 0x454   : > { %v7952_v9 = vld [vmem:[#allocation15_spill] sm:$0xff] }
 0x455   : > { %v4181_v0 = vpop.f32.mrf.mxu1  ;;  %v3992_v46 = vadd.f32 %v7417_v6, %v7952_v9 }
 0x456   : > { %v4182_v17 = vadd.f32 %v4181_v0, %v3957_v29 }
 0x457   : > { %v4183_v2 = vpop.f32.mrf.mxu1 }
 0x459   : > { %v4186_v47 = vpop.f32.mrf.mxu1 }
 0x45a   : > { %v4187_v49 = vadd.f32 %v4186_v47, %v3962_v11 }
 0x45b   : > { %v4188_v3 = vpop.f32.mrf.mxu1 }
 0x45c   : > { %v7953_v3 = vld [vmem:[#allocation16_spill] sm:$0xff] }
 0x45d   : > { %v4191_v26 = vpop.f32.mrf.mxu1  ;;  %v3997_v60 = vadd.f32 %v7427_v52, %v7953_v3 }
 0x45e   : > { %v4192_v1 = vadd.f32 %v4191_v26, %v3967_v38 }
 0x45f   : > { %v4193_v30 = vpop.f32.mrf.mxu1 }
 0x461   : > { %v4196_v56 = vpop.f32.mrf.mxu1 }
 0x462   : > { %v4197_v18 = vadd.f32 %v4196_v56, %v3972_v19  ;;  %v7954_v56 = vld [vmem:[#allocation17_spill] sm:$0xff] }
 0x463   : > { %v4198_v4 = vpop.f32.mrf.mxu1  ;;  %v4002_v6 = vadd.f32 %v7437_v24, %v7954_v56 }
 0x465   : > { %v4201_v40 = vpop.f32.mrf.mxu1 }
 0x466   : > { %v4096_v23 = vpop.f32.mrf.mxu0  ;;  %v4202_v14 = vadd.f32 %v4201_v40, %v3977_v13 }
 0x467   : > { %v7588_v41 = vadd.f32 %v4096_v23, %v3871_v59  ;;  %v4203_v55 = vpop.f32.mrf.mxu1 }
 0x468   : > { %v4098_v35 = vpop.f32.mrf.mxu0  ;;  %v7955_v55 = vld [vmem:[#allocation18_spill] sm:$0xff] }
 0x469   : > { %v4206_v48 = vpop.f32.mrf.mxu1  ;;  %v4007_v52 = vadd.f32 %v7447_v25, %v7955_v55  ;;  %v7958_v25 = vld [vmem:[#allocation20_spill] sm:$0xff] }
 0x46a   : > { %v4101_v15 = vpop.f32.mrf.mxu0  ;;  %v4207_v37 = vadd.f32 %v4206_v48, %v3982_v63 }
 0x46b   : > { %v7592_v8 = vadd.f32 %v4101_v15, %v3876_v54  ;;  %v4208_v61 = vpop.f32.mrf.mxu1 }
 0x46c   : > { %v4103_v39 = vpop.f32.mrf.mxu0  ;;  %v7957_v61 = vld [vmem:[#allocation19_spill] sm:$0xff] }
 0x46d   : > { %v4211_v32 = vpop.f32.mrf.mxu1  ;;  %v4012_v24 = vadd.f32 %v7461_v45, %v7957_v61  ;;  %v7960_v45 = vld [vmem:[#allocation21_spill] sm:$0xff]  ;;  %v7968_v61 = vld [vmem:[#allocation28_spill] sm:$0xff] }
 0x46e   : > { %v4212_v51 = vadd.f32 %v4211_v32, %v3987_v57  ;;  %v4396_v22 = vpop.f32.mrf.mxu0 }
 0x46f   : > { %v7596_v59 = vadd.f32 %v4396_v22, %v4172_v58  ;;  %v4213_v20 = vpop.f32.mrf.mxu1 }
 0x470   : > { %v4398_v29 = vpop.f32.mrf.mxu0  ;;  %v4017_v20 = vadd.f32 %v7472_v28, %v7958_v25  ;;  %v7962_v28 = vld [vmem:[#allocation22_spill] sm:$0xff] }
 0x471   : > { %v4216_v0 = vpop.f32.mrf.mxu1 }
 0x472   : > { %v4217_v2 = vadd.f32 %v4216_v0, %v3992_v46  ;;  %v4401_v11 = vpop.f32.mrf.mxu0 }
 0x473   : > { %v7600_v54 = vadd.f32 %v4401_v11, %v4177_v7  ;;  %v4218_v47 = vpop.f32.mrf.mxu1 }
 0x474   : > { %v4403_v38 = vpop.f32.mrf.mxu0  ;;  %v4022_v47 = vadd.f32 %v7481_v44, %v7960_v45  ;;  %v7964_v44 = vld [vmem:[#allocation23_spill] sm:$0xff] }
 0x475   : > { %v4221_v26 = vpop.f32.mrf.mxu1 }
 0x476   : > { %v4222_v30 = vadd.f32 %v4221_v26, %v3997_v60  ;;  %v4406_v43 = vpop.f32.mrf.mxu0 }
 0x477   : > { %v7604_v58 = vadd.f32 %v4406_v43, %v4182_v17  ;;  %v4223_v19 = vpop.f32.mrf.mxu1 }
 0x478   : > { %v4408_v4 = vpop.f32.mrf.mxu0  ;;  %v4027_v19 = vadd.f32 %v7490_v62, %v7962_v28  ;;  %v7967_v62 = vld [vmem:[#allocation24_spill] sm:$0xff] }
 0x479   : > { %v4226_v21 = vpop.f32.mrf.mxu1 }
 0x47a   : > { %v4227_v13 = vadd.f32 %v4226_v21, %v4002_v6  ;;  %v4411_v40 = vpop.f32.mrf.mxu0 }
 0x47b   : > { %v7608_v7 = vadd.f32 %v4411_v40, %v4187_v49  ;;  %v4228_v23 = vpop.f32.mrf.mxu1 }
 0x47c   : > { %v4413_v27 = vpop.f32.mrf.mxu0  ;;  %v7965_v23 = vld [vmem:[#allocation27_spill] sm:$0xff] }
 0x47d   : > { %v4231_v63 = vpop.f32.mrf.mxu1  ;;  %v4032_v55 = vadd.f32 %v7965_v23, %v7964_v44 }
 0x47e   : > { %v7612_v35 = vadd.f32 %v4231_v63, %v4007_v52  ;;  %v4416_v17 = vpop.f32.mrf.mxu0 }
 0x47f   : > { %v7614_v48 = vadd.f32 %v4416_v17, %v4192_v1  ;;  %v4233_v15 = vpop.f32.mrf.mxu1 }
 0x480   : > { %v4418_v34 = vpop.f32.mrf.mxu0 }
 0x481   : > { %7956 = vst [vmem:[#allocation26_spill] sm:$0xff] %v7614_v48  ;;  %v4236_v57 = vpop.f32.mrf.mxu1 }
 0x482   : > { %v7618_v39 = vadd.f32 %v4236_v57, %v4012_v24  ;;  %v4421_v49 = vpop.f32.mrf.mxu0  ;;  %v4037_v24 = vadd.f32 %v7968_v61, %v7967_v62 }
 0x483   : > { %v7620_v32 = vadd.f32 %v4421_v49, %v4197_v18  ;;  %v4238_v22 = vpop.f32.mrf.mxu1 }
 0x484   : > { %v4423_v9 = vpop.f32.mrf.mxu0 }
 0x485   : > { %v4241_v46 = vpop.f32.mrf.mxu1 }
 0x486   : > { %v7624_v29 = vadd.f32 %v4241_v46, %v4017_v20  ;;  %v4426_v1 = vpop.f32.mrf.mxu0 }
 0x487   : > { %v7626_v0 = vadd.f32 %v4426_v1, %v4202_v14  ;;  %v4243_v11 = vpop.f32.mrf.mxu1 }
 0x488   : > { %v4428_v3 = vpop.f32.mrf.mxu0 }
 0x489   : > { %7959 = vst [vmem:[#allocation12_spill] sm:$0xff] %v7626_v0  ;;  %v4246_v60 = vpop.f32.mrf.mxu1 }
 0x48a   : > { %v7630_v38 = vadd.f32 %v4246_v60, %v4022_v47  ;;  %v4431_v18 = vpop.f32.mrf.mxu0 }
 0x48b   : > { %v7632_v26 = vadd.f32 %v4431_v18, %v4207_v37  ;;  %v4248_v43 = vpop.f32.mrf.mxu1 }
 0x48c   : > { %v4433_v56 = vpop.f32.mrf.mxu0 }
 0x48d   : > { %7961 = vst [vmem:[#allocation13_spill] sm:$0xff] %v7632_v26  ;;  %v4251_v6 = vpop.f32.mrf.mxu1 }
 0x48e   : > { %v7636_v4 = vadd.f32 %v4251_v6, %v4027_v19  ;;  %v4436_v14 = vpop.f32.mrf.mxu0 }
 0x48f   : > { %v7638_v21 = vadd.f32 %v4436_v14, %v4212_v51  ;;  %v4253_v40 = vpop.f32.mrf.mxu1 }
 0x490   : > { %v4438_v52 = vpop.f32.mrf.mxu0 }
 0x491   : > { %7963 = vst [vmem:[#allocation14_spill] sm:$0xff] %v7638_v21  ;;  %v4256_v27 = vpop.f32.mrf.mxu1 }
 0x492   : > { %v7642_v63 = vadd.f32 %v4256_v27, %v4032_v55  ;;  %v4441_v37 = vpop.f32.mrf.mxu0 }
 0x493   : > { %v7644_v17 = vadd.f32 %v4441_v37, %v4217_v2  ;;  %v4258_v15 = vpop.f32.mrf.mxu1 }
 0x494   : > { %v4443_v34 = vpop.f32.mrf.mxu0 }
 0x495   : > { %7966 = vst [vmem:[#allocation15_spill] sm:$0xff] %v7644_v17  ;;  %v4261_v57 = vpop.f32.mrf.mxu1  ;;  %v7971_v17 = vld [vmem:[#allocation25_spill] sm:$0xff] }
 0x496   : > { %v7648_v49 = vadd.f32 %v4261_v57, %v4037_v24  ;;  %v4446_v51 = vpop.f32.mrf.mxu0  ;;  %v4042_v0 = vadd.f32 %v7507_v33, %v7971_v17 }
 0x497   : > { %v7650_v22 = vadd.f32 %v4446_v51, %v4222_v30  ;;  %v4263_v25 = vpop.f32.mrf.mxu1 }
 0x498   : > { %v4448_v20 = vpop.f32.mrf.mxu0 }
 0x499   : > { %7969 = vst [vmem:[#allocation16_spill] sm:$0xff] %v7650_v22  ;;  %v7652_v9 = vpop.f32.mrf.mxu1 }
 0x49a   : > { %v4451_v46 = vpop.f32.mrf.mxu0 }
 0x49b   : > { %v7654_v1 = vadd.f32 %v4451_v46, %v4227_v13  ;;  %v4268_v2 = vpop.f32.mrf.mxu1 }
 0x49c   : > { %v4453_v11 = vpop.f32.mrf.mxu0 }
 0x49d   : > { %7970 = vst [vmem:[#allocation17_spill] sm:$0xff] %v7654_v1  ;;  %v7656_v45 = vpop.f32.mrf.mxu1 }
 0x49e   : > { %v4456_v47 = vpop.f32.mrf.mxu0 }
 0x49f   : > { %v4273_v3 = vpop.f32.mrf.mxu1 }
 0x4a0   : > { %v4458_v60 = vpop.f32.mrf.mxu0 }
 0x4a1   : > { %v7658_v18 = vpop.f32.mrf.mxu1 }
 0x4a2   : > { %v4461_v43 = vpop.f32.mrf.mxu0 }
 0x4a3   : > { %v4278_v28 = vpop.f32.mrf.mxu1 }
 0x4a4   : > { %v4463_v30 = vpop.f32.mrf.mxu0 }
 0x4a5   : > { %v7660_v19 = vpop.f32.mrf.mxu1 }
 0x4a6   : > { %v4466_v56 = vpop.f32.mrf.mxu0 }
 0x4a7   : > { %v4283_v6 = vpop.f32.mrf.mxu1  ;;  %v4467_v26 = vadd.f32 %v4466_v56, %v7624_v29  ;;  %v7972_v56 = vld [vmem:[#allocation29_spill] sm:$0xff] }
 0x4a8   : > { %v4468_v14 = vpop.f32.mrf.mxu0 }
 0x4a9   : > { %v7662_v40 = vpop.f32.mrf.mxu1 }
 0x4aa   : > { %v4471_v13 = vpop.f32.mrf.mxu0 }
 0x4ab   : > { %v4288_v44 = vpop.f32.mrf.mxu1 }
 0x4ac   : > { %v4473_v23 = vpop.f32.mrf.mxu0 }
 0x4ad   : > { %v7664_v55 = vpop.f32.mrf.mxu1 }
 0x4ae   : > { %v4476_v52 = vpop.f32.mrf.mxu0 }
 0x4af   : > { %v4293_v27 = vpop.f32.mrf.mxu1 }
 0x4b0   : > { %v4478_v37 = vpop.f32.mrf.mxu0 }
 0x4b1   : > { %v7666_v15 = vpop.f32.mrf.mxu1 }
 0x4b2   : > { %v4481_v62 = vpop.f32.mrf.mxu0 }
 0x4b3   : > { %v4298_v61 = vpop.f32.mrf.mxu1 }
 0x4b4   : > { %v4483_v24 = vpop.f32.mrf.mxu0 }
 0x4b5   : > { %v7668_v34 = vpop.f32.mrf.mxu1 }
 0x4b6   : > { %v7670_v57 = vpop.f32.mrf.mxu0 }
 0x4b7   : > { %v4303_v51 = vpop.f32.mrf.mxu1 }
 0x4b8   : > { %v4488_v25 = vpop.f32.mrf.mxu0 }
 0x4b9   : > { %v7672_v20 = vpop.f32.mrf.mxu1 }
 0x4ba   : > { %v4491_v46 = vpop.f32.mrf.mxu0 }
 0x4bb   : > { %v4308_v2 = vpop.f32.mrf.mxu1 }
 0x4bc   : > { %v4493_v11 = vpop.f32.mrf.mxu0 }
 0x4bd   : > { %v7674_v3 = vpop.f32.mrf.mxu1  ;;  %v4462_v11 = vadd.f32 %v4461_v43, %v7618_v39  ;;  %v4472_v39 = vadd.f32 %v4471_v13, %v7630_v38 }
 0x4be   : > { %v7676_v60 = vpop.f32.mrf.mxu0 }
 0x4bf   : > { %v4313_v28 = vpop.f32.mrf.mxu1 }
 0x4c0   : > { %v4498_v30 = vpop.f32.mrf.mxu0 }
 0x4c1   : > { %v7678_v6 = vpop.f32.mrf.mxu1 }
 0x4c2   : > { %v7680_v14 = vpop.f32.mrf.mxu0 }
 0x4c3   : > { %v4318_v44 = vpop.f32.mrf.mxu1 }
 0x4c4   : > { %v4503_v23 = vpop.f32.mrf.mxu0  ;;  %v7694_v44 = vld [vmem:[%s7924_s5] ss:$0 sm:$0xff] }
 0x4c5   : > { %v7682_v27 = vpop.f32.mrf.mxu1  ;;  %v4457_v23 = vadd.f32 %v4456_v47, %v7612_v35 }
 0x4c6   : > { %v7684_v37 = vpop.f32.mrf.mxu0 }
 0x4c7   : > { %v4323_v61 = vpop.f32.mrf.mxu1 }
 0x4c8   : > { %v4508_v24 = vpop.f32.mrf.mxu0 }
 0x4c9   : > { %v7686_v51 = vpop.f32.mrf.mxu1  ;;  %v7703_v24 = vld [vmem:[%s7925_s6] ss:$0 sm:$0xff] }
 0x4ca   : > { %v7688_v25 = vpop.f32.mrf.mxu0 }
 0x4cb   : > { %v4328_v2 = vpop.f32.mrf.mxu1 }
 0x4cc   : > { %v4513_v28 = vpop.f32.mrf.mxu0 }
 0x4cd   : > { %v5322_v30 = vpop.f32.mrf.mxu1 }
 0x4ce   : > { %v7697_v22 = vpop.f32.mrf.mxu0  ;;  %v4687_v61 = vadd.f32 %v5322_v30, %v4462_v11 }
 0x4cf   : > { %v4681_v2 = vpop.f32.mrf.mxu1 }
 0x4d0   : > { %v4800_v43 = vmul.f32 %v7694_v44, %v4687_v61  ;;  %v4518_v28 = vpop.f32.mrf.mxu0  ;;  %v4682_v1 = vadd.f32 %v4681_v2, %v4457_v23 }
 0x4d1   : > { %v5325_v21 = vpop.f32.mrf.mxu1  ;;  %v4482_v28 = vadd.f32 %v4481_v62, %v7642_v63 }
 0x4d2   : > { %v4839_v35 = vadd.f32 %v7703_v24, %v4800_v43  ;;  %v4799_v47 = vmul.f32 %v7694_v44, %v4682_v1  ;;  %v7711_v11 = vpop.f32.mrf.mxu0  ;;  %v4697_v30 = vadd.f32 %v5325_v21, %v4472_v39  ;;  %v4267_v43 = vadd.f32 %v7652_v9, %v4042_v0 }
 0x4d3   : > { %v4691_v38 = vpop.f32.mrf.mxu1  ;;  %v4477_v1 = vadd.f32 %v4476_v52, %v7636_v4 }
 0x4d4   : > { %vm4871_vm3 = vcmp.ge.f32.partialorder %v4839_v35, 0.0  ;;  %v4903_v13 = vmul.f32 0.01, %v4839_v35  ;;  %v4838_v23 = vadd.f32 %v7703_v24, %v4799_v47  ;;  %v4802_v61 = vmul.f32 %v7694_v44, %v4697_v30  ;;  %v4523_v2 = vpop.f32.mrf.mxu0 }
 0x4d5   : > { %v4692_v21 = vadd.f32 %v4691_v38, %v4467_v26  ;;  %v5328_v39 = vpop.f32.mrf.mxu1  ;;  %v4272_v47 = vadd.f32 %v7656_v45, %v7972_v56  ;;  %v4492_v30 = vadd.f32 %v4491_v46, %v4267_v43  ;;  %v4282_v45 = vadd.f32 %v7660_v19, %v7523_v31 }
 0x4d6   : > { %v4935_v48 = vsel %vm4871_vm3, %v4839_v35, %v4903_v13  ;;  %vm4870_vm4 = vcmp.ge.f32.partialorder %v4838_v23, 0.0  ;;  %v4902_v33 = vmul.f32 0.01, %v4838_v23  ;;  %v4841_v29 = vadd.f32 %v7703_v24, %v4802_v61  ;;  %v7722_v17 = vpop.f32.mrf.mxu0 }
 0x4d7   : > { %4967 = vst [vmem:[%s7726_s14 + $0x68] sm:$0xff] %v4935_v48  ;;  %v4801_v0 = vmul.f32 %v7694_v44, %v4692_v21  ;;  %v4707_v26 = vadd.f32 %v5328_v39, %v4482_v28  ;;  %v4701_v4 = vpop.f32.mrf.mxu1  ;;  %v4277_v35 = vadd.f32 %v7658_v18, %v7517_v12  ;;  %v4487_v13 = vadd.f32 %v7670_v57, %v7648_v49 }
 0x4d8   : > { %v4934_v63 = vsel %vm4870_vm4, %v4838_v23, %v4902_v33  ;;  %vm4873_vm5 = vcmp.ge.f32.partialorder %v4841_v29, 0.0  ;;  %v4905_v9 = vmul.f32 0.01, %v4841_v29  ;;  %v4528_v52 = vpop.f32.mrf.mxu0  ;;  %v4702_v62 = vadd.f32 %v4701_v4, %v4477_v1 }
 0x4d9   : > { %4966 = vst [vmem:[%s7726_s14 + $0x60] sm:$0xff] %v4934_v63  ;;  %v4840_v46 = vadd.f32 %v7703_v24, %v4801_v0  ;;  %v4804_v48 = vmul.f32 %v7694_v44, %v4707_v26  ;;  %v5331_v38 = vpop.f32.mrf.mxu1  ;;  %v4287_v12 = vadd.f32 %v7662_v40, %v7527_v36  ;;  %v4292_v1 = vadd.f32 %v7664_v55, %v7544_v5 }
 0x4da   : > { %v4937_v23 = vsel %vm4873_vm5, %v4841_v29, %v4905_v9  ;;  %v4803_v61 = vmul.f32 %v7694_v44, %v4702_v62  ;;  %v7740_v2 = vpop.f32.mrf.mxu0  ;;  %v4717_v43 = vadd.f32 %v5331_v38, %v4492_v30  ;;  %v4502_v39 = vadd.f32 %v7680_v14, %v4277_v35 }
 0x4db   : > { %4969 = vst [vmem:[%s7726_s14 + $0x78] sm:$0xff] %v4937_v23  ;;  %vm4872_vm6 = vcmp.ge.f32.partialorder %v4840_v46, 0.0  ;;  %v4904_v31 = vmul.f32 0.01, %v4840_v46  ;;  %v4843_v18 = vadd.f32 %v7703_v24, %v4804_v48  ;;  %v4711_v19 = vpop.f32.mrf.mxu1  ;;  %v4497_v30 = vadd.f32 %v7676_v60, %v4272_v47 }
 0x4dc   : > { %v4842_v49 = vadd.f32 %v7703_v24, %v4803_v61  ;;  %v4806_v57 = vmul.f32 %v7694_v44, %v4717_v43  ;;  %v4533_v28 = vpop.f32.mrf.mxu0  ;;  %v4712_v21 = vadd.f32 %v4711_v19, %v4487_v13  ;;  %v4512_v0 = vadd.f32 %v7688_v25, %v4287_v12 }
 0x4dd   : > { %v4936_v36 = vsel %vm4872_vm6, %v4840_v46, %v4904_v31  ;;  %vm4875_vm7 = vcmp.ge.f32.partialorder %v4843_v18, 0.0  ;;  %v4907_v40 = vmul.f32 0.01, %v4843_v18  ;;  %v5334_v33 = vpop.f32.mrf.mxu1  ;;  %v4297_v35 = vadd.f32 %v7666_v15, %v7547_v10 }
 0x4de   : > { %4968 = vst [vmem:[%s7726_s14 + $0x70] sm:$0xff] %v4936_v36  ;;  %vm4874_vm8 = vcmp.ge.f32.partialorder %v4842_v49, 0.0  ;;  %v4906_v29 = vmul.f32 0.01, %v4842_v49  ;;  %v4845_v56 = vadd.f32 %v7703_v24, %v4806_v57  ;;  %v4805_v5 = vmul.f32 %v7694_v44, %v4712_v21  ;;  %v7754_v55 = vpop.f32.mrf.mxu0 }
 0x4df   : > { %v4939_v14 = vsel %vm4875_vm7, %v4843_v18, %v4907_v40  ;;  %v4727_v26 = vadd.f32 %v5334_v33, %v4502_v39  ;;  %v4721_v4 = vpop.f32.mrf.mxu1  ;;  %v4507_v46 = vadd.f32 %v7684_v37, %v4282_v45  ;;  %v4302_v61 = vadd.f32 %v7668_v34, %v7564_v53 }
 0x4e0   : > { %4971 = vst [vmem:[%s7726_s14 + $0x88] sm:$0xff] %v4939_v14  ;;  %v4938_v63 = vsel %vm4874_vm8, %v4842_v49, %v4906_v29  ;;  %vm4877_vm9 = vcmp.ge.f32.partialorder %v4845_v56, 0.0  ;;  %v4909_v9 = vmul.f32 0.01, %v4845_v56  ;;  %v4844_v52 = vadd.f32 %v7703_v24, %v4805_v5  ;;  %v4538_v62 = vpop.f32.mrf.mxu0 }
 0x4e1   : > { %4970 = vst [vmem:[%s7726_s14 + $0x80] sm:$0xff] %v4938_v63  ;;  %v4808_v60 = vmul.f32 %v7694_v44, %v4727_v26  ;;  %v4722_v25 = vadd.f32 %v4721_v4, %v4497_v30  ;;  %v5337_v47 = vpop.f32.mrf.mxu1  ;;  %v4307_v43 = vadd.f32 %v7672_v20, %v7568_v16  ;;  %v4522_v45 = vadd.f32 %v7711_v11, %v4297_v35 }
 0x4e2   : > { %v4941_v48 = vsel %vm4877_vm9, %v4845_v56, %v4909_v9  ;;  %vm4876_vm10 = vcmp.ge.f32.partialorder %v4844_v52, 0.0  ;;  %v4908_v38 = vmul.f32 0.01, %v4844_v52  ;;  %v4541_v13 = vpop.f32.mrf.mxu0  ;;  %v4737_v23 = vadd.f32 %v5337_v47, %v4512_v0 }
 0x4e3   : > { %4973 = vst [vmem:[%s7726_s14 + $0x98] sm:$0xff] %v4941_v48  ;;  %v4847_v10 = vadd.f32 %v7703_v24, %v4808_v60  ;;  %v4807_v15 = vmul.f32 %v7694_v44, %v4722_v25  ;;  %v4731_v37 = vpop.f32.mrf.mxu1  ;;  %v4312_v49 = vadd.f32 %v7674_v3, %v7570_v42  ;;  %v4317_v20 = vadd.f32 %v7678_v6, %v7572_v50 }
 0x4e4   : > { %v4940_v12 = vsel %vm4876_vm10, %v4844_v52, %v4908_v38  ;;  %v4810_v31 = vmul.f32 %v7694_v44, %v4737_v23  ;;  %v4543_v18 = vpop.f32.mrf.mxu0  ;;  %v4732_v19 = vadd.f32 %v4731_v37, %v4507_v46  ;;  %v4517_v39 = vadd.f32 %v7697_v22, %v4292_v1 }
 0x4e5   : > { %4972 = vst [vmem:[%s7726_s14 + $0x90] sm:$0xff] %v4940_v12  ;;  %vm4879_vm11 = vcmp.ge.f32.partialorder %v4847_v10, 0.0  ;;  %v4911_v53 = vmul.f32 0.01, %v4847_v10  ;;  %v4846_v16 = vadd.f32 %v7703_v24, %v4807_v15  ;;  %v5340_v34 = vpop.f32.mrf.mxu1  ;;  %v4527_v29 = vadd.f32 %v7722_v17, %v4302_v61 }
 0x4e6   : > { %v4849_v11 = vadd.f32 %v7703_v24, %v4810_v31  ;;  %v4809_v57 = vmul.f32 %v7694_v44, %v4732_v19  ;;  %v4546_v28 = vpop.f32.mrf.mxu0  ;;  %v4747_v21 = vadd.f32 %v5340_v34, %v4522_v45  ;;  %v4532_v56 = vadd.f32 %v7740_v2, %v4307_v43 }
 0x4e7   : > { %v4943_v42 = vsel %vm4879_vm11, %v4847_v10, %v4911_v53  ;;  %vm4878_vm14 = vcmp.ge.f32.partialorder %v4846_v16, 0.0  ;;  %v4910_v3 = vmul.f32 0.01, %v4846_v16  ;;  %v4741_v36 = vpop.f32.mrf.mxu1  ;;  %v4322_v4 = vadd.f32 %v7682_v27, %v7588_v41 }
 0x4e8   : > { %4975 = vst [vmem:[%s7726_s14 + $0xa8] sm:$0xff] %v4943_v42  ;;  %vm4881_vm15 = vcmp.ge.f32.partialorder %v4849_v11, 0.0  ;;  %v4913_v40 = vmul.f32 0.01, %v4849_v11  ;;  %v4848_v33 = vadd.f32 %v7703_v24, %v4809_v57  ;;  %v4812_v50 = vmul.f32 %v7694_v44, %v4747_v21  ;;  %v4548_v6 = vpop.f32.mrf.mxu0 }
 0x4e9   : > { %v4942_v5 = vsel %vm4878_vm14, %v4846_v16, %v4910_v3  ;;  %v4742_v22 = vadd.f32 %v4741_v36, %v4517_v39  ;;  %v5343_v1 = vpop.f32.mrf.mxu1  ;;  %v4542_v63 = vadd.f32 %v4541_v13, %v4317_v20  ;;  %v4327_v60 = vadd.f32 %v7686_v51, %v7592_v8 }
 0x4ea   : > { %4974 = vst [vmem:[%s7726_s14 + $0xa0] sm:$0xff] %v4942_v5  ;;  %v4945_v30 = vsel %vm4881_vm15, %v4849_v11, %v4913_v40  ;;  %vm4880_vm0 = vcmp.ge.f32.partialorder %v4848_v33, 0.0  ;;  %v4912_v0 = vmul.f32 0.01, %v4848_v33  ;;  %v4851_v14 = vadd.f32 %v7703_v24, %v4812_v50  ;;  %v4551_v26 = vpop.f32.mrf.mxu0 }
 0x4eb   : > { %4977 = vst [vmem:[%s7726_s14 + $0xb8] sm:$0xff] %v4945_v30  ;;  %v4811_v17 = vmul.f32 %v7694_v44, %v4742_v22  ;;  %v4757_v9 = vadd.f32 %v5343_v1, %v4532_v56  ;;  %v4751_v2 = vpop.f32.mrf.mxu1  ;;  %v4537_v25 = vadd.f32 %v7754_v55, %v4312_v49  ;;  %v4547_v48 = vadd.f32 %v4546_v28, %v4322_v4 }
 0x4ec   : > { %v4944_v52 = vsel %vm4880_vm0, %v4848_v33, %v4912_v0  ;;  %vm4883_vm1 = vcmp.ge.f32.partialorder %v4851_v14, 0.0  ;;  %v4915_v62 = vmul.f32 0.01, %v4851_v14  ;;  %v4553_v35 = vpop.f32.mrf.mxu0  ;;  %v4752_v46 = vadd.f32 %v4751_v2, %v4527_v29 }
 0x4ed   : > { %4976 = vst [vmem:[%s7726_s14 + $0xb0] sm:$0xff] %v4944_v52  ;;  %v4850_v41 = vadd.f32 %v7703_v24, %v4811_v17  ;;  %v4814_v27 = vmul.f32 %v7694_v44, %v4757_v9  ;;  %v5346_v47 = vpop.f32.mrf.mxu1  ;;  %v4552_v10 = vadd.f32 %v4551_v26, %v4327_v60  ;;  %v7973_v60 = vld [vmem:[#allocation26_spill] sm:$0xff] }
 0x4ee   : > { %v4947_v38 = vsel %vm4883_vm1, %v4851_v14, %v4915_v62  ;;  %v4813_v13 = vmul.f32 %v7694_v44, %v4752_v46  ;;  %v5304_v23 = vpop.f32.mrf.mxu0  ;;  %v4767_v61 = vadd.f32 %v5346_v47, %v4542_v63 }
 0x4ef   : > { %4979 = vst [vmem:[%s7726_s14 + $0xc8] sm:$0xff] %v4947_v38  ;;  %vm4882_vm2 = vcmp.ge.f32.partialorder %v4850_v41, 0.0  ;;  %v4914_v43 = vmul.f32 0.01, %v4850_v41  ;;  %v4853_v8 = vadd.f32 %v7703_v24, %v4814_v27  ;;  %v4627_v51 = vadd.f32 %v5304_v23, %v7600_v54  ;;  %v4761_v55 = vpop.f32.mrf.mxu1 }
 0x4f0   : > { %v4852_v15 = vadd.f32 %v7703_v24, %v4813_v13  ;;  %v4816_v37 = vmul.f32 %v7694_v44, %v4767_v61  ;;  %v4621_v45 = vpop.f32.mrf.mxu0  ;;  %v4762_v12 = vadd.f32 %v4761_v55, %v4537_v25 }
 0x4f1   : > { %v4946_v31 = vsel %vm4882_vm2, %v4850_v41, %v4914_v43  ;;  %vm4885_vm12 = vcmp.ge.f32.partialorder %v4853_v8, 0.0  ;;  %v4917_v18 = vmul.f32 0.01, %v4853_v8  ;;  %v4788_v19 = vmul.f32 %v7694_v44, %v4627_v51  ;;  %v5349_v34 = vpop.f32.mrf.mxu1  ;;  %v7974_v41 = vld [vmem:[#allocation13_spill] sm:$0xff]  ;;  %v7975_v51 = vld [vmem:[#allocation12_spill] sm:$0xff] }
 0x4f2   : > { %4978 = vst [vmem:[%s7726_s14 + $0xc0] sm:$0xff] %v4946_v31  ;;  %vm4884_vm13 = vcmp.ge.f32.partialorder %v4852_v15, 0.0  ;;  %v4916_v49 = vmul.f32 0.01, %v4852_v15  ;;  %v4855_v54 = vadd.f32 %v7703_v24, %v4816_v37  ;;  %v4622_v53 = vadd.f32 %v4621_v45, %v7596_v59  ;;  %v5307_v16 = vpop.f32.mrf.mxu0 }
 0x4f3   : > { %v4949_v20 = vsel %vm4885_vm12, %v4853_v8, %v4917_v18  ;;  %v4827_v11 = vadd.f32 %v7703_v24, %v4788_v19  ;;  %v4815_v57 = vmul.f32 %v7694_v44, %v4762_v12  ;;  %v4637_v28 = vadd.f32 %v5307_v16, %v7608_v7  ;;  %v4771_v29 = vpop.f32.mrf.mxu1  ;;  %v7976_v18 = vld [vmem:[#allocation15_spill] sm:$0xff] }
 0x4f4   : > { %4981 = vst [vmem:[%s7726_s14 + $0xd8] sm:$0xff] %v4949_v20  ;;  %v4948_v21 = vsel %vm4884_vm13, %v4852_v15, %v4916_v49  ;;  %vm4887_vm3 = vcmp.ge.f32.partialorder %v4855_v54, 0.0  ;;  %v4919_v39 = vmul.f32 0.01, %v4855_v54  ;;  %v4787_v42 = vmul.f32 %v7694_v44, %v4622_v53  ;;  %v4631_v3 = vpop.f32.mrf.mxu0 }
 0x4f5   : > { %4980 = vst [vmem:[%s7726_s14 + $0xd0] sm:$0xff] %v4948_v21  ;;  %vm4859_vm4 = vcmp.ge.f32.partialorder %v4827_v11, 0.0  ;;  %v4891_v59 = vmul.f32 0.01, %v4827_v11  ;;  %v4854_v36 = vadd.f32 %v7703_v24, %v4815_v57  ;;  %v4790_v40 = vmul.f32 %v7694_v44, %v4637_v28  ;;  %v7977_v21 = vld [vmem:[#allocation14_spill] sm:$0xff] }
 0x4f6   : > { %v4951_v33 = vsel %vm4887_vm3, %v4855_v54, %v4919_v39  ;;  %v4826_v50 = vadd.f32 %v7703_v24, %v4787_v42  ;;  %v4777_v7 = vadd.f32 %v5349_v34, %v4552_v10  ;;  %v4632_v6 = vadd.f32 %v4631_v3, %v7604_v58  ;;  %v5310_v56 = vpop.f32.mrf.mxu0  ;;  %v7978_v42 = vld [vmem:[#allocation17_spill] sm:$0xff] }
 0x4f7   : > { %v4923_v5 = vsel %vm4859_vm4, %v4827_v11, %v4891_v59  ;;  %4983 = vst [vmem:[%s7726_s14 + $0xe8] sm:$0xff] %v4951_v33  ;;  %vm4886_vm5 = vcmp.ge.f32.partialorder %v4854_v36, 0.0  ;;  %v4918_v22 = vmul.f32 0.01, %v4854_v36  ;;  %v4829_v1 = vadd.f32 %v7703_v24, %v4790_v40 }
 0x4f8   : > { %4955 = vst [vmem:[%s7726_s14 + $0x8] sm:$0xff] %v4923_v5  ;;  %vm4858_vm6 = vcmp.ge.f32.partialorder %v4826_v50, 0.0  ;;  %v4890_v30 = vmul.f32 0.01, %v4826_v50  ;;  %v4818_v0 = vmul.f32 %v7694_v44, %v4777_v7  ;;  %v4789_v14 = vmul.f32 %v7694_v44, %v4632_v6  ;;  %v4641_v26 = vpop.f32.mrf.mxu0 }
 0x4f9   : > { %v4950_v58 = vsel %vm4886_vm5, %v4854_v36, %v4918_v22  ;;  %vm4861_vm7 = vcmp.ge.f32.partialorder %v4829_v1, 0.0  ;;  %v4893_v4 = vmul.f32 0.01, %v4829_v1  ;;  %v4772_v63 = vadd.f32 %v4771_v29, %v4547_v48  ;;  %v7979_v29 = vld [vmem:[#allocation16_spill] sm:$0xff] }
 0x4fa   : > { %v4922_v17 = vsel %vm4858_vm6, %v4826_v50, %v4890_v30  ;;  %4982 = vst [vmem:[%s7726_s14 + $0xe0] sm:$0xff] %v4950_v58  ;;  %v4857_v9 = vadd.f32 %v7703_v24, %v4818_v0  ;;  %v4828_v2 = vadd.f32 %v7703_v24, %v4789_v14  ;;  %v4647_v52 = vadd.f32 %v5310_v56, %v7620_v32  ;;  %v5313_v62 = vpop.f32.mrf.mxu0 }
 0x4fb   : > { %4954 = vst [vmem:[%s7726_s14] sm:$0xff] %v4922_v17  ;;  %v4925_v35 = vsel %vm4861_vm7, %v4829_v1, %v4893_v4  ;;  %v4817_v46 = vmul.f32 %v7694_v44, %v4772_v63  ;;  %v4642_v25 = vadd.f32 %v4641_v26, %v7973_v60  ;;  %v4657_v27 = vadd.f32 %v5313_v62, %v7974_v41 }
 0x4fc   : > { %4957 = vst [vmem:[%s7726_s14 + $0x18] sm:$0xff] %v4925_v35  ;;  %vm4889_vm8 = vcmp.ge.f32.partialorder %v4857_v9, 0.0  ;;  %v4921_v47 = vmul.f32 0.01, %v4857_v9  ;;  %vm4860_vm9 = vcmp.ge.f32.partialorder %v4828_v2, 0.0  ;;  %v4651_v38 = vpop.f32.mrf.mxu0  ;;  %v4792_v32 = vmul.f32 %v7694_v44, %v4647_v52 }
 0x4fd   : > { %v4892_v48 = vmul.f32 0.01, %v4828_v2  ;;  %v4856_v13 = vadd.f32 %v7703_v24, %v4817_v46  ;;  %v4791_v23 = vmul.f32 %v7694_v44, %v4642_v25  ;;  %v4794_v61 = vmul.f32 %v7694_v44, %v4657_v27 }
 0x4fe   : > { %v4953_v43 = vsel %vm4889_vm8, %v4857_v9, %v4921_v47  ;;  %v4652_v55 = vadd.f32 %v4651_v38, %v7975_v51  ;;  %v5316_v10 = vpop.f32.mrf.mxu0  ;;  %v4831_v37 = vadd.f32 %v7703_v24, %v4792_v32 }
 0x4ff   : > { %v4924_v8 = vsel %vm4860_vm9, %v4828_v2, %v4892_v48  ;;  %4985 = vst [vmem:[%s7726_s14 + $0xf8] sm:$0xff] %v4953_v43  ;;  %vm4888_vm10 = vcmp.ge.f32.partialorder %v4856_v13, 0.0  ;;  %v4920_v15 = vmul.f32 0.01, %v4856_v13  ;;  %v4830_v45 = vadd.f32 %v7703_v24, %v4791_v23 }
 0x500   : > { %4956 = vst [vmem:[%s7726_s14 + $0x10] sm:$0xff] %v4924_v8  ;;  %v4833_v12 = vadd.f32 %v7703_v24, %v4794_v61  ;;  %v4793_v31 = vmul.f32 %v7694_v44, %v4652_v55  ;;  %v4667_v19 = vadd.f32 %v5316_v10, %v7976_v18  ;;  %v4661_v49 = vpop.f32.mrf.mxu0  ;;  %vm4863_vm11 = vcmp.ge.f32.partialorder %v4831_v37, 0.0 }
 0x501   : > { %v4952_v54 = vsel %vm4888_vm10, %v4856_v13, %v4920_v15  ;;  %v4895_v53 = vmul.f32 0.01, %v4831_v37  ;;  %vm4862_vm14 = vcmp.ge.f32.partialorder %v4830_v45, 0.0  ;;  %v4894_v16 = vmul.f32 0.01, %v4830_v45 }
 0x502   : > { %4984 = vst [vmem:[%s7726_s14 + $0xf0] sm:$0xff] %v4952_v54  ;;  %vm4865_vm15 = vcmp.ge.f32.partialorder %v4833_v12, 0.0  ;;  %v4897_v34 = vmul.f32 0.01, %v4833_v12  ;;  %v4832_v20 = vadd.f32 %v7703_v24, %v4793_v31  ;;  %v5319_v11 = vpop.f32.mrf.mxu0  ;;  %v4796_v28 = vmul.f32 %v7694_v44, %v4667_v19 }
 0x503   : > { %v4927_v57 = vsel %vm4863_vm11, %v4831_v37, %v4895_v53  ;;  %v4662_v39 = vadd.f32 %v4661_v49, %v7977_v21  ;;  %v4677_v3 = vadd.f32 %v5319_v11, %v7978_v42  ;;  %v4926_v59 = vsel %vm4862_vm14, %v4830_v45, %v4894_v16 }
 0x504   : > { %4959 = vst [vmem:[%s7726_s14 + $0x28] sm:$0xff] %v4927_v57  ;;  %v4929_v36 = vsel %vm4865_vm15, %v4833_v12, %v4897_v34  ;;  %vm4864_vm0 = vcmp.ge.f32.partialorder %v4832_v20, 0.0  ;;  %v4896_v40 = vmul.f32 0.01, %v4832_v20  ;;  %v4671_v33 = vpop.f32.mrf.mxu0  ;;  %4958 = vst [vmem:[%s7726_s14 + $0x20] sm:$0xff] %v4926_v59  ;;  %v4835_v50 = vadd.f32 %v7703_v24, %v4796_v28 }
 0x505   : > { %4961 = vst [vmem:[%s7726_s14 + $0x38] sm:$0xff] %v4929_v36  ;;  %v4795_v7 = vmul.f32 %v7694_v44, %v4662_v39  ;;  %v4798_v6 = vmul.f32 %v7694_v44, %v4677_v3  ;;  %v4672_v56 = vadd.f32 %v4671_v33, %v7979_v29 }
 0x506   : > { %v4928_v5 = vsel %vm4864_vm0, %v4832_v20, %v4896_v40  ;;  %vm4867_vm1 = vcmp.ge.f32.partialorder %v4835_v50, 0.0  ;;  %v4899_v22 = vmul.f32 0.01, %v4835_v50 }
 0x507   : > { %4960 = vst [vmem:[%s7726_s14 + $0x30] sm:$0xff] %v4928_v5  ;;  %v4834_v1 = vadd.f32 %v7703_v24, %v4795_v7  ;;  %v4837_v30 = vadd.f32 %v7703_v24, %v4798_v6  ;;  %v4797_v0 = vmul.f32 %v7694_v44, %v4672_v56 }
 0x508   : > { %v4931_v14 = vsel %vm4867_vm1, %v4835_v50, %v4899_v22 }
 0x509   : > { %vm4866_vm2 = vcmp.ge.f32.partialorder %v4834_v1, 0.0  ;;  %v4898_v26 = vmul.f32 0.01, %v4834_v1  ;;  %vm4869_vm12 = vcmp.ge.f32.partialorder %v4837_v30, 0.0  ;;  %4963 = vst [vmem:[%s7726_s14 + $0x48] sm:$0xff] %v4931_v14  ;;  %v4836_v4 = vadd.f32 %v7703_v24, %v4797_v0 }
 0x50a   : > { %v4901_v58 = vmul.f32 0.01, %v4837_v30 }
 0x50b   : > { %v4930_v63 = vsel %vm4866_vm2, %v4834_v1, %v4898_v26  ;;  %vm4868_vm13 = vcmp.ge.f32.partialorder %v4836_v4, 0.0  ;;  %v4900_v9 = vmul.f32 0.01, %v4836_v4 }
 0x50c   : > { %4962 = vst [vmem:[%s7726_s14 + $0x40] sm:$0xff] %v4930_v63  ;;  %v4933_v17 = vsel %vm4869_vm12, %v4837_v30, %v4901_v58 }
 0x50d   : > { %4965 = vst [vmem:[%s7726_s14 + $0x58] sm:$0xff] %v4933_v17  ;;  %v4932_v44 = vsel %vm4868_vm13, %v4836_v4, %v4900_v9 }
 0x50e   : > { %4964 = vst [vmem:[%s7726_s14 + $0x50] sm:$0xff] %v4932_v44 }
 0x50f   : > { %5491 = shalt.err (!%p5488_p0)
}
 0x510   : > { %s5492_s23 = scalar_lea.hbm %s7870_s19, 4096  ;;  %s5496_s14 = scalar_lea.hbm %s7926_s7, 8192 }
 0x511   : > { %p5493_p1 = scmp.ne.s32.totalorder %s7870_s19, %s5492_s23  ;;  %p5497_p4 = scmp.lt.s32.totalorder %s7870_s19, %s7926_s7 }
 0x512   : > { %p5498_p7 = scmp.lt.s32.totalorder %s5496_s14, %s5492_s23 }
 0x513   : > { %p5494_p2 = pnand %p5493_p1, %p5636_p5 }
 0x514   : > { %p5499_p6 = por %p5498_p7, %p5497_p4 }
 0x515   : > { %p5495_p3 = pneg %p5494_p2 }
 0x517   : > { %p5500_p8 = pnand %p5499_p6, %p5495_p3 }
 0x519   : > { %5503 = shalt.err (!%p5500_p8)
}
 0x51a   : > { %s5557_s18 = smov 128  }
 0x51b   : > { %5386 = dma.vmem_to_hbm [thread:$0]  (%p5636_p5), %s7873_s16, 4096, %s7870_s19, %s7878_s28, %s5557_s18, %s5557_s18, %s5549_s13  }
 0x51c PF: > { %p5398_p9 = scmp.ge.s32.totalorder %s5542_s27, 2  ;;  %s5015_s20 = sand.u32 1, %s5530_s24  }
 0x51d   : > { %p7980_p10 = scmp.ne.s32.totalorder %s7928_s12, 0  ;;  %s5016_s22 = scalar_lea.sflag [#allocation8], %s5015_s20 }
 0x51f   : > { %p5393_p11 = pnand %p5398_p9, %p7980_p10 }
 0x521   : > { %p5394_p12 = pneg %p5393_p11 }
 0x523   : > { %5525 = dma.done.wait (%p5394_p12), %s5016_s22, 4096  }
 0x524   : > { %5527 = vsyncadd (%p5394_p12), %s5016_s22, 4294963200  ;;  %p18_p13 = scmp.ge.s32.totalorder %s5623_s30, 4   ;;  %s7981_s24 = smov %s5534_s25 }
 0x525   : > { %s7982_s25 = smov %s5538_s26  ;;  %s7983_s26 = smov %s5634_s10 }
 0x526   : > { %s7984_s27 = smov %s5623_s30  ;;  %20 = sbr.rel (!%p18_p13) target bundleno = 4 (0x4), region = 92 }
 0x52b   :  { %5021 = vsyncpa [#allocation7], 1 }
 0x52c   :  { %5023 = vsyncpa [#allocation7 + $0x1], 1 }
 0x52d   :  { %5024 = vsyncpa [#allocation8], 1 }
 0x52e   :  { %5026 = vsyncpa [#allocation8 + $0x1], 1 }

</bundles_post_ra>
